<compile_context>
chip_gen: v7x
topology: tpu7x:2x2x1
jax: 0.10.0
libtpu: 0.0.40
codegen_flags: <defaults>
</compile_context>

<pallas_src>
import functools

import jax
import jax.numpy as jnp
from jax.experimental import pallas as pl
from jax.experimental.pallas import tpu as pltpu


def _fourier_loss_kernel(mw_ref, mh_ref, x_ref, y_ref, amp_ref, ph_ref, *,
                         use_l2, fused_phase, g, h, w):
    inner = pl.program_id(1)

    # Output blocks are resident across the inner sweep (index map depends only
    # on the outer axis): zero them once per chunk, accumulate every step.
    @pl.when(inner == 0)
    def _():
        amp_ref[...] = jnp.zeros_like(amp_ref)
        ph_ref[...] = jnp.zeros_like(ph_ref)

    cw = mw_ref[0]       # (W, W)   cos(2*pi*w*v/W)
    msw = mw_ref[1]      # (W, W)  -sin(2*pi*w*v/W)
    ch = mh_ref[0]       # (H, H)   cos(2*pi*h*u/H)
    sh = mh_ref[1]       # (H, H)   sin(2*pi*h*u/H)
    dt = cw.dtype

    def fft2_re_im(img_ref):
        # Stage A: W-direction DFT -- two big (G*H, W) x (W, W) matmuls.
        x2 = img_ref[...].reshape(g * h, w)
        tr = jnp.dot(x2, cw, preferred_element_type=jnp.float32)    # (G*H, W)
        ti = jnp.dot(x2, msw, preferred_element_type=jnp.float32)   # (G*H, W)
        # Per-image minor-dim transpose (XLU) so the H axis lands on lanes.
        trT = jnp.swapaxes(tr.reshape(g, h, w), 1, 2).reshape(g * w, h).astype(dt)
        tiT = jnp.swapaxes(ti.reshape(g, h, w), 1, 2).reshape(g * w, h).astype(dt)
        # Stage B: H-direction DFT -- four lane-dense (G*W, H) x (H, H) matmuls.
        a = jnp.dot(trT, ch, preferred_element_type=jnp.float32)
        b = jnp.dot(trT, sh, preferred_element_type=jnp.float32)
        c = jnp.dot(tiT, ch, preferred_element_type=jnp.float32)
        d = jnp.dot(tiT, sh, preferred_element_type=jnp.float32)
        return a + d, c - b          # Re(F)^T, Im(F)^T, each (G*W, H), f32

    re_x, im_x = fft2_re_im(x_ref)
    re_y, im_y = fft2_re_im(y_ref)

    mag_x = jnp.sqrt(re_x * re_x + im_x * im_x)     # |FFT2(input)|
    mag_y = jnp.sqrt(re_y * re_y + im_y * im_y)     # |FFT2(target)|
    d_mag = mag_x - mag_y

    if fused_phase:
        # angle(Fx * conj(Fy)): one atan2 per pair.  Differs from
        # angle(Fx) - angle(Fy) when the phase difference wraps past +/-pi.
        d_ang = jnp.arctan2(im_x * re_y - re_x * im_y,
                            re_x * re_y + im_x * im_y)
    else:
        d_ang = jnp.arctan2(im_x, re_x) - jnp.arctan2(im_y, re_y)

    if use_l2:
        amp_term = d_mag * d_mag
        ph_term = d_ang * d_ang
    else:
        amp_term = jnp.abs(d_mag)
        ph_term = jnp.abs(d_ang)

    # Lane then sublane reduce (XLU, otherwise idle) -> accumulate the scalar
    # into the resident (1,1,1) output block.  One HBM writeback per chunk.
    amp_s = jnp.sum(jnp.sum(amp_term, axis=1, keepdims=True), axis=0, keepdims=True)
    ph_s = jnp.sum(jnp.sum(ph_term, axis=1, keepdims=True), axis=0, keepdims=True)
    amp_ref[...] += amp_s.reshape(1, 1, 1)
    ph_ref[...] += ph_s.reshape(1, 1, 1)


def _tpu_generation():
    try:
        kind = jax.devices()[0].device_kind.lower()
    except Exception:
        return 0
    if "v7" in kind or "7x" in kind:
        return 7
    if "v6" in kind:
        return 6
    if "v5" in kind:
        return 5
    return 0


def combined_fourier_loss(x, y, *, amplitude_weight=1.0, phase_weight=1.0,
                          loss_type='l1', dft_dtype=None, fused_phase=False):
    if loss_type not in ('l1', 'l2'):
        raise ValueError("Invalid loss_type. Use 'l1' or 'l2'.")
    if x.shape != y.shape:
        raise ValueError("input/target shape mismatch")
    B, C, H, W = x.shape
    N = B * C

    gen = _tpu_generation()
    if dft_dtype is None:
        # bf16 DFT matmuls (f32 accumulation) on v6e/v7x MXU; f32 elsewhere.
        # NOTE: bf16 adds a rounding step between the two DFT stages vs the
        # pure-f32 reference; pass dft_dtype=jnp.float32 for bit-parity checks.
        dft_dtype = jnp.bfloat16 if gen in (6, 7) else jnp.float32
    itemsize = jnp.dtype(dft_dtype).itemsize

    xf = x.reshape(N, H, W).astype(dft_dtype)
    yf = y.reshape(N, H, W).astype(dft_dtype)

    # --- generation-aware VMEM budget & chunk size G (image pairs per step) --
    vmem_hard = (52 << 20) if gen == 7 else ((100 << 20) if gen in (5, 6)
                                             else (48 << 20))
    mats_bytes = 2 * (W * W + H * H) * itemsize          # (2,W,W) + (2,H,H)
    # Per image pair: x+y input blocks (double-buffered) + f32 intermediates
    # (tr/ti, transposes, 4 stage-B products, re/im/mag/ang, both-side overlap)
    # with ~25% slack so the limit is not undercounted.
    per_pair = H * W * (4 * itemsize + 80)
    budget = vmem_hard - 2 * mats_bytes - (6 << 20)
    g_cap = int(max(1, min(N, 256, budget // per_pair)))

    # --- chunking: minimise zero-image padding; 2-way outer split on v7x only
    n_outer = 2 if (gen == 7 and N >= 2) else 1
    n_chunks = max(n_outer, -(-N // g_cap))
    n_chunks = -(-n_chunks // n_outer) * n_outer
    G = -(-N // n_chunks)
    n_inner = n_chunks // n_outer
    N_pad = n_chunks * G
    if N_pad > N:        # zero images contribute exactly 0 to both losses
        pad = ((0, N_pad - N), (0, 0), (0, 0))
        xf = jnp.pad(xf, pad)
        yf = jnp.pad(yf, pad)

    # --- DFT matrices (cos/sin kept separate: no in-kernel lane slicing) -----
    h_idx = jnp.arange(H, dtype=jnp.float32)
    w_idx = jnp.arange(W, dtype=jnp.float32)
    ang_h = (2.0 * jnp.pi / H) * jnp.outer(h_idx, h_idx)
    ang_w = (2.0 * jnp.pi / W) * jnp.outer(w_idx, w_idx)
    mw = jnp.stack([jnp.cos(ang_w), -jnp.sin(ang_w)]).astype(dft_dtype)  # (2,W,W)
    mh = jnp.stack([jnp.cos(ang_h), jnp.sin(ang_h)]).astype(dft_dtype)   # (2,H,H)

    kernel = functools.partial(_fourier_loss_kernel,
                               use_l2=(loss_type == 'l2'),
                               fused_phase=fused_phase, g=G, h=H, w=W)

    # --- cost estimate + VMEM limit ------------------------------------------
    flops = int(N_pad * 2 * (4 * H * W * W + 8 * H * H * W)
                + N_pad * 2 * H * W * 12)
    transcendentals = int(N_pad * H * W * (3 if fused_phase else 4))
    bytes_accessed = int(2 * N_pad * H * W * itemsize + 2 * mats_bytes
                         + n_chunks * 2 * 4)
    cost = pl.CostEstimate(flops=flops, transcendentals=transcendentals,
                           bytes_accessed=bytes_accessed)
    vmem_limit = int(min(vmem_hard,
                         max(32 << 20,
                             2 * mats_bytes + G * per_pair + (4 << 20))))

    grid_spec = pltpu.PrefetchScalarGridSpec(
        num_scalar_prefetch=0,
        grid=(n_outer, n_inner),
        in_specs=[
            # Grid-invariant DFT matrices (block index never changes -> no
            # per-step re-fetch by the pipeline).
            pl.BlockSpec((2, W, W), lambda o, i: (0, 0, 0)),
            pl.BlockSpec((2, H, H), lambda o, i: (0, 0, 0)),
            # G image pairs per step; chunk index = o * n_inner + i.
            pl.BlockSpec((G, H, W), lambda o, i: (o * n_inner + i, 0, 0)),
            pl.BlockSpec((G, H, W), lambda o, i: (o * n_inner + i, 0, 0)),
        ],
        out_specs=(pl.BlockSpec((1, 1, 1), lambda o, i: (o, 0, 0)),
                   pl.BlockSpec((1, 1, 1), lambda o, i: (o, 0, 0))),
    )

    amp_part, ph_part = pl.pallas_call(
        kernel,
        out_shape=(jax.ShapeDtypeStruct((n_outer, 1, 1), jnp.float32),
                   jax.ShapeDtypeStruct((n_outer, 1, 1), jnp.float32)),
        grid_spec=grid_spec,
        compiler_params=pltpu.CompilerParams(
            dimension_semantics=("parallel", "arbitrary"),
            vmem_limit_bytes=vmem_limit),
        cost_estimate=cost,
    )(mw, mh, xf, yf)

    denom = jnp.float32(N * H * W)          # mean over all elements
    amp_loss = jnp.sum(amp_part) / denom
    ph_loss = jnp.sum(ph_part) / denom
    return amplitude_weight * amp_loss + phase_weight * ph_loss


if __name__ == "__main__":
    key = jax.random.PRNGKey(0)
    kx, ky = jax.random.split(key)
    B, C, H, W = 2, 4, 16, 16
    x = jax.random.normal(kx, (B, C, H, W), dtype=jnp.float32)
    y = jax.random.normal(ky, (B, C, H, W), dtype=jnp.float32)

    loss = combined_fourier_loss(x, y, amplitude_weight=1.0,
                                 phase_weight=1.0, loss_type='l1')
    jax.block_until_ready(loss)
    print("KERNEL_OK")
</pallas_src>

<mosaic_0001>
module attributes {stable_mosaic.version = 11 : i64} {
  func.func @_fourier_loss_kernel(%arg0: i32, %arg1: i32, %arg2: memref<2x16x16xf32, #tpu.memory_space<vmem>>, %arg3: memref<2x16x16xf32, #tpu.memory_space<vmem>>, %arg4: memref<8x16x16xf32, #tpu.memory_space<vmem>>, %arg5: memref<8x16x16xf32, #tpu.memory_space<vmem>>, %arg6: memref<1x1x1xf32, #tpu.memory_space<vmem>>, %arg7: memref<1x1x1xf32, #tpu.memory_space<vmem>>) attributes {dimension_semantics = [#tpu.dimension_semantics<parallel>, #tpu.dimension_semantics<arbitrary>], iteration_bounds = array<i64: 1, 1>, scalar_prefetch = 0 : i64, scratch_operands = 0 : i64, tpu.core_type = #tpu.core_type<tc>, window_params = [{pipeline_mode = #tpu.pipeline_mode<synchronous>, transform_indices = @transform_0, window_bounds = array<i64: 2, 16, 16>}, {pipeline_mode = #tpu.pipeline_mode<synchronous>, transform_indices = @transform_1, window_bounds = array<i64: 2, 16, 16>}, {transform_indices = @transform_2, window_bounds = array<i64: 8, 16, 16>}, {transform_indices = @transform_3, window_bounds = array<i64: 8, 16, 16>}, {transform_indices = @transform_4, window_bounds = array<i64: 1, 1, 1>}, {transform_indices = @transform_5, window_bounds = array<i64: 1, 1, 1>}]} {
    %c0_i32 = arith.constant 0 : i32
    %0 = arith.cmpi eq, %arg1, %c0_i32 : i32
    %1 = arith.extui %0 : i1 to i32
    %c0_i32_0 = arith.constant 0 : i32
    %2 = arith.cmpi ne, %1, %c0_i32_0 : i32
    scf.if %2 {
      %cst_44 = arith.constant 0.000000e+00 : f32
      %73 = vector.broadcast %cst_44 : f32 to vector<1x1x1xf32>
      %c0_45 = arith.constant 0 : index
      %c0_46 = arith.constant 0 : index
      %c0_47 = arith.constant 0 : index
      %74 = vector.load %arg6[%c0_45, %c0_46, %c0_47] : memref<1x1x1xf32, #tpu.memory_space<vmem>>, vector<1x1x1xf32>
      tpu.vector_store %arg6[%c0_45, %c0_46, %c0_47], %73 {strides = array<i32>} : memref<1x1x1xf32, #tpu.memory_space<vmem>>, vector<1x1x1xf32>,
      %cst_48 = arith.constant 0.000000e+00 : f32
      %75 = vector.broadcast %cst_48 : f32 to vector<1x1x1xf32>
      %c0_49 = arith.constant 0 : index
      %c0_50 = arith.constant 0 : index
      %c0_51 = arith.constant 0 : index
      %76 = vector.load %arg7[%c0_49, %c0_50, %c0_51] : memref<1x1x1xf32, #tpu.memory_space<vmem>>, vector<1x1x1xf32>
      tpu.vector_store %arg7[%c0_49, %c0_50, %c0_51], %75 {strides = array<i32>} : memref<1x1x1xf32, #tpu.memory_space<vmem>>, vector<1x1x1xf32>,
    } else {
    }
    %c0 = arith.constant 0 : index
    %c0_1 = arith.constant 0 : index
    %c0_2 = arith.constant 0 : index
    %3 = vector.load %arg2[%c0, %c0_1, %c0_2] : memref<2x16x16xf32, #tpu.memory_space<vmem>>, vector<1x16x16xf32>
    %4 = vector.shape_cast %3 : vector<1x16x16xf32> to vector<16x16xf32>
    %c1 = arith.constant 1 : index
    %c0_3 = arith.constant 0 : index
    %c0_4 = arith.constant 0 : index
    %5 = vector.load %arg2[%c1, %c0_3, %c0_4] : memref<2x16x16xf32, #tpu.memory_space<vmem>>, vector<1x16x16xf32>
    %6 = vector.shape_cast %5 : vector<1x16x16xf32> to vector<16x16xf32>
    %c0_5 = arith.constant 0 : index
    %c0_6 = arith.constant 0 : index
    %c0_7 = arith.constant 0 : index
    %7 = vector.load %arg3[%c0_5, %c0_6, %c0_7] : memref<2x16x16xf32, #tpu.memory_space<vmem>>, vector<1x16x16xf32>
    %8 = vector.shape_cast %7 : vector<1x16x16xf32> to vector<16x16xf32>
    %c1_8 = arith.constant 1 : index
    %c0_9 = arith.constant 0 : index
    %c0_10 = arith.constant 0 : index
    %9 = vector.load %arg3[%c1_8, %c0_9, %c0_10] : memref<2x16x16xf32, #tpu.memory_space<vmem>>, vector<1x16x16xf32>
    %10 = vector.shape_cast %9 : vector<1x16x16xf32> to vector<16x16xf32>
    %c0_11 = arith.constant 0 : index
    %c0_12 = arith.constant 0 : index
    %c0_13 = arith.constant 0 : index
    %11 = vector.load %arg4[%c0_11, %c0_12, %c0_13] : memref<8x16x16xf32, #tpu.memory_space<vmem>>, vector<8x16x16xf32>
    %12 = vector.shape_cast %11 : vector<8x16x16xf32> to vector<128x16xf32>
    %cst = arith.constant dense<0.000000e+00> : vector<128x16xf32>
    %13 = tpu.matmul %12, %4, %cst {dimension_numbers = #tpu.dot_dimension_numbers<[1], [0], [0], [1], [0, 0, 1, 1], [], []>} : vector<128x16xf32>, vector<16x16xf32>, vector<128x16xf32> -> vector<128x16xf32>
    %cst_14 = arith.constant dense<0.000000e+00> : vector<128x16xf32>
    %14 = tpu.matmul %12, %6, %cst_14 {dimension_numbers = #tpu.dot_dimension_numbers<[1], [0], [0], [1], [0, 0, 1, 1], [], []>} : vector<128x16xf32>, vector<16x16xf32>, vector<128x16xf32> -> vector<128x16xf32>
    %15 = vector.shape_cast %13 : vector<128x16xf32> to vector<8x16x16xf32>
    %16 = tpu.transpose %15, [0, 2, 1] : vector<8x16x16xf32> -> vector<8x16x16xf32>
    %17 = vector.shape_cast %16 : vector<8x16x16xf32> to vector<128x16xf32>
    %18 = vector.shape_cast %14 : vector<128x16xf32> to vector<8x16x16xf32>
    %19 = tpu.transpose %18, [0, 2, 1] : vector<8x16x16xf32> -> vector<8x16x16xf32>
    %20 = vector.shape_cast %19 : vector<8x16x16xf32> to vector<128x16xf32>
    %cst_15 = arith.constant dense<0.000000e+00> : vector<128x16xf32>
    %21 = tpu.matmul %17, %8, %cst_15 {dimension_numbers = #tpu.dot_dimension_numbers<[1], [0], [0], [1], [0, 0, 1, 1], [], []>} : vector<128x16xf32>, vector<16x16xf32>, vector<128x16xf32> -> vector<128x16xf32>
    %cst_16 = arith.constant dense<0.000000e+00> : vector<128x16xf32>
    %22 = tpu.matmul %17, %10, %cst_16 {dimension_numbers = #tpu.dot_dimension_numbers<[1], [0], [0], [1], [0, 0, 1, 1], [], []>} : vector<128x16xf32>, vector<16x16xf32>, vector<128x16xf32> -> vector<128x16xf32>
    %cst_17 = arith.constant dense<0.000000e+00> : vector<128x16xf32>
    %23 = tpu.matmul %20, %8, %cst_17 {dimension_numbers = #tpu.dot_dimension_numbers<[1], [0], [0], [1], [0, 0, 1, 1], [], []>} : vector<128x16xf32>, vector<16x16xf32>, vector<128x16xf32> -> vector<128x16xf32>
    %cst_18 = arith.constant dense<0.000000e+00> : vector<128x16xf32>
    %24 = tpu.matmul %20, %10, %cst_18 {dimension_numbers = #tpu.dot_dimension_numbers<[1], [0], [0], [1], [0, 0, 1, 1], [], []>} : vector<128x16xf32>, vector<16x16xf32>, vector<128x16xf32> -> vector<128x16xf32>
    %25 = arith.addf %21, %24 : vector<128x16xf32>
    %26 = arith.subf %23, %22 : vector<128x16xf32>
    %c0_19 = arith.constant 0 : index
    %c0_20 = arith.constant 0 : index
    %c0_21 = arith.constant 0 : index
    %27 = vector.load %arg5[%c0_19, %c0_20, %c0_21] : memref<8x16x16xf32, #tpu.memory_space<vmem>>, vector<8x16x16xf32>
    %28 = vector.shape_cast %27 : vector<8x16x16xf32> to vector<128x16xf32>
    %cst_22 = arith.constant dense<0.000000e+00> : vector<128x16xf32>
    %29 = tpu.matmul %28, %4, %cst_22 {dimension_numbers = #tpu.dot_dimension_numbers<[1], [0], [0], [1], [0, 0, 1, 1], [], []>} : vector<128x16xf32>, vector<16x16xf32>, vector<128x16xf32> -> vector<128x16xf32>
    %cst_23 = arith.constant dense<0.000000e+00> : vector<128x16xf32>
    %30 = tpu.matmul %28, %6, %cst_23 {dimension_numbers = #tpu.dot_dimension_numbers<[1], [0], [0], [1], [0, 0, 1, 1], [], []>} : vector<128x16xf32>, vector<16x16xf32>, vector<128x16xf32> -> vector<128x16xf32>
    %31 = vector.shape_cast %29 : vector<128x16xf32> to vector<8x16x16xf32>
    %32 = tpu.transpose %31, [0, 2, 1] : vector<8x16x16xf32> -> vector<8x16x16xf32>
    %33 = vector.shape_cast %32 : vector<8x16x16xf32> to vector<128x16xf32>
    %34 = vector.shape_cast %30 : vector<128x16xf32> to vector<8x16x16xf32>
    %35 = tpu.transpose %34, [0, 2, 1] : vector<8x16x16xf32> -> vector<8x16x16xf32>
    %36 = vector.shape_cast %35 : vector<8x16x16xf32> to vector<128x16xf32>
    %cst_24 = arith.constant dense<0.000000e+00> : vector<128x16xf32>
    %37 = tpu.matmul %33, %8, %cst_24 {dimension_numbers = #tpu.dot_dimension_numbers<[1], [0], [0], [1], [0, 0, 1, 1], [], []>} : vector<128x16xf32>, vector<16x16xf32>, vector<128x16xf32> -> vector<128x16xf32>
    %cst_25 = arith.constant dense<0.000000e+00> : vector<128x16xf32>
    %38 = tpu.matmul %33, %10, %cst_25 {dimension_numbers = #tpu.dot_dimension_numbers<[1], [0], [0], [1], [0, 0, 1, 1], [], []>} : vector<128x16xf32>, vector<16x16xf32>, vector<128x16xf32> -> vector<128x16xf32>
    %cst_26 = arith.constant dense<0.000000e+00> : vector<128x16xf32>
    %39 = tpu.matmul %36, %8, %cst_26 {dimension_numbers = #tpu.dot_dimension_numbers<[1], [0], [0], [1], [0, 0, 1, 1], [], []>} : vector<128x16xf32>, vector<16x16xf32>, vector<128x16xf32> -> vector<128x16xf32>
    %cst_27 = arith.constant dense<0.000000e+00> : vector<128x16xf32>
    %40 = tpu.matmul %36, %10, %cst_27 {dimension_numbers = #tpu.dot_dimension_numbers<[1], [0], [0], [1], [0, 0, 1, 1], [], []>} : vector<128x16xf32>, vector<16x16xf32>, vector<128x16xf32> -> vector<128x16xf32>
    %41 = arith.addf %37, %40 : vector<128x16xf32>
    %42 = arith.subf %39, %38 : vector<128x16xf32>
    %43 = arith.mulf %25, %25 : vector<128x16xf32>
    %44 = arith.mulf %26, %26 : vector<128x16xf32>
    %45 = arith.addf %43, %44 : vector<128x16xf32>
    %46 = math.sqrt %45 : vector<128x16xf32>
    %47 = arith.mulf %41, %41 : vector<128x16xf32>
    %48 = arith.mulf %42, %42 : vector<128x16xf32>
    %49 = arith.addf %47, %48 : vector<128x16xf32>
    %50 = math.sqrt %49 : vector<128x16xf32>
    %51 = arith.subf %46, %50 : vector<128x16xf32>
    %52 = math.atan2 %26, %25 : vector<128x16xf32>
    %53 = math.atan2 %42, %41 : vector<128x16xf32>
    %54 = arith.subf %52, %53 : vector<128x16xf32>
    %55 = math.absf %51 : vector<128x16xf32>
    %56 = math.absf %54 : vector<128x16xf32>
    %cst_28 = arith.constant dense<0.000000e+00> : vector<128xf32>
    %57 = vector.multi_reduction <add>, %55, %cst_28 [1] : vector<128x16xf32> to vector<128xf32>
    %58 = vector.shape_cast %57 : vector<128xf32> to vector<128x1xf32>
    %cst_29 = arith.constant dense<0.000000e+00> : vector<1xf32>
    %59 = vector.multi_reduction <add>, %58, %cst_29 [0] : vector<128x1xf32> to vector<1xf32>
    %60 = vector.shape_cast %59 : vector<1xf32> to vector<1x1xf32>
    %cst_30 = arith.constant dense<0.000000e+00> : vector<128xf32>
    %61 = vector.multi_reduction <add>, %56, %cst_30 [1] : vector<128x16xf32> to vector<128xf32>
    %62 = vector.shape_cast %61 : vector<128xf32> to vector<128x1xf32>
    %cst_31 = arith.constant dense<0.000000e+00> : vector<1xf32>
    %63 = vector.multi_reduction <add>, %62, %cst_31 [0] : vector<128x1xf32> to vector<1xf32>
    %64 = vector.shape_cast %63 : vector<1xf32> to vector<1x1xf32>
    %c0_32 = arith.constant 0 : index
    %c0_33 = arith.constant 0 : index
    %c0_34 = arith.constant 0 : index
    %65 = vector.load %arg6[%c0_32, %c0_33, %c0_34] : memref<1x1x1xf32, #tpu.memory_space<vmem>>, vector<1x1x1xf32>
    %66 = vector.shape_cast %60 : vector<1x1xf32> to vector<1x1x1xf32>
    %67 = arith.addf %65, %66 : vector<1x1x1xf32>
    %c0_35 = arith.constant 0 : index
    %c0_36 = arith.constant 0 : index
    %c0_37 = arith.constant 0 : index
    %68 = vector.load %arg6[%c0_35, %c0_36, %c0_37] : memref<1x1x1xf32, #tpu.memory_space<vmem>>, vector<1x1x1xf32>
    tpu.vector_store %arg6[%c0_35, %c0_36, %c0_37], %67 {strides = array<i32>} : memref<1x1x1xf32, #tpu.memory_space<vmem>>, vector<1x1x1xf32>,
    %c0_38 = arith.constant 0 : index
    %c0_39 = arith.constant 0 : index
    %c0_40 = arith.constant 0 : index
    %69 = vector.load %arg7[%c0_38, %c0_39, %c0_40] : memref<1x1x1xf32, #tpu.memory_space<vmem>>, vector<1x1x1xf32>
    %70 = vector.shape_cast %64 : vector<1x1xf32> to vector<1x1x1xf32>
    %71 = arith.addf %69, %70 : vector<1x1x1xf32>
    %c0_41 = arith.constant 0 : index
    %c0_42 = arith.constant 0 : index
    %c0_43 = arith.constant 0 : index
    %72 = vector.load %arg7[%c0_41, %c0_42, %c0_43] : memref<1x1x1xf32, #tpu.memory_space<vmem>>, vector<1x1x1xf32>
    tpu.vector_store %arg7[%c0_41, %c0_42, %c0_43], %71 {strides = array<i32>} : memref<1x1x1xf32, #tpu.memory_space<vmem>>, vector<1x1x1xf32>,
    return
  }
  func.func @transform_0(%arg0: i32, %arg1: i32) -> (i32, i32, i32) {
    %c0_i32 = arith.constant 0 : i32
    %c0_i32_0 = arith.constant 0 : i32
    %c0_i32_1 = arith.constant 0 : i32
    %c0_i32_2 = arith.constant 0 : i32
    return %c0_i32, %c0_i32_0, %c0_i32_1 : i32, i32, i32
  }
  func.func @transform_1(%arg0: i32, %arg1: i32) -> (i32, i32, i32) {
    %c0_i32 = arith.constant 0 : i32
    %c0_i32_0 = arith.constant 0 : i32
    %c0_i32_1 = arith.constant 0 : i32
    %c0_i32_2 = arith.constant 0 : i32
    return %c0_i32, %c0_i32_0, %c0_i32_1 : i32, i32, i32
  }
  func.func @transform_2(%arg0: i32, %arg1: i32) -> (i32, i32, i32) {
    %c1_i32 = arith.constant 1 : i32
    %0 = arith.muli %arg0, %c1_i32 : i32
    %1 = arith.addi %0, %arg1 : i32
    %c0_i32 = arith.constant 0 : i32
    %c0_i32_0 = arith.constant 0 : i32
    %c0_i32_1 = arith.constant 0 : i32
    return %1, %c0_i32, %c0_i32_0 : i32, i32, i32
  }
  func.func @transform_3(%arg0: i32, %arg1: i32) -> (i32, i32, i32) {
    %c1_i32 = arith.constant 1 : i32
    %0 = arith.muli %arg0, %c1_i32 : i32
    %1 = arith.addi %0, %arg1 : i32
    %c0_i32 = arith.constant 0 : i32
    %c0_i32_0 = arith.constant 0 : i32
    %c0_i32_1 = arith.constant 0 : i32
    return %1, %c0_i32, %c0_i32_0 : i32, i32, i32
  }
  func.func @transform_4(%arg0: i32, %arg1: i32) -> (i32, i32, i32) {
    %c0_i32 = arith.constant 0 : i32
    %c0_i32_0 = arith.constant 0 : i32
    %c0_i32_1 = arith.constant 0 : i32
    return %arg0, %c0_i32, %c0_i32_0 : i32, i32, i32
  }
  func.func @transform_5(%arg0: i32, %arg1: i32) -> (i32, i32, i32) {
    %c0_i32 = arith.constant 0 : i32
    %c0_i32_0 = arith.constant 0 : i32
    %c0_i32_1 = arith.constant 0 : i32
    return %arg0, %c0_i32, %c0_i32_0 : i32, i32, i32
  }
}

</mosaic_0001>

<bundles_post_ra>
// kernel: tpu_custom_call.1
= control target key start
LH: loop header
LB: loop body
LE: loop exit
PB: predicated region body
PF: predicated region fallthrough
CT: control target
= control target key end

     0   :  { %11 = vsyncpa [#allocation3], 0  ;;  %s9820_s0 = inlined_call_operand.hbm [shape: f32[2,16,16], index: 0, kind: input, shape index: {}]   ;;  %s9821_s1 = inlined_call_operand.hbm [shape: f32[2,16,16], index: 1, kind: input, shape index: {}]   ;;  %s9822_s2 = inlined_call_operand.hbm [shape: f32[8,16,16], index: 2, kind: input, shape index: {}]   ;;  %s9823_s3 = inlined_call_operand.hbm [shape: f32[8,16,16], index: 3, kind: input, shape index: {}]   ;;  %s9824_s4 = inlined_call_operand.hbm [shape: f32[1,1,1], index: 4, kind: output, shape index: {0}]   ;;  %s9825_s5 = inlined_call_operand.hbm [shape: f32[1,1,1], index: 5, kind: output, shape index: {1}]  }
   0x1   :  { %12 = vsyncpa [#allocation6], 0 }
   0x2   :  { %13 = vsyncpa [#allocation9], 0 }
   0x3   :  { %14 = vsyncpa [#allocation4], 0 }
   0x4   :  { %15 = vsyncpa [#allocation12], 0  ;;  %s6392_s18 = smov [#allocation5]   ;;  %s6393_s20 = smov [#allocation2]  }
   0x5   :  { %s33_s19 = sshll.u32 %s6392_s18, 4  ;;  %s21_s21 = sshll.u32 %s6393_s20, 4  ;;  %s34_s19 = int_to_ptr.vmem [resolvable:$true] %s33_s19  ;;  %s6432_s21 = int_to_ptr.vmem [resolvable:$true] %s21_s21 }
   0x6   :  { %s6250_s24 = scalar_lea.hbm %s9821_s1, 512 }
   0x7   :  { %p6251_p0 = scmp.ne.s32.totalorder %s9821_s1, %s6250_s24  ;;  %p6254_p1 = scmp.lt.u32.totalorder %s6250_s24, %s9821_s1 }
   0x9   :  { %p6256_p2 = pnand %p6254_p1, %p6251_p0 }
   0xb   :  { %6259 = shalt.err (!%p6256_p2)
}
   0xc   :  { %s6260_s29 = scalar_lea.vmem %s34_s19, 512  ;;  %p6265_p4 = scmp.lt.s32.totalorder %s34_s19, %s34_s19 }
   0xd   :  { %p6261_p3 = scmp.ne.s32.totalorder %s34_s19, %s6260_s29  ;;  %p6266_p5 = scmp.lt.s32.totalorder %s6260_s29, %s6260_s29 }
   0xf   :  { %p6267_p6 = por %p6266_p5, %p6265_p4 }
  0x11   :  { %p6268_p7 = pnand %p6267_p6, %p6261_p3 }
  0x13   :  { %6271 = shalt.err (!%p6268_p7)
}
  0x14   :  { %s6394_s30 = smov 128   ;;  %s6395_s6 = smov 8  }
  0x15   :  { %39 = dma.hbm_to_vmem [thread:$0]  %s9821_s1, 512, %s34_s19, [#allocation6], %s6394_s30, %s6394_s30, %s6395_s6  }
  0x16   :  { %s6272_s11 = scalar_lea.hbm %s9820_s0, 512 }
  0x17   :  { %p6273_p8 = scmp.ne.s32.totalorder %s9820_s0, %s6272_s11  ;;  %p6276_p9 = scmp.lt.u32.totalorder %s6272_s11, %s9820_s0 }
  0x19   :  { %p6278_p10 = pnand %p6276_p9, %p6273_p8 }
  0x1b   :  { %6281 = shalt.err (!%p6278_p10)
}
  0x1c   :  { %s6282_s16 = scalar_lea.vmem %s6432_s21, 512  ;;  %p6287_p12 = scmp.lt.s32.totalorder %s6432_s21, %s6432_s21 }
  0x1d   :  { %p6283_p11 = scmp.ne.s32.totalorder %s6432_s21, %s6282_s16  ;;  %p6288_p13 = scmp.lt.s32.totalorder %s6282_s16, %s6282_s16 }
  0x1f   :  { %p6289_p0 = por %p6288_p13, %p6287_p12 }
  0x21   :  { %p6290_p1 = pnand %p6289_p0, %p6283_p11 }
  0x23   :  { %6293 = shalt.err (!%p6290_p1)
}
  0x24   :  { %27 = dma.hbm_to_vmem [thread:$0]  %s9820_s0, 512, %s6432_s21, [#allocation3], %s6394_s30, %s6394_s30, %s6395_s6  }
  0x25   :  { %s6396_s18 = smov [#allocation7]   ;;  %s6397_s20 = smov [#allocation8]  }
  0x26   :  { %s50_s19 = sshll.u32 %s6396_s18, 4  ;;  %s67_s22 = sshll.u32 %s6397_s20, 4  ;;  %s51_s19 = int_to_ptr.vmem [resolvable:$true] %s50_s19  ;;  %s6469_s22 = int_to_ptr.vmem [resolvable:$true] %s67_s22 }
  0x27   :  { %s6294_s25 = scalar_lea.hbm %s9822_s2, 2048 }
  0x28   :  { %p6295_p2 = scmp.ne.s32.totalorder %s9822_s2, %s6294_s25  ;;  %p6298_p3 = scmp.lt.u32.totalorder %s6294_s25, %s9822_s2 }
  0x2a   :  { %p6300_p4 = pnand %p6298_p3, %p6295_p2 }
  0x2c   :  { %6303 = shalt.err (!%p6300_p4)
}
  0x2d   :  { %s6304_s0 = scalar_lea.vmem %s51_s19, 2048  ;;  %p6309_p6 = scmp.lt.s32.totalorder %s51_s19, %s51_s19 }
  0x2e   :  { %p6305_p5 = scmp.ne.s32.totalorder %s51_s19, %s6304_s0  ;;  %p6310_p7 = scmp.lt.s32.totalorder %s6304_s0, %s6304_s0 }
  0x30   :  { %p6311_p8 = por %p6310_p7, %p6309_p6 }
  0x32   :  { %p6312_p9 = pnand %p6311_p8, %p6305_p5 }
  0x34   :  { %6315 = shalt.err (!%p6312_p9)
}
  0x35   :  { %56 = dma.hbm_to_vmem [thread:$0]  %s9822_s2, 2048, %s51_s19, [#allocation6], %s6394_s30, %s6394_s30, %s6395_s6  }
  0x36   :  { %s6316_s10 = scalar_lea.hbm %s9823_s3, 2048 }
  0x37   :  { %p6317_p10 = scmp.ne.s32.totalorder %s9823_s3, %s6316_s10  ;;  %p6320_p11 = scmp.lt.u32.totalorder %s6316_s10, %s9823_s3 }
  0x39   :  { %p6322_p12 = pnand %p6320_p11, %p6317_p10 }
  0x3b   :  { %6325 = shalt.err (!%p6322_p12)
}
  0x3c   :  { %s6326_s15 = scalar_lea.vmem %s6469_s22, 2048  ;;  %p6331_p0 = scmp.lt.s32.totalorder %s6469_s22, %s6469_s22 }
  0x3d   :  { %p6327_p13 = scmp.ne.s32.totalorder %s6469_s22, %s6326_s15  ;;  %p6332_p1 = scmp.lt.s32.totalorder %s6326_s15, %s6326_s15 }
  0x3f   :  { %p6333_p2 = por %p6332_p1, %p6331_p0 }
  0x41   :  { %p6334_p3 = pnand %p6333_p2, %p6327_p13 }
  0x43   :  { %6337 = shalt.err (!%p6334_p3)
}
  0x44   :  { %73 = dma.hbm_to_vmem [thread:$0]  %s9823_s3, 2048, %s6469_s22, [#allocation9], %s6394_s30, %s6394_s30, %s6395_s6  }
  0x45   :  { %6382 = dma.done.wait [#allocation3], 512  }
  0x46   :  { %6383 = vsyncadd [#allocation3], 4294966784 }
  0x47   :  { %6384 = dma.done.wait [#allocation6], 2560  }
  0x48   :  { %6385 = vsyncadd [#allocation6], 4294964736 }
  0x49   :  { %6386 = dma.done.wait [#allocation9], 2048  }
  0x4a   :  { %6387 = vsyncadd [#allocation9], 4294965248  ;;  %vm9916_vm0 = vcmask 130048   ;;  %v97_v0 = vld [vmem:[#allocation2] sm:$0xff]  ;;  %v98_v1 = vld [vmem:[#allocation2 + $0x8] sm:$0xff]  ;;  %s6400_s3 = smov [#allocation10]  }
  0x4b   :  { %v107_v2 = vld [vmem:[#allocation7] sm:$0xff]  ;;  %v6506_v3 = vpack.c.bf16 %v98_v1, %v97_v0  ;;  %v100_v4 = vld [vmem:[#allocation2 + $0x10] sm:$0xff]  ;;  %v101_v5 = vld [vmem:[#allocation2 + $0x18] sm:$0xff]  ;;  %s5263_s30 = sshll.u32 %s6400_s3, 4  ;;  %s5264_s30 = int_to_ptr.vmem [resolvable:$true] %s5263_s30 }
  0x4c   :  { %5700 = vmatprep.mubr.msk.f32.mxu1 %vm9916_vm0, %v107_v2  ;;  %v6509_v6 = vpack.c.bf16 %v101_v5, %v100_v4  ;;  %v108_v7 = vld [vmem:[#allocation7 + $0x8] sm:$0xff]  ;;  %v109_v8 = vld [vmem:[#allocation7 + $0x10] sm:$0xff]  ;;  %v110_v9 = vld [vmem:[#allocation7 + $0x18] sm:$0xff]  ;;  %s6338_s6 = scalar_lea.vmem %s5264_s30, 16  ;;  %s6342_s1 = scalar_lea.vmem %s5264_s30, 32 }
  0x4d   :  { %6033 = vmatprep.subr.bf16.mxu1 %v6506_v3  ;;  %v111_v10 = vld [vmem:[#allocation7 + $0x20] sm:$0xff]  ;;  %v112_v11 = vld [vmem:[#allocation7 + $0x28] sm:$0xff]  ;;  %v113_v12 = vld [vmem:[#allocation7 + $0x30] sm:$0xff]  ;;  %p6339_p4 = scmp.ne.s32.totalorder %s5264_s30, %s6338_s6  ;;  %p6343_p5 = scmp.lt.s32.totalorder %s5264_s30, %s5264_s30 }
  0x4e   :  { %6035 = vmatpush3.bf16.msra.mxu1 %v6506_v3  ;;  %v114_v13 = vld [vmem:[#allocation7 + $0x38] sm:$0xff]  ;;  %v115_v14 = vld [vmem:[#allocation7 + $0x40] sm:$0xff]  ;;  %v116_v15 = vld [vmem:[#allocation7 + $0x48] sm:$0xff]  ;;  %p6344_p6 = scmp.lt.s32.totalorder %s6342_s1, %s6338_s6 }
  0x4f   :  { %6037 = vmatprep.subr.bf16.mxu1 %v6509_v6  ;;  %v117_v16 = vld [vmem:[#allocation7 + $0x50] sm:$0xff]  ;;  %v118_v17 = vld [vmem:[#allocation7 + $0x58] sm:$0xff]  ;;  %v119_v18 = vld [vmem:[#allocation7 + $0x60] sm:$0xff] }
  0x50   :  { %v120_v19 = vld [vmem:[#allocation7 + $0x68] sm:$0xff]  ;;  %v121_v20 = vld [vmem:[#allocation7 + $0x70] sm:$0xff]  ;;  %v122_v21 = vld [vmem:[#allocation7 + $0x78] sm:$0xff]  ;;  %p6345_p7 = por %p6344_p6, %p6343_p5 }
  0x51   :  { %5701 = vmatmul.mubr.msk.f32.vlgmr.msra.gmra.mrb[0].mxu1 %vm9916_vm0, %v108_v7  ;;  %v102_v22 = vld [vmem:[#allocation5] sm:$0xff]  ;;  %v103_v23 = vld [vmem:[#allocation5 + $0x8] sm:$0xff]  ;;  %v105_v57 = vld [vmem:[#allocation5 + $0x10] sm:$0xff] }
  0x52   :  { %6039 = vmatpush3.bf16.msra.mxu1 %v6509_v6  ;;  %5703 = vmatprep.mubr.msk.f32.mxu1 %vm9916_vm0, %v109_v8  ;;  %v6546_v24 = vpack.c.bf16 %v103_v23, %v102_v22  ;;  %v106_v58 = vld [vmem:[#allocation5 + $0x18] sm:$0xff]  ;;  %v1672_v23 = vld [vmem:[#allocation8 + $0x30] sm:$0xff]  ;;  %p6346_p8 = pnand %p6345_p7, %p6339_p4 }
  0x53   :  { %v6551_v59 = vpack.c.bf16 %v106_v58, %v105_v57 }
  0x54   :  { %6045 = vmatprep.subr.bf16.mxu1 %v6546_v24 }
  0x55   :  { %5704 = vmatmul.mubr.msk.f32.gmra.mrb[2].mxu1 %vm9916_vm0, %v110_v9  ;;  %6041 = vmatprep.subr.bf16.mxu0 %v6551_v59 }
  0x56   :  { %5706 = vmatprep.mubr.msk.f32.mxu1 %vm9916_vm0, %v111_v10  ;;  %6043 = vmatpush3.bf16.msra.mxu0 %v6551_v59 }
  0x57   :  { %6049 = vmatprep.subr.bf16.mxu0 %v6551_v59 }
  0x59   :  { %5707 = vmatmul.mubr.msk.f32.gmra.mrb[4].mxu1 %vm9916_vm0, %v112_v11 }
  0x5a   :  { %5709 = vmatprep.mubr.msk.f32.mxu1 %vm9916_vm0, %v113_v12 }
  0x5d   :  { %5710 = vmatmul.mubr.msk.f32.gmra.mrb[6].mxu1 %vm9916_vm0, %v114_v13 }
  0x5e   :  { %5712 = vmatprep.mubr.msk.f32.mxu1 %vm9916_vm0, %v115_v14 }
  0x61   :  { %5713 = vmatmul.mubr.msk.f32.gmra.mrb[8].mxu1 %vm9916_vm0, %v116_v15 }
  0x62   :  { %5715 = vmatprep.mubr.msk.f32.mxu1 %vm9916_vm0, %v117_v16 }
  0x65   :  { %5716 = vmatmul.mubr.msk.f32.gmra.mrb[10].mxu1 %vm9916_vm0, %v118_v17 }
  0x66   :  { %5718 = vmatprep.mubr.msk.f32.mxu1 %vm9916_vm0, %v119_v18 }
  0x69   :  { %5719 = vmatmul.mubr.msk.f32.gmra.mrb[12].mxu1 %vm9916_vm0, %v120_v19 }
  0x6a   :  { %5721 = vmatprep.mubr.msk.f32.mxu1 %vm9916_vm0, %v121_v20 }
  0x6d   :  { %5722 = vmatmul.mubr.msk.f32.gmra.mrb[14].mxu1 %vm9916_vm0, %v122_v21 }
  0x6e   :  { %5728 = vmatprep.mubr.msk.f32.mxu1 %vm9916_vm0, %v107_v2 }
  0x71   :  { %5729 = vmatmul.mubr.msk.f32.vlgmr.msra.gmra.mrb[16].mxu1 %vm9916_vm0, %v108_v7 }
  0x72   :  { %5731 = vmatprep.mubr.msk.f32.mxu1 %vm9916_vm0, %v109_v8  ;;  %6047 = vmatpush3.bf16.msra.mxu1 %v6546_v24 }
  0x73   :  { %6057 = vmatprep.subr.bf16.mxu1 %v6506_v3 }
  0x75   :  { %5732 = vmatmul.mubr.msk.f32.gmra.mrb[18].mxu1 %vm9916_vm0, %v110_v9 }
  0x76   :  { %5734 = vmatprep.mubr.msk.f32.mxu1 %vm9916_vm0, %v111_v10 }
  0x79   :  { %5735 = vmatmul.mubr.msk.f32.gmra.mrb[20].mxu1 %vm9916_vm0, %v112_v11 }
  0x7a   :  { %5737 = vmatprep.mubr.msk.f32.mxu1 %vm9916_vm0, %v113_v12  ;;  %v6618_v12 = vld [vmem:[#allocation8] sm:$0xff] }
  0x7d   :  { %5738 = vmatmul.mubr.msk.f32.gmra.mrb[22].mxu1 %vm9916_vm0, %v114_v13 }
  0x7e   :  { %5740 = vmatprep.mubr.msk.f32.mxu1 %vm9916_vm0, %v115_v14 }
  0x81   :  { %5741 = vmatmul.mubr.msk.f32.gmra.mrb[24].mxu1 %vm9916_vm0, %v116_v15  ;;  %v6630_v15 = vld [vmem:[#allocation8 + $0x8] sm:$0xff] }
  0x82   :  { %5743 = vmatprep.mubr.msk.f32.mxu1 %vm9916_vm0, %v117_v16 }
  0x85   :  { %5744 = vmatmul.mubr.msk.f32.gmra.mrb[26].mxu1 %vm9916_vm0, %v118_v17 }
  0x86   :  { %5746 = vmatprep.mubr.msk.f32.mxu1 %vm9916_vm0, %v119_v18  ;;  %v6636_v18 = vld [vmem:[#allocation8 + $0x10] sm:$0xff] }
  0x89   :  { %5747 = vmatmul.mubr.msk.f32.gmra.mrb[28].mxu1 %vm9916_vm0, %v120_v19  ;;  %v6645_v19 = vld [vmem:[#allocation8 + $0x18] sm:$0xff] }
  0x8a   :  { %5749 = vmatprep.mubr.msk.f32.mxu1 %vm9916_vm0, %v121_v20  ;;  %v6649_v20 = vld [vmem:[#allocation8 + $0x20] sm:$0xff] }
  0x8d   :  { %5750 = vmatmul.mubr.msk.f32.gmra.mrb[30].mxu1 %vm9916_vm0, %v122_v21 }
 0x124   :  { %v5702_v25 = vpop.f32.mrb[0].mxu1 }
 0x125   :  { %v238_v26 = vpop.f32.mrb[1].mxu1 }
 0x128   :  { %v5705_v27 = vpop.f32.mrb[2].mxu1 }
 0x129   :  { %v248_v28 = vpop.f32.mrb[3].mxu1 }
 0x12c   :  { %v5708_v29 = vpop.f32.mrb[4].mxu1 }
 0x12d   :  { %v258_v30 = vpop.f32.mrb[5].mxu1 }
 0x130   :  { %v5711_v31 = vpop.f32.mrb[6].mxu1 }
 0x131   :  { %v268_v32 = vpop.f32.mrb[7].mxu1 }
 0x134   :  { %v5714_v33 = vpop.f32.mrb[8].mxu1 }
 0x135   :  { %v278_v34 = vpop.f32.mrb[9].mxu1 }
 0x138   :  { %v5717_v35 = vpop.f32.mrb[10].mxu1 }
 0x139   :  { %v288_v36 = vpop.f32.mrb[11].mxu1 }
 0x13c   :  { %v5720_v37 = vpop.f32.mrb[12].mxu1 }
 0x13d   :  { %v298_v38 = vpop.f32.mrb[13].mxu1 }
 0x140   :  { %v5723_v39 = vpop.f32.mrb[14].mxu1 }
 0x141   :  { %v308_v40 = vpop.f32.mrb[15].mxu1 }
 0x144   :  { %v5730_v41 = vpop.f32.mrb[16].mxu1 }
 0x145   :  { %v383_v42 = vpop.f32.mrb[17].mxu1 }
 0x146   :  { %718 = vxpose.xlu0.b32.start [1/2] (short) (narrow) %v383_v42, 16 }
 0x148   :  { %v5733_v43 = vpop.f32.mrb[18].mxu1 }
 0x149   :  { %v393_v44 = vpop.f32.mrb[19].mxu1 }
 0x14a   :  { %719 = vxpose.xlu0.b32.end [2/2] (short) (narrow) %v5730_v41, 16  ;;  %750 = vxpose.xlu1.b32.start [1/2] (short) (narrow) %v393_v44, 16 }
 0x14c   :  { %v5736_v45 = vpop.f32.mrb[20].mxu1 }
 0x14d   :  { %v403_v46 = vpop.f32.mrb[21].mxu1 }
 0x14e   :  { %751 = vxpose.xlu1.b32.end [2/2] (short) (narrow) %v5733_v43, 16  ;;  %782 = vxpose.xlu0.b32.start [1/2] (short) (narrow) %v403_v46, 16  ;;  %v1681_v43 = vld [vmem:[#allocation8 + $0x78] sm:$0xff] }
 0x150   :  { %v5739_v47 = vpop.f32.mrb[22].mxu1 }
 0x151   :  { %v413_v48 = vpop.f32.mrb[23].mxu1 }
 0x152   :  { %783 = vxpose.xlu0.b32.end [2/2] (short) (narrow) %v5736_v45, 16  ;;  %814 = vxpose.xlu1.b32.start [1/2] (short) (narrow) %v413_v48, 16 }
 0x154   :  { %v5742_v49 = vpop.f32.mrb[24].mxu1 }
 0x155   :  { %v423_v50 = vpop.f32.mrb[25].mxu1 }
 0x156   :  { %815 = vxpose.xlu1.b32.end [2/2] (short) (narrow) %v5739_v47, 16  ;;  %846 = vxpose.xlu0.b32.start [1/2] (short) (narrow) %v423_v50, 16 }
 0x158   :  { %v5745_v51 = vpop.f32.mrb[26].mxu1 }
 0x159   :  { %v433_v52 = vpop.f32.mrb[27].mxu1 }
 0x15a   :  { %847 = vxpose.xlu0.b32.end [2/2] (short) (narrow) %v5742_v49, 16  ;;  %878 = vxpose.xlu1.b32.start [1/2] (short) (narrow) %v433_v52, 16 }
 0x15c   :  { %v5748_v53 = vpop.f32.mrb[28].mxu1 }
 0x15d   :  { %v443_v54 = vpop.f32.mrb[29].mxu1 }
 0x15e   :  { %879 = vxpose.xlu1.b32.end [2/2] (short) (narrow) %v5745_v51, 16  ;;  %910 = vxpose.xlu0.b32.start [1/2] (short) (narrow) %v443_v54, 16 }
 0x160   :  { %v5751_v55 = vpop.f32.mrb[30].mxu1 }
 0x161   :  { %v453_v56 = vpop.f32.mrb[31].mxu1 }
 0x162   :  { %911 = vxpose.xlu0.b32.end [2/2] (short) (narrow) %v5748_v53, 16  ;;  %942 = vxpose.xlu1.b32.start [1/2] (short) (narrow) %v453_v56, 16 }
 0x166   :  { %462 = vxpose.xlu0.b32.start [1/2] (short) (narrow) %v238_v26, 16  ;;  %943 = vxpose.xlu1.b32.end [2/2] (short) (narrow) %v5751_v55, 16 }
 0x16a   :  { %463 = vxpose.xlu0.b32.end [2/2] (short) (narrow) %v5702_v25, 16  ;;  %494 = vxpose.xlu1.b32.start [1/2] (short) (narrow) %v248_v28, 16  ;;  %v1674_v28 = vld [vmem:[#allocation8 + $0x40] sm:$0xff] }
 0x16e   :  { %526 = vxpose.xlu0.b32.start [1/2] (short) (narrow) %v258_v30, 16  ;;  %495 = vxpose.xlu1.b32.end [2/2] (short) (narrow) %v5705_v27, 16  ;;  %v1673_v27 = vld [vmem:[#allocation8 + $0x38] sm:$0xff] }
 0x172   :  { %527 = vxpose.xlu0.b32.end [2/2] (short) (narrow) %v5708_v29, 16  ;;  %558 = vxpose.xlu1.b32.start [1/2] (short) (narrow) %v268_v32, 16  ;;  %v1676_v32 = vld [vmem:[#allocation8 + $0x50] sm:$0xff] }
 0x176   :  { %590 = vxpose.xlu0.b32.start [1/2] (short) (narrow) %v278_v34, 16  ;;  %559 = vxpose.xlu1.b32.end [2/2] (short) (narrow) %v5711_v31, 16  ;;  %v1675_v31 = vld [vmem:[#allocation8 + $0x48] sm:$0xff] }
 0x17a   :  { %591 = vxpose.xlu0.b32.end [2/2] (short) (narrow) %v5714_v33, 16  ;;  %622 = vxpose.xlu1.b32.start [1/2] (short) (narrow) %v288_v36, 16  ;;  %v1678_v36 = vld [vmem:[#allocation8 + $0x60] sm:$0xff] }
 0x17e   :  { %654 = vxpose.xlu0.b32.start [1/2] (short) (narrow) %v298_v38, 16  ;;  %623 = vxpose.xlu1.b32.end [2/2] (short) (narrow) %v5717_v35, 16  ;;  %v1677_v35 = vld [vmem:[#allocation8 + $0x58] sm:$0xff] }
 0x182   :  { %655 = vxpose.xlu0.b32.end [2/2] (short) (narrow) %v5720_v37, 16  ;;  %686 = vxpose.xlu1.b32.start [1/2] (short) (narrow) %v308_v40, 16  ;;  %v1680_v40 = vld [vmem:[#allocation8 + $0x70] sm:$0xff] }
 0x186   :  { %687 = vxpose.xlu1.b32.end [2/2] (short) (narrow) %v5723_v39, 16  ;;  %v1679_v39 = vld [vmem:[#allocation8 + $0x68] sm:$0xff] }
 0x1c6   :  { %v6556_v60 = vpop.trf.xlu0 }
 0x1c7   :  { %5784 = vmatprep.mubr.msk.f32.mxu1 %vm9916_vm0, %v6556_v60 }
 0x1ca   :  { %v6560_v61 = vpop.trf.xlu0  ;;  %v6562_v62 = vpop.trf.xlu1 }
 0x1cb   :  { %5785 = vmatmul.mubr.msk.f32.vlgmr.msra.gmra.mrb[32].mxu1 %vm9916_vm0, %v6560_v61 }
 0x1cc   :  { %5787 = vmatprep.mubr.msk.f32.mxu1 %vm9916_vm0, %v6562_v62  ;;  %6059 = vmatpush3.bf16.msra.mxu1 %v6506_v3 }
 0x1cd   :  { %6061 = vmatprep.subr.bf16.mxu1 %v6509_v6 }
 0x1ce   :  { %v6570_v63 = vpop.trf.xlu1  ;;  %v6572_v0 = vpop.trf.xlu0 }
 0x1cf   :  { %5788 = vmatmul.mubr.msk.f32.gmra.mrb[34].mxu1 %vm9916_vm0, %v6570_v63 }
 0x1d0   :  { %5790 = vmatprep.mubr.msk.f32.mxu1 %vm9916_vm0, %v6572_v0 }
 0x1d2   :  { %v6578_v1 = vpop.trf.xlu0  ;;  %v6580_v2 = vpop.trf.xlu1 }
 0x1d3   :  { %5791 = vmatmul.mubr.msk.f32.gmra.mrb[36].mxu1 %vm9916_vm0, %v6578_v1 }
 0x1d4   :  { %5793 = vmatprep.mubr.msk.f32.mxu1 %vm9916_vm0, %v6580_v2 }
 0x1d6   :  { %v6586_v3 = vpop.trf.xlu1  ;;  %v6588_v4 = vpop.trf.xlu0 }
 0x1d7   :  { %5794 = vmatmul.mubr.msk.f32.gmra.mrb[38].mxu1 %vm9916_vm0, %v6586_v3 }
 0x1d8   :  { %5796 = vmatprep.mubr.msk.f32.mxu1 %vm9916_vm0, %v6588_v4 }
 0x1da   :  { %v6594_v5 = vpop.trf.xlu0  ;;  %v6596_v7 = vpop.trf.xlu1 }
 0x1db   :  { %5797 = vmatmul.mubr.msk.f32.gmra.mrb[40].mxu1 %vm9916_vm0, %v6594_v5 }
 0x1dc   :  { %5799 = vmatprep.mubr.msk.f32.mxu1 %vm9916_vm0, %v6596_v7 }
 0x1de   :  { %v6602_v8 = vpop.trf.xlu1  ;;  %v6604_v9 = vpop.trf.xlu0 }
 0x1df   :  { %5800 = vmatmul.mubr.msk.f32.gmra.mrb[42].mxu1 %vm9916_vm0, %v6602_v8 }
 0x1e0   :  { %5802 = vmatprep.mubr.msk.f32.mxu1 %vm9916_vm0, %v6604_v9 }
 0x1e2   :  { %v6610_v10 = vpop.trf.xlu0  ;;  %v6612_v11 = vpop.trf.xlu1 }
 0x1e3   :  { %5803 = vmatmul.mubr.msk.f32.gmra.mrb[44].mxu1 %vm9916_vm0, %v6610_v10 }
 0x1e4   :  { %5805 = vmatprep.mubr.msk.f32.mxu1 %vm9916_vm0, %v6612_v11 }
 0x1e6   :  { %v6620_v13 = vpop.trf.xlu0  ;;  %v6622_v14 = vpop.trf.xlu1 }
 0x1e7   :  { %5806 = vmatmul.mubr.msk.f32.gmra.mrb[46].mxu1 %vm9916_vm0, %v6622_v14  ;;  %5756 = vmatprep.mubr.msk.f32.mxu0 %vm9916_vm0, %v6620_v13 }
 0x1e8   :  { %5868 = vmatprep.mubr.msk.f32.mxu1 %vm9916_vm0, %v6618_v12 }
 0x1ea   :  { %v6632_v16 = vpop.trf.xlu0  ;;  %v6634_v17 = vpop.trf.xlu1 }
 0x1eb   :  { %5757 = vmatmul.mubr.msk.f32.vlgmr.msra.gmra.mrb[0].mxu0 %vm9916_vm0, %v6632_v16  ;;  %5869 = vmatmul.mubr.msk.f32.vlgmr.msra.gmra.mrb[48].mxu1 %vm9916_vm0, %v6630_v15 }
 0x1ec   :  { %6063 = vmatpush3.bf16.msra.mxu1 %v6509_v6  ;;  %5759 = vmatprep.mubr.msk.f32.mxu0 %vm9916_vm0, %v6634_v17  ;;  %v1671_v6 = vld [vmem:[#allocation8 + $0x28] sm:$0xff] }
 0x1ed   :  { %5871 = vmatprep.mubr.msk.f32.mxu1 %vm9916_vm0, %v6636_v18  ;;  %6051 = vmatpush3.bf16.msra.mxu0 %v6551_v59 }
 0x1ee   :  { %v6652_v21 = vpop.trf.xlu0  ;;  %v6654_v22 = vpop.trf.xlu1  ;;  %6053 = vmatprep.subr.bf16.mxu0 %v6546_v24  ;;  %6069 = vmatprep.subr.bf16.mxu1 %v6546_v24 }
 0x1ef   :  { %5760 = vmatmul.mubr.msk.f32.gmra.mrb[2].mxu0 %vm9916_vm0, %v6654_v22  ;;  %5872 = vmatmul.mubr.msk.f32.gmra.mrb[50].mxu1 %vm9916_vm0, %v6645_v19 }
 0x1f0   :  { %5762 = vmatprep.mubr.msk.f32.mxu0 %vm9916_vm0, %v6652_v21  ;;  %5874 = vmatprep.mubr.msk.f32.mxu1 %vm9916_vm0, %v6649_v20 }
 0x1f2   :  { %v6666_v25 = vpop.trf.xlu0  ;;  %v6668_v26 = vpop.trf.xlu1 }
 0x1f3   :  { %5763 = vmatmul.mubr.msk.f32.gmra.mrb[4].mxu0 %vm9916_vm0, %v6666_v25  ;;  %5875 = vmatmul.mubr.msk.f32.gmra.mrb[52].mxu1 %vm9916_vm0, %v1671_v6 }
 0x1f4   :  { %5765 = vmatprep.mubr.msk.f32.mxu0 %vm9916_vm0, %v6668_v26  ;;  %5877 = vmatprep.mubr.msk.f32.mxu1 %vm9916_vm0, %v1672_v23 }
 0x1f6   :  { %v6676_v29 = vpop.trf.xlu0  ;;  %v6678_v30 = vpop.trf.xlu1 }
 0x1f7   :  { %5766 = vmatmul.mubr.msk.f32.gmra.mrb[6].mxu0 %vm9916_vm0, %v6678_v30  ;;  %5878 = vmatmul.mubr.msk.f32.gmra.mrb[54].mxu1 %vm9916_vm0, %v1673_v27 }
 0x1f8   :  { %5768 = vmatprep.mubr.msk.f32.mxu0 %vm9916_vm0, %v6676_v29  ;;  %5880 = vmatprep.mubr.msk.f32.mxu1 %vm9916_vm0, %v1674_v28 }
 0x1fa   :  { %v6686_v33 = vpop.trf.xlu0  ;;  %v6688_v34 = vpop.trf.xlu1 }
 0x1fb   :  { %5769 = vmatmul.mubr.msk.f32.gmra.mrb[8].mxu0 %vm9916_vm0, %v6686_v33  ;;  %5881 = vmatmul.mubr.msk.f32.gmra.mrb[56].mxu1 %vm9916_vm0, %v1675_v31 }
 0x1fc   :  { %5771 = vmatprep.mubr.msk.f32.mxu0 %vm9916_vm0, %v6688_v34  ;;  %5883 = vmatprep.mubr.msk.f32.mxu1 %vm9916_vm0, %v1676_v32 }
 0x1fe   :  { %v6696_v37 = vpop.trf.xlu0  ;;  %v6698_v38 = vpop.trf.xlu1 }
 0x1ff   :  { %5772 = vmatmul.mubr.msk.f32.gmra.mrb[10].mxu0 %vm9916_vm0, %v6698_v38  ;;  %5884 = vmatmul.mubr.msk.f32.gmra.mrb[58].mxu1 %vm9916_vm0, %v1677_v35 }
 0x200   :  { %5774 = vmatprep.mubr.msk.f32.mxu0 %vm9916_vm0, %v6696_v37  ;;  %5886 = vmatprep.mubr.msk.f32.mxu1 %vm9916_vm0, %v1678_v36 }
 0x202   :  { %v671_v41 = vpop.trf.xlu0  ;;  %v702_v42 = vpop.trf.xlu1 }
 0x203   :  { %5775 = vmatmul.mubr.msk.f32.gmra.mrb[12].mxu0 %vm9916_vm0, %v671_v41  ;;  %5887 = vmatmul.mubr.msk.f32.gmra.mrb[60].mxu1 %vm9916_vm0, %v1679_v39 }
 0x204   :  { %5777 = vmatprep.mubr.msk.f32.mxu0 %vm9916_vm0, %v702_v42  ;;  %5889 = vmatprep.mubr.msk.f32.mxu1 %vm9916_vm0, %v1680_v40 }
 0x206   :  { %v703_v44 = vpop.trf.xlu1 }
 0x207   :  { %5778 = vmatmul.mubr.msk.f32.gmra.mrb[14].mxu0 %vm9916_vm0, %v703_v44  ;;  %5890 = vmatmul.mubr.msk.f32.gmra.mrb[62].mxu1 %vm9916_vm0, %v1681_v43 }
 0x208   :  { %5812 = vmatprep.mubr.msk.f32.mxu0 %vm9916_vm0, %v6556_v60  ;;  %5896 = vmatprep.mubr.msk.f32.mxu1 %vm9916_vm0, %v6618_v12 }
 0x20b   :  { %5813 = vmatmul.mubr.msk.f32.vlgmr.msra.gmra.mrb[16].mxu0 %vm9916_vm0, %v6560_v61  ;;  %5897 = vmatmul.mubr.msk.f32.vlgmr.msra.gmra.mrb[64].mxu1 %vm9916_vm0, %v6630_v15 }
 0x20c   :  { %5815 = vmatprep.mubr.msk.f32.mxu0 %vm9916_vm0, %v6562_v62  ;;  %5899 = vmatprep.mubr.msk.f32.mxu1 %vm9916_vm0, %v6636_v18 }
 0x20d   :  { %6055 = vmatpush3.bf16.msra.mxu0 %v6546_v24  ;;  %6071 = vmatpush3.bf16.msra.mxu1 %v6546_v24 }
 0x20e   :  { %6065 = vmatprep.subr.bf16.mxu0 %v6551_v59 }
 0x20f   :  { %5816 = vmatmul.mubr.msk.f32.gmra.mrb[18].mxu0 %vm9916_vm0, %v6570_v63  ;;  %5900 = vmatmul.mubr.msk.f32.gmra.mrb[66].mxu1 %vm9916_vm0, %v6645_v19 }
 0x210   :  { %5818 = vmatprep.mubr.msk.f32.mxu0 %vm9916_vm0, %v6572_v0  ;;  %5902 = vmatprep.mubr.msk.f32.mxu1 %vm9916_vm0, %v6649_v20 }
 0x213   :  { %5819 = vmatmul.mubr.msk.f32.gmra.mrb[20].mxu0 %vm9916_vm0, %v6578_v1  ;;  %5903 = vmatmul.mubr.msk.f32.gmra.mrb[68].mxu1 %vm9916_vm0, %v1671_v6 }
 0x214   :  { %5821 = vmatprep.mubr.msk.f32.mxu0 %vm9916_vm0, %v6580_v2  ;;  %5905 = vmatprep.mubr.msk.f32.mxu1 %vm9916_vm0, %v1672_v23 }
 0x217   :  { %5822 = vmatmul.mubr.msk.f32.gmra.mrb[22].mxu0 %vm9916_vm0, %v6586_v3  ;;  %5906 = vmatmul.mubr.msk.f32.gmra.mrb[70].mxu1 %vm9916_vm0, %v1673_v27 }
 0x218   :  { %5824 = vmatprep.mubr.msk.f32.mxu0 %vm9916_vm0, %v6588_v4  ;;  %5908 = vmatprep.mubr.msk.f32.mxu1 %vm9916_vm0, %v1674_v28 }
 0x21b   :  { %5825 = vmatmul.mubr.msk.f32.gmra.mrb[24].mxu0 %vm9916_vm0, %v6594_v5  ;;  %5909 = vmatmul.mubr.msk.f32.gmra.mrb[72].mxu1 %vm9916_vm0, %v1675_v31 }
 0x21c   :  { %5827 = vmatprep.mubr.msk.f32.mxu0 %vm9916_vm0, %v6596_v7  ;;  %5911 = vmatprep.mubr.msk.f32.mxu1 %vm9916_vm0, %v1676_v32 }
 0x21f   :  { %5828 = vmatmul.mubr.msk.f32.gmra.mrb[26].mxu0 %vm9916_vm0, %v6602_v8  ;;  %5912 = vmatmul.mubr.msk.f32.gmra.mrb[74].mxu1 %vm9916_vm0, %v1677_v35 }
 0x220   :  { %5830 = vmatprep.mubr.msk.f32.mxu0 %vm9916_vm0, %v6604_v9  ;;  %5914 = vmatprep.mubr.msk.f32.mxu1 %vm9916_vm0, %v1678_v36 }
 0x223   :  { %5831 = vmatmul.mubr.msk.f32.gmra.mrb[28].mxu0 %vm9916_vm0, %v6610_v10  ;;  %5915 = vmatmul.mubr.msk.f32.gmra.mrb[76].mxu1 %vm9916_vm0, %v1679_v39 }
 0x224   :  { %5833 = vmatprep.mubr.msk.f32.mxu0 %vm9916_vm0, %v6612_v11  ;;  %5917 = vmatprep.mubr.msk.f32.mxu1 %vm9916_vm0, %v1680_v40 }
 0x227   :  { %5834 = vmatmul.mubr.msk.f32.gmra.mrb[30].mxu0 %vm9916_vm0, %v6622_v14  ;;  %5918 = vmatmul.mubr.msk.f32.gmra.mrb[78].mxu1 %vm9916_vm0, %v1681_v43 }
 0x228   :  { %5840 = vmatprep.mubr.msk.f32.mxu0 %vm9916_vm0, %v6620_v13 }
 0x22b   :  { %5841 = vmatmul.mubr.msk.f32.vlgmr.msra.gmra.mrb[16].mxu0 %vm9916_vm0, %v6632_v16 }
 0x22c   :  { %5843 = vmatprep.mubr.msk.f32.mxu0 %vm9916_vm0, %v6634_v17  ;;  %6067 = vmatpush3.bf16.msra.mxu0 %v6551_v59 }
 0x22d   :  { %6073 = vmatprep.subr.bf16.mxu0 %v6551_v59 }
 0x22f   :  { %5844 = vmatmul.mubr.msk.f32.gmra.mrb[18].mxu0 %vm9916_vm0, %v6654_v22 }
 0x230   :  { %5846 = vmatprep.mubr.msk.f32.mxu0 %vm9916_vm0, %v6652_v21 }
 0x233   :  { %5847 = vmatmul.mubr.msk.f32.gmra.mrb[20].mxu0 %vm9916_vm0, %v6666_v25 }
 0x234   :  { %5849 = vmatprep.mubr.msk.f32.mxu0 %vm9916_vm0, %v6668_v26 }
 0x237   :  { %5850 = vmatmul.mubr.msk.f32.gmra.mrb[22].mxu0 %vm9916_vm0, %v6678_v30 }
 0x238   :  { %5852 = vmatprep.mubr.msk.f32.mxu0 %vm9916_vm0, %v6676_v29 }
 0x23b   :  { %5853 = vmatmul.mubr.msk.f32.gmra.mrb[24].mxu0 %vm9916_vm0, %v6686_v33 }
 0x23c   :  { %5855 = vmatprep.mubr.msk.f32.mxu0 %vm9916_vm0, %v6688_v34 }
 0x23f   :  { %5856 = vmatmul.mubr.msk.f32.gmra.mrb[26].mxu0 %vm9916_vm0, %v6698_v38 }
 0x240   :  { %5858 = vmatprep.mubr.msk.f32.mxu0 %vm9916_vm0, %v6696_v37 }
 0x243   :  { %5859 = vmatmul.mubr.msk.f32.gmra.mrb[28].mxu0 %vm9916_vm0, %v671_v41 }
 0x244   :  { %5861 = vmatprep.mubr.msk.f32.mxu0 %vm9916_vm0, %v702_v42 }
 0x247   :  { %5862 = vmatmul.mubr.msk.f32.gmra.mrb[30].mxu0 %vm9916_vm0, %v703_v44 }
 0x29e   :  { %v5786_v45 = vpop.f32.mrb[32].mxu1 }
 0x29f   :  { %v1281_v46 = vpop.f32.mrb[33].mxu1 }
 0x2a2   :  { %v5789_v47 = vpop.f32.mrb[34].mxu1 }
 0x2a3   :  { %v1291_v48 = vpop.f32.mrb[35].mxu1 }
 0x2a6   :  { %v5792_v49 = vpop.f32.mrb[36].mxu1 }
 0x2a7   :  { %v1301_v50 = vpop.f32.mrb[37].mxu1 }
 0x2aa   :  { %v5795_v51 = vpop.f32.mrb[38].mxu1 }
 0x2ab   :  { %v1311_v52 = vpop.f32.mrb[39].mxu1 }
 0x2ae   :  { %v5798_v53 = vpop.f32.mrb[40].mxu1 }
 0x2af   :  { %v1321_v54 = vpop.f32.mrb[41].mxu1 }
 0x2b2   :  { %v5801_v55 = vpop.f32.mrb[42].mxu1 }
 0x2b3   :  { %v1331_v56 = vpop.f32.mrb[43].mxu1 }
 0x2b6   :  { %v5804_v57 = vpop.f32.mrb[44].mxu1 }
 0x2b7   :  { %v1341_v58 = vpop.f32.mrb[45].mxu1 }
 0x2ba   :  { %v5807_v60 = vpop.f32.mrb[46].mxu1 }
 0x2bb   :  { %v1351_v61 = vpop.f32.mrb[47].mxu1 }
 0x2be   :  { %v5758_v62 = vpop.f32.mrb[0].mxu0  ;;  %v5870_v63 = vpop.f32.mrb[48].mxu1 }
 0x2bf   :  { %v6799_v0 = vsub.f32 %v5786_v45, %v5758_v62  ;;  %v1088_v1 = vpop.f32.mrb[1].mxu0  ;;  %v1796_v2 = vpop.f32.mrb[49].mxu1 }
 0x2c0   :  { %v6801_v3 = vsub.f32 %v1281_v46, %v1088_v1  ;;  %2020 = vxpose.xlu0.b32.start [1/2] (short) (narrow) %v1796_v2, 16 }
 0x2c1   :  { %10065 = vst [vmem:[#allocation18_spill] sm:$0xff] %v6799_v0  ;;  %v6834_v2 = vand.u32 2147483647, %v6799_v0  ;;  %vm3642_vm2 = vcmp.ne.f32.partialorder %v6799_v0, %v6799_v0 }
 0x2c2   :  { %10066 = vst [vmem:[#allocation19_spill] sm:$0xff] %v6801_v3  ;;  %v5761_v4 = vpop.f32.mrb[2].mxu0  ;;  %v5873_v5 = vpop.f32.mrb[50].mxu1 }
 0x2c3   :  { %v6803_v7 = vsub.f32 %v5789_v47, %v5761_v4  ;;  %v1098_v8 = vpop.f32.mrb[3].mxu0  ;;  %v1806_v9 = vpop.f32.mrb[51].mxu1  ;;  %10081 = vst [vmem:[#allocation34_spill] sm:$0xff] %v6834_v2 }
 0x2c4   :  { %v6805_v10 = vsub.f32 %v1291_v48, %v1098_v8  ;;  %2021 = vxpose.xlu0.b32.end [2/2] (short) (narrow) %v5870_v63, 16  ;;  %2052 = vxpose.xlu1.b32.start [1/2] (short) (narrow) %v1806_v9, 16 }
 0x2c5   :  { %10067 = vst [vmem:[#allocation20_spill] sm:$0xff] %v6803_v7 }
 0x2c6   :  { %10068 = vst [vmem:[#allocation21_spill] sm:$0xff] %v6805_v10  ;;  %v5764_v11 = vpop.f32.mrb[4].mxu0  ;;  %v5876_v12 = vpop.f32.mrb[52].mxu1  ;;  %vm3689_vm6 = vcmp.ne.f32.partialorder %v6805_v10, %v6805_v10 }
 0x2c7   :  { %v6807_v13 = vsub.f32 %v5792_v49, %v5764_v11  ;;  %v1108_v14 = vpop.f32.mrb[5].mxu0  ;;  %v1816_v15 = vpop.f32.mrb[53].mxu1 }
 0x2c8   :  { %v6809_v16 = vsub.f32 %v1301_v50, %v1108_v14  ;;  %2053 = vxpose.xlu1.b32.end [2/2] (short) (narrow) %v5873_v5, 16  ;;  %2084 = vxpose.xlu0.b32.start [1/2] (short) (narrow) %v1816_v15, 16  ;;  %v3241_v5 = vmul.f32 %v6799_v0, %v6799_v0  ;;  %v10085_v15 = vmov 0 }
 0x2c9   :  { %10069 = vst [vmem:[#allocation22_spill] sm:$0xff] %v6807_v13  ;;  %vm3830_vm9 = vcmp.ne.f32.partialorder %v6807_v13, %v6807_v13 }
 0x2ca   :  { %10070 = vst [vmem:[#allocation23_spill] sm:$0xff] %v6809_v16  ;;  %v5767_v17 = vpop.f32.mrb[6].mxu0  ;;  %v5879_v18 = vpop.f32.mrb[54].mxu1  ;;  %vm3783_vm14 = vcmp.ne.f32.partialorder %v6809_v16, %v6809_v16 }
 0x2cb   :  { %v6811_v19 = vsub.f32 %v5795_v51, %v5767_v17  ;;  %v1118_v20 = vpop.f32.mrb[7].mxu0  ;;  %v1826_v21 = vpop.f32.mrb[55].mxu1 }
 0x2cc   :  { %v6813_v22 = vsub.f32 %v1311_v52, %v1118_v20  ;;  %2085 = vxpose.xlu0.b32.end [2/2] (short) (narrow) %v5876_v12, 16  ;;  %2116 = vxpose.xlu1.b32.start [1/2] (short) (narrow) %v1826_v21, 16  ;;  %v3242_v21 = vmul.f32 %v6805_v10, %v6805_v10 }
 0x2cd   :  { %10071 = vst [vmem:[#allocation24_spill] sm:$0xff] %v6811_v19 }
 0x2ce   :  { %10072 = vst [vmem:[#allocation25_spill] sm:$0xff] %v6813_v22  ;;  %v5770_v6 = vpop.f32.mrb[8].mxu0  ;;  %v5882_v23 = vpop.f32.mrb[56].mxu1 }
 0x2cf   :  { %v6815_v25 = vsub.f32 %v5798_v53, %v5770_v6  ;;  %v1128_v26 = vpop.f32.mrb[9].mxu0  ;;  %v1836_v27 = vpop.f32.mrb[57].mxu1 }
 0x2d0   :  { %v6817_v28 = vsub.f32 %v1321_v54, %v1128_v26  ;;  %2117 = vxpose.xlu1.b32.end [2/2] (short) (narrow) %v5879_v18, 16  ;;  %2148 = vxpose.xlu0.b32.start [1/2] (short) (narrow) %v1836_v27, 16 }
 0x2d1   :  { %10073 = vst [vmem:[#allocation26_spill] sm:$0xff] %v6815_v25 }
 0x2d2   :  { %10074 = vst [vmem:[#allocation27_spill] sm:$0xff] %v6817_v28  ;;  %v5773_v29 = vpop.f32.mrb[10].mxu0  ;;  %v5885_v30 = vpop.f32.mrb[58].mxu1 }
 0x2d3   :  { %v6819_v31 = vsub.f32 %v5801_v55, %v5773_v29  ;;  %v1138_v32 = vpop.f32.mrb[11].mxu0  ;;  %v1846_v33 = vpop.f32.mrb[59].mxu1 }
 0x2d4   :  { %v6821_v34 = vsub.f32 %v1331_v56, %v1138_v32  ;;  %2149 = vxpose.xlu0.b32.end [2/2] (short) (narrow) %v5882_v23, 16  ;;  %2180 = vxpose.xlu1.b32.start [1/2] (short) (narrow) %v1846_v33, 16  ;;  %v6872_v23 = vand.u32 2147483647, %v6805_v10  ;;  %v3245_v32 = vmul.f32 %v6807_v13, %v6807_v13  ;;  %v6890_v33 = vand.u32 2147483647, %v6807_v13 }
 0x2d5   :  { %10075 = vst [vmem:[#allocation28_spill] sm:$0xff] %v6819_v31 }
 0x2d6   :  { %10076 = vst [vmem:[#allocation29_spill] sm:$0xff] %v6821_v34  ;;  %v5776_v35 = vpop.f32.mrb[12].mxu0  ;;  %v5888_v36 = vpop.f32.mrb[60].mxu1  ;;  %10091 = vst [vmem:[#allocation42_spill] sm:$0xff] %v6872_v23 }
 0x2d7   :  { %v6823_v37 = vsub.f32 %v5804_v57, %v5776_v35  ;;  %v1148_v38 = vpop.f32.mrb[13].mxu0  ;;  %v1856_v39 = vpop.f32.mrb[61].mxu1  ;;  %10095 = vst [vmem:[#allocation46_spill] sm:$0xff] %v6890_v33 }
 0x2d8   :  { %v6825_v40 = vsub.f32 %v1341_v58, %v1148_v38  ;;  %2181 = vxpose.xlu1.b32.end [2/2] (short) (narrow) %v5885_v30, 16  ;;  %2212 = vxpose.xlu0.b32.start [1/2] (short) (narrow) %v1856_v39, 16  ;;  %v10096_v38 = vmov 0  ;;  %v6903_v39 = vand.u32 2147483647, %v6809_v16 }
 0x2d9   :  { %10077 = vst [vmem:[#allocation30_spill] sm:$0xff] %v6823_v37 }
 0x2da   :  { %10078 = vst [vmem:[#allocation31_spill] sm:$0xff] %v6825_v40  ;;  %v5779_v41 = vpop.f32.mrb[14].mxu0  ;;  %v5891_v42 = vpop.f32.mrb[62].mxu1  ;;  %10099 = vst [vmem:[#allocation48_spill] sm:$0xff] %v6903_v39 }
 0x2db   :  { %v6827_v43 = vsub.f32 %v5807_v60, %v5779_v41  ;;  %v1158_v44 = vpop.f32.mrb[15].mxu0  ;;  %v1866_v45 = vpop.f32.mrb[63].mxu1 }
 0x2dc   :  { %v6829_v46 = vsub.f32 %v1351_v61, %v1158_v44  ;;  %2213 = vxpose.xlu0.b32.end [2/2] (short) (narrow) %v5888_v36, 16  ;;  %2244 = vxpose.xlu1.b32.start [1/2] (short) (narrow) %v1866_v45, 16 }
 0x2dd   :  { %10079 = vst [vmem:[#allocation32_spill] sm:$0xff] %v6827_v43 }
 0x2de   :  { %10080 = vst [vmem:[#allocation33_spill] sm:$0xff] %v6829_v46  ;;  %v5898_v47 = vpop.f32.mrb[64].mxu1 }
 0x2df   :  { %v1941_v48 = vpop.f32.mrb[65].mxu1 }
 0x2e0   :  { %2245 = vxpose.xlu1.b32.end [2/2] (short) (narrow) %v5891_v42, 16  ;;  %2276 = vxpose.xlu0.b32.start [1/2] (short) (narrow) %v1941_v48, 16 }
 0x2e2   :  { %v5901_v49 = vpop.f32.mrb[66].mxu1 }
 0x2e3   :  { %v1951_v50 = vpop.f32.mrb[67].mxu1 }
 0x2e4   :  { %2277 = vxpose.xlu0.b32.end [2/2] (short) (narrow) %v5898_v47, 16  ;;  %2308 = vxpose.xlu1.b32.start [1/2] (short) (narrow) %v1951_v50, 16  ;;  %v3244_v47 = vmul.f32 %v6809_v16, %v6809_v16 }
 0x2e6   :  { %v5904_v51 = vpop.f32.mrb[68].mxu1 }
 0x2e7   :  { %v1961_v52 = vpop.f32.mrb[69].mxu1 }
 0x2e8   :  { %2309 = vxpose.xlu1.b32.end [2/2] (short) (narrow) %v5901_v49, 16  ;;  %2340 = vxpose.xlu0.b32.start [1/2] (short) (narrow) %v1961_v52, 16 }
 0x2ea   :  { %v5907_v53 = vpop.f32.mrb[70].mxu1 }
 0x2eb   :  { %v1971_v54 = vpop.f32.mrb[71].mxu1 }
 0x2ec   :  { %2341 = vxpose.xlu0.b32.end [2/2] (short) (narrow) %v5904_v51, 16  ;;  %2372 = vxpose.xlu1.b32.start [1/2] (short) (narrow) %v1971_v54, 16  ;;  %v10104_v51 = vmov 0 }
 0x2ee   :  { %v5910_v55 = vpop.f32.mrb[72].mxu1 }
 0x2ef   :  { %v1981_v56 = vpop.f32.mrb[73].mxu1 }
 0x2f0   :  { %2373 = vxpose.xlu1.b32.end [2/2] (short) (narrow) %v5907_v53, 16  ;;  %2404 = vxpose.xlu0.b32.start [1/2] (short) (narrow) %v1981_v56, 16 }
 0x2f2   :  { %v5913_v57 = vpop.f32.mrb[74].mxu1 }
 0x2f3   :  { %v1991_v58 = vpop.f32.mrb[75].mxu1 }
 0x2f4   :  { %2405 = vxpose.xlu0.b32.end [2/2] (short) (narrow) %v5910_v55, 16  ;;  %2436 = vxpose.xlu1.b32.start [1/2] (short) (narrow) %v1991_v58, 16  ;;  %v10109_v58 = vmov 0 }
 0x2f6   :  { %v5916_v60 = vpop.f32.mrb[76].mxu1 }
 0x2f7   :  { %v2001_v61 = vpop.f32.mrb[77].mxu1 }
 0x2f8   :  { %2437 = vxpose.xlu1.b32.end [2/2] (short) (narrow) %v5913_v57, 16  ;;  %2468 = vxpose.xlu0.b32.start [1/2] (short) (narrow) %v2001_v61, 16 }
 0x2fa   :  { %v5919_v62 = vpop.f32.mrb[78].mxu1 }
 0x2fb   :  { %v2011_v63 = vpop.f32.mrb[79].mxu1 }
 0x2fc   :  { %2469 = vxpose.xlu0.b32.end [2/2] (short) (narrow) %v5916_v60, 16  ;;  %2500 = vxpose.xlu1.b32.start [1/2] (short) (narrow) %v2011_v63, 16 }
 0x2fe   :  { %v6831_v1 = vpop.f32.mrb[16].mxu0 }
 0x2ff   :  { %v3225_v4 = vmul.f32 %v6831_v1, %v6831_v1  ;;  %v6841_v8 = vand.u32 2147483647, %v6831_v1  ;;  %v6843_v9 = vpop.f32.mrb[17].mxu0  ;;  %vm3641_vm1 = vcmp.ne.f32.partialorder %v6831_v1, %v6831_v1 }
 0x300   :  { %10083 = vst [vmem:[#allocation36_spill] sm:$0xff] %v6843_v9  ;;  %2501 = vxpose.xlu1.b32.end [2/2] (short) (narrow) %v5919_v62, 16  ;;  %vm6857_vm4 = vmor %vm3641_vm1, %vm3642_vm2  ;;  %v3247_v62 = vmul.f32 %v6811_v19, %v6811_v19 }
 0x301   :  { %10082 = vst [vmem:[#allocation35_spill] sm:$0xff] %v6841_v8  ;;  %v6849_v11 = vadd.f32 %v3241_v5, %v3225_v4  ;;  %v3609_v12 = vmin.f32 %v6841_v8, %v6834_v2  ;;  %v3610_v14 = vmax.f32 %v6841_v8, %v6834_v2  ;;  %vm3631_vm3 = vcmp.gt.f32.partialorder %v6834_v2, %v6841_v8 }
 0x302   :  { %v10086_v15 = vsel %vm6857_vm4, 4294967295, %v10085_v15  ;;  %v6861_v17 = vpop.f32.mrb[18].mxu0  ;;  %v6962_v4 = vand.u32 2147483647, %v6811_v19 }
 0x303   :  { %10084 = vst [vmem:[#allocation37_spill] sm:$0xff] %v6849_v11  ;;  %10087 = vst [vmem:[#allocation38_spill] sm:$0xff] %v10086_v15  ;;  %6122 = vrcp.f32 %v3610_v14  ;;  %v6863_v18 = vpop.f32.mrb[19].mxu0 }
 0x304   :  { %10088 = vst [vmem:[#allocation39_spill] sm:$0xff] %v6861_v17  ;;  %10089 = vst [vmem:[#allocation40_spill] sm:$0xff] %v6863_v18  ;;  %v3226_v20 = vmul.f32 %v6863_v18, %v6863_v18  ;;  %v6877_v27 = vand.u32 2147483647, %v6863_v18  ;;  %vm3688_vm5 = vcmp.ne.f32.partialorder %v6863_v18, %v6863_v18  ;;  %v3249_v17 = vmul.f32 %v6815_v25, %v6815_v25 }
 0x305   :  { %vm6898_vm8 = vmor %vm3688_vm5, %vm3689_vm6  ;;  %10113 = vst [vmem:[#allocation58_spill] sm:$0xff] %v6962_v4  ;;  %vm3924_vm5 = vcmp.ne.f32.partialorder %v6811_v19, %v6811_v19 }
 0x306   :  { %v6869_v6 = vpop.f32.mrb[20].mxu0  ;;  %v6874_v26 = vadd.f32 %v3242_v21, %v3226_v20  ;;  %10093 = vst [vmem:[#allocation44_spill] sm:$0xff] %v6877_v27  ;;  %v3656_v35 = vmin.f32 %v6877_v27, %v6872_v23  ;;  %v3657_v36 = vmax.f32 %v6877_v27, %v6872_v23  ;;  %vm3678_vm7 = vcmp.gt.f32.partialorder %v6872_v23, %v6877_v27 }
 0x307   :  { %10090 = vst [vmem:[#allocation41_spill] sm:$0xff] %v6869_v6  ;;  %v6879_v29 = vpop.f32.mrb[21].mxu0  ;;  %v3229_v30 = vmul.f32 %v6869_v6, %v6869_v6  ;;  %v10097_v38 = vsel %vm6898_vm8, 4294967295, %v10096_v38  ;;  %v6908_v42 = vand.u32 2147483647, %v6869_v6  ;;  %vm3829_vm10 = vcmp.ne.f32.partialorder %v6869_v6, %v6869_v6 }
 0x308   :  { %10092 = vst [vmem:[#allocation43_spill] sm:$0xff] %v6874_v26  ;;  %10094 = vst [vmem:[#allocation45_spill] sm:$0xff] %v6879_v29  ;;  %6124 = vrcp.f32 %v3657_v36  ;;  %v3228_v45 = vmul.f32 %v6879_v29, %v6879_v29  ;;  %v6933_v52 = vand.u32 2147483647, %v6879_v29  ;;  %vm3782_vm13 = vcmp.ne.f32.partialorder %v6879_v29, %v6879_v29 }
 0x309   :  { %10098 = vst [vmem:[#allocation47_spill] sm:$0xff] %v10097_v38  ;;  %v6905_v41 = vadd.f32 %v3245_v32, %v3229_v30  ;;  %10101 = vst [vmem:[#allocation50_spill] sm:$0xff] %v6908_v42  ;;  %v3797_v49 = vmin.f32 %v6908_v42, %v6890_v33  ;;  %v3798_v50 = vmax.f32 %v6908_v42, %v6890_v33  ;;  %v10116_v32 = vmov 0 }
 0x30a   :  { %v6912_v44 = vpop.f32.mrb[22].mxu0  ;;  %vm3819_vm11 = vcmp.gt.f32.partialorder %v6890_v33, %v6908_v42  ;;  %vm6928_vm12 = vmor %vm3829_vm10, %vm3830_vm9  ;;  %10107 = vst [vmem:[#allocation54_spill] sm:$0xff] %v6933_v52  ;;  %v6935_v54 = vadd.f32 %v3244_v47, %v3228_v45  ;;  %v3750_v56 = vmin.f32 %v6933_v52, %v6903_v39  ;;  %v3751_v57 = vmax.f32 %v6933_v52, %v6903_v39 }
 0x30b   :  { %10100 = vst [vmem:[#allocation49_spill] sm:$0xff] %v6905_v41  ;;  %10102 = vst [vmem:[#allocation51_spill] sm:$0xff] %v6912_v44  ;;  %v6920_v48 = vpop.f32.mrb[23].mxu0  ;;  %v10105_v51 = vsel %vm6928_vm12, 4294967295, %v10104_v51  ;;  %6126 = vrcp.f32 %v3798_v50  ;;  %vm3772_vm1 = vcmp.gt.f32.partialorder %v6903_v39, %v6933_v52  ;;  %v3231_v61 = vmul.f32 %v6912_v44, %v6912_v44 }
 0x30c   :  { %10103 = vst [vmem:[#allocation52_spill] sm:$0xff] %v6920_v48  ;;  %10106 = vst [vmem:[#allocation53_spill] sm:$0xff] %v10105_v51  ;;  %6128 = vrcp.f32 %v3751_v57  ;;  %vm3923_vm2 = vcmp.ne.f32.partialorder %v6912_v44, %v6912_v44  ;;  %v3230_v45 = vmul.f32 %v6920_v48, %v6920_v48  ;;  %v3246_v47 = vmul.f32 %v6813_v22, %v6813_v22 }
 0x30d   :  { %v6123_v53 = vpop.eup %6122  ;;  %10108 = vst [vmem:[#allocation55_spill] sm:$0xff] %v6935_v54  ;;  %vm6947_vm15 = vmor %vm3782_vm13, %vm3783_vm14  ;;  %v6971_v14 = vadd.f32 %v3247_v62, %v3231_v61  ;;  %v7000_v61 = vand.u32 2147483647, %v6920_v48  ;;  %vm3877_vm13 = vcmp.ne.f32.partialorder %v6813_v22, %v6813_v22  ;;  %vm3876_vm14 = vcmp.ne.f32.partialorder %v6920_v48, %v6920_v48 }
 0x30e   :  { %v6941_v55 = vmul.f32 %v6123_v53, %v3609_v12  ;;  %v10110_v58 = vsel %vm6947_vm15, 4294967295, %v10109_v58  ;;  %v6951_v60 = vpop.f32.mrb[24].mxu0  ;;  %v6969_v12 = vand.u32 2147483647, %v6912_v44  ;;  %vm6984_vm9 = vmor %vm3923_vm2, %vm3924_vm5  ;;  %v6997_v53 = vand.u32 2147483647, %v6813_v22 }
 0x30f   :  { %10111 = vst [vmem:[#allocation56_spill] sm:$0xff] %v10110_v58  ;;  %10112 = vst [vmem:[#allocation57_spill] sm:$0xff] %v6951_v60  ;;  %v6959_v63 = vpop.f32.mrb[25].mxu0  ;;  %v10117_v32 = vsel %vm6984_vm9, 4294967295, %v10116_v32  ;;  %v7041_v9 = vand.u32 2147483647, %v6951_v60  ;;  %vm4017_vm5 = vcmp.ne.f32.partialorder %v6951_v60, %v6951_v60  ;;  %vm3971_vm10 = vcmp.ne.f32.partialorder %v6817_v28, %v6817_v28 }
 0x310   :  { %v6966_v5 = vmul.f32 %v6941_v55, %v6941_v55  ;;  %10114 = vst [vmem:[#allocation59_spill] sm:$0xff] %v6969_v12  ;;  %10115 = vst [vmem:[#allocation60_spill] sm:$0xff] %v6971_v14  ;;  %v3891_v21 = vmin.f32 %v6969_v12, %v6962_v4  ;;  %v3892_v30 = vmax.f32 %v6969_v12, %v6962_v4  ;;  %v10166_v52 = vmov 0 }
 0x311   :  { %vm3913_vm6 = vcmp.gt.f32.partialorder %v6962_v4, %v6969_v12  ;;  %10118 = vst [vmem:[#allocation61_spill] sm:$0xff] %v10117_v32  ;;  %10119 = vst [vmem:[#allocation62_spill] sm:$0xff] %v6997_v53  ;;  %v7002_v14 = vadd.f32 %v3246_v47, %v3230_v45  ;;  %v3844_v26 = vmin.f32 %v7000_v61, %v6997_v53  ;;  %v7026_v47 = vand.u32 2147483647, %v6815_v25 }
 0x312   :  { %v3614_v20 = vmul.f32 0.002785687, %v6966_v5  ;;  %v6988_v36 = vpop.f32.mrb[26].mxu0  ;;  %6130 = vrcp.f32 %v3892_v30  ;;  %10120 = vst [vmem:[#allocation63_spill] sm:$0xff] %v7000_v61  ;;  %v6125_v62 = vpop.eup %6124  ;;  %v3845_v11 = vmax.f32 %v7000_v61, %v6997_v53  ;;  %vm7030_vm2 = vmor %vm3876_vm14, %vm3877_vm13  ;;  %vm4018_vm13 = vcmp.ne.f32.partialorder %v6815_v25, %v6815_v25 }
 0x313   :  { %v6994_v50 = vpop.f32.mrb[27].mxu0  ;;  %10121 = vst [vmem:[#allocation64_spill] sm:$0xff] %v7002_v14  ;;  %v7005_v41 = vmul.f32 %v6125_v62, %v3656_v35  ;;  %10124 = vst [vmem:[#allocation67_spill] sm:$0xff] %v7026_v47  ;;  %v10125_v62 = vmov 0  ;;  %vm9862_vm14 = vcmp.lt.f32.partialorder %v6831_v1, 0.0 }
 0x314   :  { %v3615_v57 = vadd.f32 -0.015866, %v3614_v20  ;;  %6132 = vrcp.f32 %v3845_v11  ;;  %v10126_v62 = vsel %vm7030_vm2, 4294967295, %v10125_v62  ;;  %10128 = vst [vmem:[#allocation69_spill] sm:$0xff] %v7041_v9 }
 0x315   :  { %v6127_v30 = vpop.eup %6126  ;;  %v7021_v35 = vmul.f32 %v7005_v41, %v7005_v41  ;;  %10127 = vst [vmem:[#allocation68_spill] sm:$0xff] %v10126_v62 }
 0x316   :  { %v3616_v54 = vmul.f32 %v3615_v57, %v6966_v5  ;;  %v7011_v7 = vpop.f32.mrb[28].mxu0  ;;  %v7028_v57 = vmul.f32 %v6127_v30, %v3797_v49  ;;  %v6129_v14 = vpop.eup %6128 }
 0x317   :  { %10122 = vst [vmem:[#allocation65_spill] sm:$0xff] %v7011_v7  ;;  %v7017_v20 = vpop.f32.mrb[29].mxu0  ;;  %v3661_v11 = vmul.f32 0.002785687, %v7021_v35  ;;  %v7049_v62 = vmul.f32 %v6129_v14, %v3750_v56 }
 0x318   :  { %10123 = vst [vmem:[#allocation66_spill] sm:$0xff] %v7017_v20  ;;  %v3617_v45 = vadd.f32 0.04247222, %v3616_v54  ;;  %v3233_v54 = vmul.f32 %v6951_v60, %v6951_v60  ;;  %v7047_v30 = vmul.f32 %v7028_v57, %v7028_v57 }
 0x319   :  { %v7060_v51 = vmul.f32 %v7049_v62, %v7049_v62 }
 0x31a   :  { %v3618_v3 = vmul.f32 %v3617_v45, %v6966_v5  ;;  %v7043_v49 = vpop.f32.mrb[30].mxu0  ;;  %v3662_v45 = vadd.f32 -0.015866, %v3661_v11  ;;  %v7053_v19 = vadd.f32 %v3249_v17, %v3233_v54  ;;  %v3802_v16 = vmul.f32 0.002785687, %v7047_v30 }
 0x31b   :  { %10129 = vst [vmem:[#allocation70_spill] sm:$0xff] %v7043_v49  ;;  %v7051_v22 = vpop.f32.mrb[31].mxu0  ;;  %v3755_v14 = vmul.f32 0.002785687, %v7060_v51 }
 0x31c   :  { %10130 = vst [vmem:[#allocation71_spill] sm:$0xff] %v7051_v22  ;;  %v3619_v32 = vadd.f32 -0.074975304, %v3618_v3  ;;  %10131 = vst [vmem:[#allocation72_spill] sm:$0xff] %v7053_v19  ;;  %v6131_v13 = vpop.eup %6130  ;;  %v3663_v56 = vmul.f32 %v3662_v45, %v7021_v35  ;;  %v3986_v3 = vmax.f32 %v7041_v9, %v7026_v47  ;;  %v3803_v17 = vadd.f32 -0.015866, %v3802_v16 }
 0x31d   :  { %v7069_v58 = vmul.f32 %v6131_v13, %v3891_v21  ;;  %v3756_v10 = vadd.f32 -0.015866, %v3755_v14 }
 0x31e   :  { %v3620_v38 = vmul.f32 %v3619_v32, %v6966_v5  ;;  %v3664_v11 = vadd.f32 0.04247222, %v3663_v56  ;;  %v3804_v19 = vmul.f32 %v3803_v17, %v7047_v30  ;;  %v6133_v15 = vpop.eup %6132  ;;  %6134 = vrcp.f32 %v3986_v3 }
 0x31f   :  { %v7076_v0 = vmul.f32 %v7069_v58, %v7069_v58  ;;  %v3757_v16 = vmul.f32 %v3756_v10, %v7060_v51  ;;  %v7080_v21 = vmul.f32 %v6133_v15, %v3844_v26 }
 0x320   :  { %v3621_v54 = vadd.f32 0.1064488, %v3620_v38  ;;  %v3665_v45 = vmul.f32 %v3664_v11, %v7021_v35  ;;  %v3805_v22 = vadd.f32 0.04247222, %v3804_v19 }
 0x321   :  { %v3896_v13 = vmul.f32 0.002785687, %v7076_v0  ;;  %v3758_v17 = vadd.f32 0.04247222, %v3757_v16  ;;  %v7087_v49 = vmul.f32 %v7080_v21, %v7080_v21 }
 0x322   :  { %v3622_v32 = vmul.f32 %v3621_v54, %v6966_v5  ;;  %v3666_v38 = vadd.f32 -0.074975304, %v3665_v45  ;;  %v3806_v56 = vmul.f32 %v3805_v22, %v7047_v30  ;;  %v10170_v39 = vld [vmem:[#allocation70_spill] sm:$0xff] }
 0x323   :  { %v3897_v11 = vadd.f32 -0.015866, %v3896_v13  ;;  %v3759_v10 = vmul.f32 %v3758_v17, %v7060_v51  ;;  %v3849_v26 = vmul.f32 0.002785687, %v7087_v49 }
 0x324   :  { %v3623_v46 = vadd.f32 -0.14207031, %v3622_v32  ;;  %v3667_v54 = vmul.f32 %v3666_v38, %v7021_v35  ;;  %v3807_v19 = vadd.f32 -0.074975304, %v3806_v56 }
 0x325   :  { %v3898_v15 = vmul.f32 %v3897_v11, %v7076_v0  ;;  %v3760_v16 = vadd.f32 -0.074975304, %v3759_v10  ;;  %v3850_v43 = vadd.f32 -0.015866, %v3849_v26 }
 0x326   :  { %v3624_v14 = vmul.f32 %v3623_v46, %v6966_v5  ;;  %v3668_v45 = vadd.f32 0.1064488, %v3667_v54  ;;  %v3808_v22 = vmul.f32 %v3807_v19, %v7047_v30 }
 0x327   :  { %v3899_v13 = vadd.f32 0.04247222, %v3898_v15  ;;  %v3761_v56 = vmul.f32 %v3760_v16, %v7060_v51  ;;  %v3851_v54 = vmul.f32 %v3850_v43, %v7087_v49 }
 0x328   :  { %v3625_v32 = vadd.f32 0.19993454, %v3624_v14  ;;  %v3669_v38 = vmul.f32 %v3668_v45, %v7021_v35  ;;  %v3809_v20 = vadd.f32 0.1064488, %v3808_v22 }
 0x329   :  { %v3900_v14 = vmul.f32 %v3899_v13, %v7076_v0  ;;  %v3762_v7 = vadd.f32 0.1064488, %v3761_v56  ;;  %v3852_v45 = vadd.f32 0.04247222, %v3851_v54 }
 0x32a   :  { %v3626_v46 = vmul.f32 %v3625_v32, %v6966_v5  ;;  %v3670_v17 = vadd.f32 -0.14207031, %v3669_v38  ;;  %v3810_v11 = vmul.f32 %v3809_v20, %v7047_v30 }
 0x32b   :  { %v3901_v32 = vadd.f32 -0.074975304, %v3900_v14  ;;  %v3763_v26 = vmul.f32 %v3762_v7, %v7060_v51  ;;  %v3853_v43 = vmul.f32 %v3852_v45, %v7087_v49 }
 0x32c   :  { %v3627_v40 = vadd.f32 -0.33333147, %v3626_v46  ;;  %v3671_v10 = vmul.f32 %v3670_v17, %v7021_v35  ;;  %v3811_v15 = vadd.f32 -0.14207031, %v3810_v11 }
 0x32d   :  { %v3902_v46 = vmul.f32 %v3901_v32, %v7076_v0  ;;  %v3764_v38 = vadd.f32 -0.14207031, %v3763_v26  ;;  %v3854_v13 = vadd.f32 -0.074975304, %v3853_v43  ;;  %v6135_v26 = vpop.eup %6134 }
 0x32e   :  { %v3628_v19 = vmul.f32 %v3627_v40, %v6966_v5  ;;  %v3672_v16 = vadd.f32 0.19993454, %v3671_v10  ;;  %v3812_v20 = vmul.f32 %v3811_v15, %v7047_v30 }
 0x32f   :  { %v3903_v5 = vadd.f32 0.1064488, %v3902_v46  ;;  %v3765_v17 = vmul.f32 %v3764_v38, %v7060_v51  ;;  %v3855_v11 = vmul.f32 %v3854_v13, %v7087_v49  ;;  %v7123_v38 = vand.u32 2147483647, %v6817_v28 }
 0x330   :  { %v3629_v22 = vmul.f32 %v3628_v19, %v6941_v55  ;;  %v3673_v40 = vmul.f32 %v3672_v16, %v7021_v35  ;;  %v3813_v56 = vadd.f32 0.19993454, %v3812_v20 }
 0x331   :  { %v3904_v54 = vmul.f32 %v3903_v5, %v7076_v0  ;;  %v3766_v10 = vadd.f32 0.19993454, %v3765_v17  ;;  %v3856_v15 = vadd.f32 0.1064488, %v3855_v11  ;;  %v3248_v17 = vmul.f32 %v6817_v28, %v6817_v28 }
 0x332   :  { %v3630_v3 = vadd.f32 %v3629_v22, %v6941_v55  ;;  %v3674_v14 = vadd.f32 -0.33333147, %v3673_v40  ;;  %v3814_v19 = vmul.f32 %v3813_v56, %v7047_v30  ;;  %v10133_v11 = vmin.f32 %v7041_v9, %v7026_v47 }
 0x333   :  { %v3905_v45 = vadd.f32 -0.14207031, %v3904_v54  ;;  %v3767_v43 = vmul.f32 %v3766_v10, %v7060_v51  ;;  %v3857_v40 = vmul.f32 %v3856_v15, %v7087_v49 }
 0x334   :  { %v3632_v7 = vsub.f32 1.5707964, %v3630_v3  ;;  %v3675_v32 = vmul.f32 %v3674_v14, %v7021_v35  ;;  %v3815_v16 = vadd.f32 -0.33333147, %v3814_v19  ;;  %v7141_v19 = vmul.f32 %v6135_v26, %v10133_v11 }
 0x335   :  { %v3906_v20 = vmul.f32 %v3905_v45, %v7076_v0  ;;  %v3768_v13 = vadd.f32 -0.33333147, %v3767_v43  ;;  %v3858_v54 = vadd.f32 -0.14207031, %v3857_v40  ;;  %v10134_v40 = vmov 0 }
 0x336   :  { %v3633_v55 = vsel %vm3631_vm3, %v3632_v7, %v3630_v3  ;;  %v3676_v46 = vmul.f32 %v3675_v32, %v7005_v41  ;;  %v3816_v3 = vmul.f32 %v3815_v16, %v7047_v30  ;;  %v7135_v7 = vand.u32 2147483647, %v6819_v31 }
 0x337   :  { %v3635_v22 = vsub.f32 3.1415927, %v3633_v55  ;;  %v3907_v56 = vadd.f32 0.19993454, %v3906_v20  ;;  %v3769_v10 = vmul.f32 %v3768_v13, %v7060_v51  ;;  %vm9866_vm3 = vcmp.lt.f32.partialorder %v6863_v18, 0.0 }
 0x338   :  { %v3677_v5 = vadd.f32 %v3676_v46, %v7005_v41  ;;  %v3817_v14 = vmul.f32 %v3816_v3, %v7028_v57  ;;  %v3859_v45 = vmul.f32 %v3858_v54, %v7087_v49  ;;  %v7154_v15 = vmul.f32 %v7141_v19, %v7141_v19 }
 0x339   :  { %v7127_v35 = vsel %vm9862_vm14, %v3635_v22, %v3633_v55  ;;  %v3908_v41 = vmul.f32 %v3907_v56, %v7076_v0  ;;  %v7147_v55 = vmul.f32 %v6819_v31, %v6819_v31  ;;  %vm9863_vm14 = vcmp.lt.f32.partialorder %v6869_v6, 0.0 }
 0x33a   :  { %10132 = vst [vmem:[#allocation73_spill] sm:$0xff] %v7127_v35  ;;  %v3679_v30 = vsub.f32 1.5707964, %v3677_v5  ;;  %v3818_v32 = vadd.f32 %v3817_v14, %v7028_v57  ;;  %v3770_v26 = vmul.f32 %v3769_v10, %v7049_v62  ;;  %v3860_v43 = vadd.f32 0.19993454, %v3859_v45 }
 0x33b   :  { %v3909_v22 = vadd.f32 -0.33333147, %v3908_v41  ;;  %v3990_v3 = vmul.f32 0.002785687, %v7154_v15  ;;  %v7188_v14 = vand.u32 2147483647, %v6959_v63 }
 0x33c   :  { %v3680_v51 = vsel %vm3678_vm7, %v3679_v30, %v3677_v5  ;;  %v3820_v46 = vsub.f32 1.5707964, %v3818_v32  ;;  %v3771_v57 = vadd.f32 %v3770_v26, %v7049_v62  ;;  %vm7171_vm7 = vmor %vm4017_vm5, %vm4018_vm13  ;;  %v3232_v5 = vmul.f32 %v6959_v63, %v6959_v63 }
 0x33d   :  { %v3682_v16 = vsub.f32 3.1415927, %v3680_v51  ;;  %v3910_v20 = vmul.f32 %v3909_v22, %v7076_v0  ;;  %v10135_v40 = vsel %vm7171_vm7, 4294967295, %v10134_v40  ;;  %v3861_v62 = vmul.f32 %v3860_v43, %v7087_v49 }
 0x33e   :  { %10136 = vst [vmem:[#allocation74_spill] sm:$0xff] %v10135_v40  ;;  %v3821_v0 = vsel %vm3819_vm11, %v3820_v46, %v3818_v32  ;;  %v3773_v11 = vsub.f32 1.5707964, %v3771_v57  ;;  %v3991_v10 = vadd.f32 -0.015866, %v3990_v3  ;;  %v7193_v45 = vadd.f32 %v3248_v17, %v3232_v5 }
 0x33f   :  { %v7181_v56 = vsel %vm9866_vm3, %v3682_v16, %v3680_v51  ;;  %v3823_v54 = vsub.f32 3.1415927, %v3821_v0  ;;  %v3911_v30 = vmul.f32 %v3910_v20, %v7069_v58  ;;  %v3862_v41 = vadd.f32 -0.33333147, %v3861_v62 }
 0x340   :  { %v7177_v13 = vpop.trf.xlu0  ;;  %10137 = vst [vmem:[#allocation75_spill] sm:$0xff] %v7181_v56  ;;  %10138 = vst [vmem:[#allocation76_spill] sm:$0xff] %v7193_v45  ;;  %v3939_v32 = vmax.f32 %v7188_v14, %v7123_v38  ;;  %v3774_v22 = vsel %vm3772_vm1, %v3773_v11, %v3771_v57  ;;  %v3992_v46 = vmul.f32 %v3991_v10, %v7154_v15  ;;  %vm9864_vm1 = vcmp.lt.f32.partialorder %v6879_v29, 0.0 }
 0x341   :  { %5924 = vmatprep.mubr.msk.f32.mxu0 %vm9916_vm0, %v7177_v13  ;;  %v7201_v26 = vsel %vm9863_vm14, %v3823_v54, %v3821_v0  ;;  %v3912_v16 = vadd.f32 %v3911_v30, %v7069_v58  ;;  %v3776_v20 = vsub.f32 3.1415927, %v3774_v22  ;;  %v3863_v3 = vmul.f32 %v3862_v41, %v7087_v49 }
 0x342   :  { %10139 = vst [vmem:[#allocation77_spill] sm:$0xff] %v7201_v26  ;;  %6136 = vrcp.f32 %v3939_v32  ;;  %v3993_v58 = vadd.f32 0.04247222, %v3992_v46  ;;  %vm4112_vm5 = vcmp.ne.f32.partialorder %v6819_v31, %v6819_v31  ;;  %v7224_v49 = vand.u32 2147483647, %v6821_v34  ;;  %v10156_v31 = vld [vmem:[#allocation65_spill] sm:$0xff] }
 0x343   :  { %v3914_v57 = vsub.f32 1.5707964, %v3912_v16  ;;  %v7228_v5 = vsel %vm9864_vm1, %v3776_v20, %v3774_v22  ;;  %v3864_v0 = vmul.f32 %v3863_v3, %v7080_v21  ;;  %vm3970_vm13 = vcmp.ne.f32.partialorder %v6959_v63, %v6959_v63 }
 0x344   :  { %v7208_v17 = vpop.trf.xlu0  ;;  %v7210_v43 = vpop.trf.xlu1  ;;  %10140 = vst [vmem:[#allocation78_spill] sm:$0xff] %v7228_v5  ;;  %vm7241_vm14 = vmor %vm3970_vm13, %vm3971_vm10  ;;  %v10141_v54 = vmov 0  ;;  %v3235_v11 = vmul.f32 %v6988_v36, %v6988_v36  ;;  %v7248_v30 = vand.u32 2147483647, %v6988_v36  ;;  %vm4065_vm13 = vcmp.ne.f32.partialorder %v6821_v34, %v6821_v34  ;;  %v10173_v5 = vld [vmem:[#allocation33_spill] sm:$0xff] }
 0x345   :  { %5925 = vmatmul.mubr.msk.f32.vlgmr.msra.gmra.mrb[32].mxu0 %vm9916_vm0, %v7208_v17  ;;  %v3915_v62 = vsel %vm3913_vm6, %v3914_v57, %v3912_v16  ;;  %v10142_v54 = vsel %vm7241_vm14, 4294967295, %v10141_v54  ;;  %vm9865_vm6 = vcmp.lt.f32.partialorder %v6912_v44, 0.0  ;;  %v3865_v22 = vadd.f32 %v3864_v0, %v7080_v21 }
 0x346   :  { %5927 = vmatprep.mubr.msk.f32.mxu0 %vm9916_vm0, %v7210_v43  ;;  %6075 = vmatpush3.bf16.msra.mxu0 %v6551_v59  ;;  %v3994_v59 = vmul.f32 %v3993_v58, %v7154_v15  ;;  %10143 = vst [vmem:[#allocation79_spill] sm:$0xff] %v10142_v54  ;;  %v3917_v32 = vsub.f32 3.1415927, %v3915_v62  ;;  %v3250_v16 = vmul.f32 %v6821_v34, %v6821_v34  ;;  %vm9882_vm10 = vcmp.lt.f32.partialorder %v6920_v48, 0.0 }
 0x347   :  { %6077 = vmatprep.subr.bf16.mxu0 %v6546_v24  ;;  %v7261_v20 = vadd.f32 %v7147_v55, %v3235_v11  ;;  %v4080_v57 = vmax.f32 %v7248_v30, %v7135_v7  ;;  %v3867_v58 = vsub.f32 1.5707964, %v3865_v22  ;;  %vm4111_vm1 = vcmp.ne.f32.partialorder %v6988_v36, %v6988_v36 }
 0x348   :  { %v7250_v10 = vpop.trf.xlu1  ;;  %v7252_v41 = vpop.trf.xlu0  ;;  %v3995_v46 = vadd.f32 -0.074975304, %v3994_v59  ;;  %v7271_v21 = vsel %vm9865_vm6, %v3917_v32, %v3915_v62  ;;  %v3234_v0 = vmul.f32 %v6994_v50, %v6994_v50  ;;  %v7287_v11 = vand.u32 2147483647, %v6823_v37  ;;  %vm7295_vm3 = vmor %vm4111_vm1, %vm4112_vm5 }
 0x349   :  { %5928 = vmatmul.mubr.msk.f32.gmra.mrb[34].mxu0 %vm9916_vm0, %v7250_v10  ;;  %10144 = vst [vmem:[#allocation80_spill] sm:$0xff] %v7261_v20  ;;  %10145 = vst [vmem:[#allocation81_spill] sm:$0xff] %v7271_v21  ;;  %6138 = vrcp.f32 %v4080_v57  ;;  %vm10146_vm6 = vcmp.gt.f32.partialorder %v6997_v53, %v7000_v61  ;;  %v7300_v57 = vand.u32 2147483647, %v6994_v50  ;;  %v3253_v3 = vmul.f32 %v6823_v37, %v6823_v37 }
 0x34a   :  { %5930 = vmatprep.mubr.msk.f32.mxu0 %vm9916_vm0, %v7252_v41  ;;  %v3996_v55 = vmul.f32 %v3995_v46, %v7154_v15  ;;  %v3868_v32 = vsel %vm10146_vm6, %v3867_v58, %v3865_v22  ;;  %v10147_v46 = vmov 0  ;;  %v7307_v58 = vadd.f32 %v3250_v16, %v3234_v0 }
 0x34b   :  { %v10148_v46 = vsel %vm7295_vm3, 4294967295, %v10147_v46  ;;  %v3870_v51 = vsub.f32 3.1415927, %v3868_v32  ;;  %vm4064_vm5 = vcmp.ne.f32.partialorder %v6994_v50, %v6994_v50  ;;  %v10152_v0 = vmin.f32 %v7188_v14, %v7123_v38 }
 0x34c   :  { %v7282_v59 = vpop.trf.xlu0  ;;  %v7284_v62 = vpop.trf.xlu1  ;;  %10149 = vst [vmem:[#allocation82_spill] sm:$0xff] %v10148_v46  ;;  %v3997_v22 = vadd.f32 0.1064488, %v3996_v55  ;;  %10150 = vst [vmem:[#allocation83_spill] sm:$0xff] %v7307_v58  ;;  %v4033_v46 = vmax.f32 %v7300_v57, %v7224_v49  ;;  %v10153_v45 = vmov 0  ;;  %v3237_v54 = vmul.f32 %v10156_v31, %v10156_v31 }
 0x34d   :  { %5931 = vmatmul.mubr.msk.f32.gmra.mrb[36].mxu0 %vm9916_vm0, %v7282_v59  ;;  %v6137_v20 = vpop.eup %6136  ;;  %v7321_v16 = vsel %vm9882_vm10, %v3870_v51, %v3868_v32  ;;  %vm7332_vm6 = vmor %vm4064_vm5, %vm4065_vm13  ;;  %v10157_v32 = vld [vmem:[#allocation31_spill] sm:$0xff]  ;;  %vm4206_vm13 = vcmp.ne.f32.partialorder %v6823_v37, %v6823_v37  ;;  %vm4205_vm10 = vcmp.ne.f32.partialorder %v10156_v31, %v10156_v31  ;;  %v7427_v33 = vand.u32 2147483647, %v10173_v5 }
 0x34e   :  { %5933 = vmatprep.mubr.msk.f32.mxu0 %vm9916_vm0, %v7284_v62  ;;  %10151 = vst [vmem:[#allocation84_spill] sm:$0xff] %v7321_v16  ;;  %v3998_v55 = vmul.f32 %v3997_v22, %v7154_v15  ;;  %v7327_v58 = vmul.f32 %v6137_v20, %v10152_v0  ;;  %v10154_v45 = vsel %vm7332_vm6, 4294967295, %v10153_v45  ;;  %v7343_v22 = vand.u32 2147483647, %v10157_v32  ;;  %vm7372_vm1 = vmor %vm4205_vm10, %vm4206_vm13  ;;  %v10164_v16 = vld [vmem:[#allocation32_spill] sm:$0xff] }
 0x34f   :  { %10155 = vst [vmem:[#allocation85_spill] sm:$0xff] %v10154_v45  ;;  %6140 = vrcp.f32 %v4033_v46  ;;  %v7346_v20 = vand.u32 2147483647, %v10156_v31  ;;  %v7356_v34 = vadd.f32 %v3253_v3, %v3237_v54  ;;  %v3252_v40 = vmul.f32 %v10157_v32, %v10157_v32 }
 0x350   :  { %v7338_v28 = vpop.trf.xlu1  ;;  %v7340_v51 = vpop.trf.xlu0  ;;  %v3999_v0 = vadd.f32 -0.14207031, %v3998_v55  ;;  %v7354_v45 = vmul.f32 %v7327_v58, %v7327_v58  ;;  %v10159_v55 = vmov 0  ;;  %v7386_v4 = vand.u32 2147483647, %v10164_v16 }
 0x351   :  { %5934 = vmatmul.mubr.msk.f32.gmra.mrb[38].mxu0 %vm9916_vm0, %v7338_v28  ;;  %10158 = vst [vmem:[#allocation65_spill] sm:$0xff] %v7356_v34  ;;  %v4174_v37 = vmax.f32 %v7346_v20, %v7287_v11  ;;  %v10160_v55 = vsel %vm7372_vm1, 4294967295, %v10159_v55  ;;  %v10162_v34 = vld [vmem:[#allocation66_spill] sm:$0xff]  ;;  %vm4159_vm13 = vcmp.ne.f32.partialorder %v10157_v32, %v10157_v32  ;;  %vm4299_vm11 = vcmp.ne.f32.partialorder %v10170_v39, %v10170_v39 }
 0x352   :  { %5936 = vmatprep.mubr.msk.f32.mxu0 %vm9916_vm0, %v7340_v51  ;;  %v4000_v54 = vmul.f32 %v3999_v0, %v7154_v15  ;;  %v3943_v3 = vmul.f32 0.002785687, %v7354_v45  ;;  %10161 = vst [vmem:[#allocation86_spill] sm:$0xff] %v10160_v55  ;;  %v3236_v46 = vmul.f32 %v10162_v34, %v10162_v34  ;;  %v7379_v25 = vand.u32 2147483647, %v10162_v34 }
 0x353   :  { %6142 = vrcp.f32 %v4174_v37  ;;  %vm4158_vm10 = vcmp.ne.f32.partialorder %v10162_v34, %v10162_v34  ;;  %v6139_v0 = vpop.eup %6138  ;;  %v10169_v37 = vmin.f32 %v7248_v30, %v7135_v7  ;;  %vm4201_vm14 = vcmp.lt.s32.totalorder %v10156_v31, 0 }
 0x354   :  { %v7381_v53 = vpop.trf.xlu0  ;;  %v7383_v61 = vpop.trf.xlu1  ;;  %v4001_v55 = vadd.f32 0.19993454, %v4000_v54  ;;  %v3944_v12 = vadd.f32 -0.015866, %v3943_v3  ;;  %v7394_v21 = vadd.f32 %v3252_v40, %v3236_v46  ;;  %vm7398_vm5 = vmor %vm4158_vm10, %vm4159_vm13  ;;  %v4127_v54 = vmax.f32 %v7379_v25, %v7343_v22 }
 0x355   :  { %10163 = vst [vmem:[#allocation66_spill] sm:$0xff] %v7383_v61  ;;  %5937 = vmatmul.mubr.msk.f32.gmra.mrb[40].mxu0 %vm9916_vm0, %v7381_v53  ;;  %v10167_v52 = vsel %vm7398_vm5, 4294967295, %v10166_v52  ;;  %v7407_v32 = vmul.f32 %v6139_v0, %v10169_v37  ;;  %v3255_v40 = vmul.f32 %v10164_v16, %v10164_v16  ;;  %vm4300_vm10 = vcmp.ne.f32.partialorder %v10164_v16, %v10164_v16 }
 0x356   :  { %10165 = vst [vmem:[#allocation87_spill] sm:$0xff] %v7394_v21  ;;  %10168 = vst [vmem:[#allocation88_spill] sm:$0xff] %v10167_v52  ;;  %5939 = vmatprep.mubr.msk.f32.mxu0 %vm9916_vm0, %v7383_v61  ;;  %v4002_v46 = vmul.f32 %v4001_v55, %v7154_v15  ;;  %v3945_v3 = vmul.f32 %v3944_v12, %v7354_v45  ;;  %v3239_v21 = vmul.f32 %v10170_v39, %v10170_v39 }
 0x357   :  { %v7420_v52 = vand.u32 2147483647, %v10170_v39  ;;  %v7431_v26 = vmul.f32 %v7407_v32, %v7407_v32  ;;  %6144 = vrcp.f32 %v4127_v54  ;;  %vm7466_vm13 = vmor %vm4299_vm11, %vm4300_vm10  ;;  %vm4253_vm11 = vcmp.ne.f32.partialorder %v10173_v5, %v10173_v5 }
 0x358   :  { %v7422_v0 = vpop.trf.xlu1  ;;  %v7424_v37 = vpop.trf.xlu0  ;;  %v4003_v12 = vadd.f32 -0.33333147, %v4002_v46  ;;  %v3946_v55 = vadd.f32 0.04247222, %v3945_v3  ;;  %v7437_v42 = vadd.f32 %v3255_v40, %v3239_v21  ;;  %v3254_v46 = vmul.f32 %v10173_v5, %v10173_v5 }
 0x359   :  { %10171 = vst [vmem:[#allocation70_spill] sm:$0xff] %v7422_v0  ;;  %10172 = vst [vmem:[#allocation89_spill] sm:$0xff] %v7424_v37  ;;  %5940 = vmatmul.mubr.msk.f32.gmra.mrb[42].mxu0 %vm9916_vm0, %v7422_v0  ;;  %v6141_v27 = vpop.eup %6140  ;;  %v4084_v56 = vmul.f32 0.002785687, %v7431_v26  ;;  %v4268_v54 = vmax.f32 %v7420_v52, %v7386_v4  ;;  %v10175_v3 = vmin.f32 %v7300_v57, %v7224_v49  ;;  %vm9930_vm5 = vcmp.lt.f32.partialorder %v6951_v60, 0.0 }
 0x35a   :  { %10174 = vst [vmem:[#allocation90_spill] sm:$0xff] %v7437_v42  ;;  %5942 = vmatprep.mubr.msk.f32.mxu0 %vm9916_vm0, %v7424_v37  ;;  %v4004_v21 = vmul.f32 %v4003_v12, %v7154_v15  ;;  %v3947_v40 = vmul.f32 %v3946_v55, %v7354_v45  ;;  %v10178_v15 = vmov 0  ;;  %v10181_v12 = vld [vmem:[#allocation71_spill] sm:$0xff] }
 0x35b   :  { %v7455_v23 = vmul.f32 %v6141_v27, %v10175_v3  ;;  %v4085_v44 = vadd.f32 -0.015866, %v4084_v56  ;;  %6146 = vrcp.f32 %v4268_v54  ;;  %v10179_v15 = vsel %vm7466_vm13, 4294967295, %v10178_v15 }
 0x35c   :  { %v7459_v42 = vpop.trf.xlu0  ;;  %v7461_v48 = vpop.trf.xlu1  ;;  %10180 = vst [vmem:[#allocation93_spill] sm:$0xff] %v10179_v15  ;;  %v3238_v27 = vmul.f32 %v10181_v12, %v10181_v12  ;;  %v7473_v55 = vand.u32 2147483647, %v10181_v12  ;;  %v4005_v3 = vmul.f32 %v4004_v21, %v7141_v19  ;;  %v3948_v56 = vadd.f32 -0.074975304, %v3947_v40 }
 0x35d   :  { %10176 = vst [vmem:[#allocation91_spill] sm:$0xff] %v7459_v42  ;;  %10177 = vst [vmem:[#allocation92_spill] sm:$0xff] %v7461_v48  ;;  %5943 = vmatmul.mubr.msk.f32.gmra.mrb[44].mxu0 %vm9916_vm0, %v7459_v42  ;;  %v7480_v54 = vmul.f32 %v7455_v23, %v7455_v23  ;;  %v6143_v15 = vpop.eup %6142  ;;  %v4086_v16 = vmul.f32 %v4085_v44, %v7431_v26  ;;  %vm4252_vm10 = vcmp.ne.f32.partialorder %v10181_v12, %v10181_v12 }
 0x35e   :  { %5945 = vmatprep.mubr.msk.f32.mxu0 %vm9916_vm0, %v7461_v48  ;;  %v7485_v29 = vadd.f32 %v3254_v46, %v3238_v27  ;;  %v4221_v18 = vmax.f32 %v7473_v55, %v7427_v33  ;;  %v4006_v21 = vadd.f32 %v4005_v3, %v7141_v19  ;;  %v3949_v40 = vmul.f32 %v3948_v56, %v7354_v45 }
 0x35f   :  { %v4037_v42 = vmul.f32 0.002785687, %v7480_v54  ;;  %v10183_v48 = vmin.f32 %v7346_v20, %v7287_v11  ;;  %v4087_v27 = vadd.f32 0.04247222, %v4086_v16  ;;  %vm10185_vm13 = vcmp.gt.f32.partialorder %v7026_v47, %v7041_v9 }
 0x360   :  { %10182 = vst [vmem:[#allocation94_spill] sm:$0xff] %v7485_v29  ;;  %v7499_v44 = vpop.trf.xlu1  ;;  %v2292_v46 = vpop.trf.xlu0  ;;  %6148 = vrcp.f32 %v4221_v18  ;;  %v4008_v19 = vsub.f32 1.5707964, %v4006_v21  ;;  %v3950_v3 = vadd.f32 0.1064488, %v3949_v40  ;;  %v10189_v47 = vmin.f32 %v7379_v25, %v7343_v22 }
 0x361   :  { %v7497_v2 = vmul.f32 %v6143_v15, %v10183_v48  ;;  %10184 = vst [vmem:[#allocation95_spill] sm:$0xff] %v7499_v44  ;;  %5946 = vmatmul.mubr.msk.f32.gmra.mrb[46].mxu0 %vm9916_vm0, %v7499_v44  ;;  %5952 = vmatprep.mubr.msk.f32.mxu1 %vm9916_vm0, %v2292_v46  ;;  %v4038_v56 = vadd.f32 -0.015866, %v4037_v42  ;;  %v6145_v15 = vpop.eup %6144  ;;  %v4088_v18 = vmul.f32 %v4087_v27, %v7431_v26 }
 0x362   :  { %5980 = vmatprep.mubr.msk.f32.mxu0 %vm9916_vm0, %v2292_v46  ;;  %v4009_v16 = vsel %vm10185_vm13, %v4008_v19, %v4006_v21  ;;  %v3951_v42 = vmul.f32 %v3950_v3, %v7354_v45  ;;  %vm7522_vm0 = vmor %vm4252_vm10, %vm4253_vm11  ;;  %v10186_v46 = vmov 0  ;;  %v7530_v21 = vmul.f32 %v6145_v15, %v10189_v47 }
 0x363   :  { %v7508_v48 = vmul.f32 %v7497_v2, %v7497_v2  ;;  %v4039_v40 = vmul.f32 %v4038_v56, %v7480_v54  ;;  %v10187_v46 = vsel %vm7522_vm0, 4294967295, %v10186_v46  ;;  %v4011_v44 = vsub.f32 3.1415927, %v4009_v16 }
 0x364   :  { %10188 = vst [vmem:[#allocation96_spill] sm:$0xff] %v10187_v46  ;;  %v2293_v27 = vpop.trf.xlu0  ;;  %v2324_v29 = vpop.trf.xlu1  ;;  %v4089_v5 = vadd.f32 -0.074975304, %v4088_v18  ;;  %vm10190_vm13 = vcmask 130048   ;;  %v3952_v19 = vadd.f32 -0.14207031, %v3951_v42  ;;  %v7543_v47 = vmul.f32 %v7530_v21, %v7530_v21 }
 0x365   :  { %v4178_v6 = vmul.f32 0.002785687, %v7508_v48  ;;  %5953 = vmatmul.mubr.msk.f32.vlgmr.msra.gmra.mrb[80].mxu1 %vm10190_vm13, %v2293_v27  ;;  %vm10191_vm1 = vmmov %vm10190_vm13  ;;  %v4040_v3 = vadd.f32 0.04247222, %v4039_v40  ;;  %v6147_v46 = vpop.eup %6146  ;;  %v7538_v18 = vsel %vm9930_vm5, %v4011_v44, %v4009_v16  ;;  %vm10209_vm5 = vcmp.gt.f32.partialorder %v7123_v38, %v7188_v14 }
 0x366   :  { %5981 = vmatmul.mubr.msk.f32.vlgmr.msra.gmra.mrb[48].mxu0 %vm10191_vm1, %v2293_v27  ;;  %vm10192_vm11 = vmmov %vm10191_vm1  ;;  %10194 = vst [vmem:[#allocation97_spill] sm:$0xff] %v7538_v18  ;;  %v4090_v9 = vmul.f32 %v4089_v5, %v7431_v26  ;;  %v3953_v15 = vmul.f32 %v3952_v19, %v7354_v45  ;;  %v4131_v27 = vmul.f32 0.002785687, %v7543_v47 }
 0x367   :  { %v4179_v56 = vadd.f32 -0.015866, %v4178_v6  ;;  %5955 = vmatprep.mubr.msk.f32.mxu1 %vm10192_vm11, %v2324_v29  ;;  %vm10193_vm10 = vmmov %vm10191_vm1  ;;  %6079 = vmatpush3.bf16.msra.mxu0 %v6546_v24  ;;  %v4041_v6 = vmul.f32 %v4040_v3, %v7480_v54 }
 0x368   :  { %5983 = vmatprep.mubr.msk.f32.mxu0 %vm10193_vm10, %v2324_v29  ;;  %v10195_v29 = vmin.f32 %v7420_v52, %v7386_v4  ;;  %v2325_v44 = vpop.trf.xlu1  ;;  %v2356_v16 = vpop.trf.xlu0  ;;  %v4091_v5 = vadd.f32 0.1064488, %v4090_v9  ;;  %vm10196_vm13 = vmmov %vm10191_vm1  ;;  %v3954_v24 = vadd.f32 0.19993454, %v3953_v15 }
 0x369   :  { %v4180_v42 = vmul.f32 %v4179_v56, %v7508_v48  ;;  %5956 = vmatmul.mubr.msk.f32.gmra.mrb[82].mxu1 %vm10191_vm1, %v2325_v44  ;;  %v4042_v19 = vadd.f32 -0.074975304, %v4041_v6  ;;  %vm10197_vm11 = vmmov %vm10191_vm1  ;;  %v4132_v56 = vadd.f32 -0.015866, %v4131_v27 }
 0x36a   :  { %v7552_v40 = vmul.f32 %v6147_v46, %v10195_v29  ;;  %5984 = vmatmul.mubr.msk.f32.gmra.mrb[50].mxu0 %vm10196_vm13, %v2325_v44  ;;  %5958 = vmatprep.mubr.msk.f32.mxu1 %vm10197_vm11, %v2356_v16  ;;  %vm10198_vm10 = vmmov %vm10191_vm1  ;;  %v6149_v46 = vpop.eup %6148  ;;  %v4092_v9 = vmul.f32 %v4091_v5, %v7431_v26  ;;  %v3955_v29 = vmul.f32 %v3954_v24, %v7354_v45 }
 0x36b   :  { %v4181_v18 = vadd.f32 0.04247222, %v4180_v42  ;;  %5986 = vmatprep.mubr.msk.f32.mxu0 %vm10198_vm10, %v2356_v16  ;;  %v4043_v60 = vmul.f32 %v4042_v19, %v7480_v54  ;;  %v4133_v37 = vmul.f32 %v4132_v56, %v7543_v47  ;;  %v10199_v16 = vmin.f32 %v7473_v55, %v7427_v33  ;;  %vm10200_vm13 = vmmov %vm10191_vm1 }
 0x36c   :  { %v7559_v3 = vmul.f32 %v7552_v40, %v7552_v40  ;;  %v2357_v42 = vpop.trf.xlu0  ;;  %v2388_v44 = vpop.trf.xlu1  ;;  %v4093_v8 = vadd.f32 -0.14207031, %v4092_v9  ;;  %v3956_v5 = vadd.f32 -0.33333147, %v3955_v29  ;;  %vm10201_vm11 = vmmov %vm10191_vm1 }
 0x36d   :  { %v4182_v15 = vmul.f32 %v4181_v18, %v7508_v48  ;;  %v7572_v35 = vmul.f32 %v6149_v46, %v10199_v16  ;;  %5959 = vmatmul.mubr.msk.f32.gmra.mrb[84].mxu1 %vm10191_vm1, %v2357_v42  ;;  %v4044_v27 = vadd.f32 0.1064488, %v4043_v60  ;;  %vm10202_vm10 = vmmov %vm10191_vm1  ;;  %v4134_v19 = vadd.f32 0.04247222, %v4133_v37 }
 0x36e   :  { %v4272_v6 = vmul.f32 0.002785687, %v7559_v3  ;;  %5987 = vmatmul.mubr.msk.f32.gmra.mrb[52].mxu0 %vm10200_vm13, %v2357_v42  ;;  %5961 = vmatprep.mubr.msk.f32.mxu1 %vm10201_vm11, %v2388_v44  ;;  %v4094_v18 = vmul.f32 %v4093_v8, %v7431_v26  ;;  %v3957_v46 = vmul.f32 %v3956_v5, %v7354_v45  ;;  %vm10203_vm13 = vmmov %vm10191_vm1 }
 0x36f   :  { %v4183_v24 = vadd.f32 -0.074975304, %v4182_v15  ;;  %5989 = vmatprep.mubr.msk.f32.mxu0 %vm10202_vm10, %v2388_v44  ;;  %v7581_v56 = vmul.f32 %v7572_v35, %v7572_v35  ;;  %v4045_v16 = vmul.f32 %v4044_v27, %v7480_v54  ;;  %v4135_v0 = vmul.f32 %v4134_v19, %v7543_v47  ;;  %vm10204_vm11 = vmmov %vm10191_vm1 }
 0x370   :  { %v4273_v9 = vadd.f32 -0.015866, %v4272_v6  ;;  %v2389_v60 = vpop.trf.xlu1  ;;  %v2420_v15 = vpop.trf.xlu0  ;;  %v4095_v42 = vadd.f32 0.19993454, %v4094_v18  ;;  %v3958_v37 = vmul.f32 %v3957_v46, %v7327_v58  ;;  %vm10205_vm10 = vmmov %vm10191_vm1 }
 0x371   :  { %v4184_v29 = vmul.f32 %v4183_v24, %v7508_v48  ;;  %v4225_v8 = vmul.f32 0.002785687, %v7581_v56  ;;  %5962 = vmatmul.mubr.msk.f32.gmra.mrb[86].mxu1 %vm10191_vm1, %v2389_v60  ;;  %v4046_v45 = vadd.f32 -0.14207031, %v4045_v16  ;;  %v4136_v27 = vadd.f32 -0.074975304, %v4135_v0 }
 0x372   :  { %v4274_v44 = vmul.f32 %v4273_v9, %v7559_v3  ;;  %5990 = vmatmul.mubr.msk.f32.gmra.mrb[54].mxu0 %vm10203_vm13, %v2389_v60  ;;  %5964 = vmatprep.mubr.msk.f32.mxu1 %vm10204_vm11, %v2420_v15  ;;  %v4096_v5 = vmul.f32 %v4095_v42, %v7431_v26  ;;  %v3959_v19 = vadd.f32 %v3958_v37, %v7327_v58  ;;  %vm10206_vm13 = vmmov %vm10191_vm1 }
 0x373   :  { %v4185_v6 = vadd.f32 0.1064488, %v4184_v29  ;;  %5992 = vmatprep.mubr.msk.f32.mxu0 %vm10205_vm10, %v2420_v15  ;;  %v4226_v18 = vadd.f32 -0.015866, %v4225_v8  ;;  %v4047_v9 = vmul.f32 %v4046_v45, %v7480_v54  ;;  %v4137_v16 = vmul.f32 %v4136_v27, %v7543_v47  ;;  %vm10207_vm11 = vmmov %vm10191_vm1 }
 0x374   :  { %v4275_v24 = vadd.f32 0.04247222, %v4274_v44  ;;  %v2421_v60 = vpop.trf.xlu0  ;;  %v2452_v61 = vpop.trf.xlu1  ;;  %v4097_v46 = vadd.f32 -0.33333147, %v4096_v5  ;;  %v3961_v0 = vsub.f32 1.5707964, %v3959_v19  ;;  %vm10208_vm10 = vmmov %vm10191_vm1 }
 0x375   :  { %v4186_v12 = vmul.f32 %v4185_v6, %v7508_v48  ;;  %v4227_v15 = vmul.f32 %v4226_v18, %v7581_v56  ;;  %5965 = vmatmul.mubr.msk.f32.gmra.mrb[88].mxu1 %vm10191_vm1, %v2421_v60  ;;  %v4048_v42 = vadd.f32 0.19993454, %v4047_v9  ;;  %v4138_v8 = vadd.f32 0.1064488, %v4137_v16 }
 0x376   :  { %v4276_v29 = vmul.f32 %v4275_v24, %v7559_v3  ;;  %5993 = vmatmul.mubr.msk.f32.gmra.mrb[56].mxu0 %vm10206_vm13, %v2421_v60  ;;  %5967 = vmatprep.mubr.msk.f32.mxu1 %vm10207_vm11, %v2452_v61  ;;  %v4098_v44 = vmul.f32 %v4097_v46, %v7431_v26  ;;  %v3962_v6 = vsel %vm10209_vm5, %v3961_v0, %v3959_v19  ;;  %vm10210_vm13 = vmmov %vm10191_vm1  ;;  %vm9931_vm11 = vcmp.lt.f32.partialorder %v6959_v63, 0.0 }
 0x377   :  { %v4187_v58 = vadd.f32 -0.14207031, %v4186_v12  ;;  %5995 = vmatprep.mubr.msk.f32.mxu0 %vm10208_vm10, %v2452_v61  ;;  %v4228_v45 = vadd.f32 0.04247222, %v4227_v15  ;;  %v4049_v5 = vmul.f32 %v4048_v42, %v7480_v54  ;;  %v3964_v12 = vsub.f32 3.1415927, %v3962_v6  ;;  %vm10211_vm5 = vmmov %vm10191_vm1 }
 0x378   :  { %v4277_v37 = vadd.f32 -0.074975304, %v4276_v29  ;;  %v2453_v24 = vpop.trf.xlu1  ;;  %v2484_v18 = vpop.trf.xlu0  ;;  %v4099_v9 = vmul.f32 %v4098_v44, %v7407_v32  ;;  %v4139_v61 = vmul.f32 %v4138_v8, %v7543_v47  ;;  %vm10212_vm10 = vmmov %vm10191_vm1 }
 0x379   :  { %v4188_v27 = vmul.f32 %v4187_v58, %v7508_v48  ;;  %5968 = vmatmul.mubr.msk.f32.gmra.mrb[90].mxu1 %vm10191_vm1, %v2453_v24  ;;  %v4050_v19 = vadd.f32 -0.33333147, %v4049_v5  ;;  %v4229_v46 = vmul.f32 %v4228_v45, %v7581_v56  ;;  %v7622_v16 = vsel %vm9931_vm11, %v3964_v12, %v3962_v6 }
 0x37a   :  { %v4278_v26 = vmul.f32 %v4277_v37, %v7559_v3  ;;  %5996 = vmatmul.mubr.msk.f32.gmra.mrb[58].mxu0 %vm10210_vm13, %v2453_v24  ;;  %5970 = vmatprep.mubr.msk.f32.mxu1 %vm10211_vm5, %v2484_v18  ;;  %v4100_v29 = vadd.f32 %v4099_v9, %v7407_v32  ;;  %v4140_v15 = vadd.f32 -0.14207031, %v4139_v61  ;;  %vm10213_vm13 = vmmov %vm10191_vm1  ;;  %vm10216_vm11 = vcmp.gt.f32.partialorder %v7135_v7, %v7248_v30 }
 0x37b   :  { %v4189_v60 = vadd.f32 0.19993454, %v4188_v27  ;;  %5998 = vmatprep.mubr.msk.f32.mxu0 %vm10212_vm10, %v2484_v18  ;;  %v4051_v42 = vmul.f32 %v4050_v19, %v7480_v54  ;;  %v4230_v44 = vadd.f32 -0.074975304, %v4229_v46  ;;  %vm10214_vm5 = vmmov %vm10191_vm1 }
 0x37c   :  { %v4279_v0 = vadd.f32 0.1064488, %v4278_v26  ;;  %v2485_v8 = vpop.trf.xlu0  ;;  %v2516_v37 = vpop.trf.xlu1  ;;  %v4102_v45 = vsub.f32 1.5707964, %v4100_v29  ;;  %v4141_v5 = vmul.f32 %v4140_v15, %v7543_v47  ;;  %vm10215_vm10 = vmmov %vm10191_vm1 }
 0x37d   :  { %v4190_v58 = vmul.f32 %v4189_v60, %v7508_v48  ;;  %5971 = vmatmul.mubr.msk.f32.gmra.mrb[92].mxu1 %vm10191_vm1, %v2485_v8  ;;  %v4052_v32 = vmul.f32 %v4051_v42, %v7455_v23  ;;  %v4231_v24 = vmul.f32 %v4230_v44, %v7581_v56  ;;  %vm9934_vm1 = vcmp.lt.f32.partialorder %v6988_v36, 0.0 }
 0x37e   :  { %v4280_v27 = vmul.f32 %v4279_v0, %v7559_v3  ;;  %5999 = vmatmul.mubr.msk.f32.gmra.mrb[60].mxu0 %vm10213_vm13, %v2485_v8  ;;  %5973 = vmatprep.mubr.msk.f32.mxu1 %vm10214_vm5, %v2516_v37  ;;  %v4103_v54 = vsel %vm10216_vm11, %v4102_v45, %v4100_v29  ;;  %v4142_v18 = vadd.f32 0.19993454, %v4141_v5  ;;  %vm10217_vm13 = vmmov %vm10214_vm5 }
 0x37f   :  { %v4191_v6 = vadd.f32 -0.33333147, %v4190_v58  ;;  %6001 = vmatprep.mubr.msk.f32.mxu0 %vm10215_vm10, %v2516_v37  ;;  %v4105_v9 = vsub.f32 3.1415927, %v4103_v54  ;;  %v4053_v61 = vadd.f32 %v4052_v32, %v7455_v23  ;;  %v4232_v19 = vadd.f32 0.1064488, %v4231_v24  ;;  %vm10218_vm11 = vmmov %vm10214_vm5 }
 0x380   :  { %v4281_v12 = vadd.f32 -0.14207031, %v4280_v27  ;;  %v2517_v60 = vpop.trf.xlu1  ;;  %v4143_v46 = vmul.f32 %v4142_v18, %v7543_v47  ;;  %vm10219_vm10 = vcmp.gt.f32.partialorder %v7224_v49, %v7300_v57 }
 0x381   :  { %v4192_v26 = vmul.f32 %v4191_v6, %v7508_v48  ;;  %5974 = vmatmul.mubr.msk.f32.gmra.mrb[94].mxu1 %vm10217_vm13, %v2517_v60  ;;  %v7647_v29 = vsel %vm9934_vm1, %v4105_v9, %v4103_v54  ;;  %v4055_v0 = vsub.f32 1.5707964, %v4053_v61  ;;  %v4233_v48 = vmul.f32 %v4232_v19, %v7581_v56  ;;  %vm10220_vm13 = vmmov %vm10214_vm5 }
 0x382   :  { %v4282_v15 = vmul.f32 %v4281_v12, %v7559_v3  ;;  %6002 = vmatmul.mubr.msk.f32.gmra.mrb[62].mxu0 %vm10214_vm5, %v2517_v60  ;;  %v4144_v42 = vadd.f32 -0.33333147, %v4143_v46  ;;  %vm9932_vm5 = vcmp.lt.f32.partialorder %v6994_v50, 0.0  ;;  %vm9936_vm1 = vcmp.lt.f32.partialorder %v10170_v39, 0.0 }
 0x383   :  { %v4193_v23 = vmul.f32 %v4192_v26, %v7497_v2  ;;  %6008 = vmatprep.mubr.msk.f32.mxu0 %vm10218_vm11, %v7177_v13  ;;  %v4056_v44 = vsel %vm10219_vm10, %v4055_v0, %v4053_v61  ;;  %v4234_v37 = vadd.f32 -0.14207031, %v4233_v48  ;;  %vm10221_vm10 = vcmp.gt.f32.partialorder %v7287_v11, %v7346_v20 }
 0x384   :  { %v4283_v58 = vadd.f32 0.19993454, %v4282_v15  ;;  %v4058_v45 = vsub.f32 3.1415927, %v4056_v44  ;;  %v4145_v5 = vmul.f32 %v4144_v42, %v7543_v47  ;;  %v10232_v42 = vld [vmem:[#allocation71_spill] sm:$0xff] }
 0x385   :  { %v4194_v8 = vadd.f32 %v4193_v23, %v7497_v2  ;;  %v4235_v32 = vmul.f32 %v4234_v37, %v7581_v56  ;;  %v9938_v23 = vmov 0.0  }
 0x386   :  { %v4284_v27 = vmul.f32 %v4283_v58, %v7559_v3  ;;  %6009 = vmatmul.mubr.msk.f32.vlgmr.msra.gmra.mrb[48].mxu0 %vm10220_vm13, %v7208_v17  ;;  %v7667_v2 = vsel %vm9932_vm5, %v4058_v45, %v4056_v44  ;;  %v4146_v6 = vmul.f32 %v4145_v5, %v7530_v21  ;;  %vm10222_vm13 = vmmov %vm10218_vm11  ;;  %v10233_v58 = vld [vmem:[#allocation18_spill] sm:$0xff]  ;;  %v10237_v45 = vld [vmem:[#allocation89_spill] sm:$0xff] }
 0x387   :  { %v4196_v13 = vsub.f32 1.5707964, %v4194_v8  ;;  %6011 = vmatprep.mubr.msk.f32.mxu0 %vm10218_vm11, %v7210_v43  ;;  %v4236_v17 = vadd.f32 0.19993454, %v4235_v32  ;;  %vm9933_vm11 = vcmp.lt.f32.partialorder %v10156_v31, 0.0  ;;  %vm10223_vm5 = vmmov %vm10222_vm13  ;;  %v10241_v32 = vld [vmem:[#allocation34_spill] sm:$0xff] }
 0x388   :  { %v4285_v47 = vadd.f32 -0.33333147, %v4284_v27  ;;  %v4147_v18 = vadd.f32 %v4146_v6, %v7530_v21  ;;  %vm10231_vm0 = vmmov %vm10223_vm5  ;;  %v9940_v6 = vmov 0.7853982  }
 0x389   :  { %v4197_v24 = vsel %vm10221_vm10, %v4196_v13, %v4194_v8  ;;  %v4237_v43 = vmul.f32 %v4236_v17, %v7581_v56  ;;  %vm10224_vm10 = vcmp.gt.f32.partialorder %v7343_v22, %v7379_v25  ;;  %v10236_v8 = vld [vmem:[#allocation73_spill] sm:$0xff]  ;;  %v10240_v13 = vld [vmem:[#allocation35_spill] sm:$0xff] }
 0x38a   :  { %v4199_v54 = vsub.f32 3.1415927, %v4197_v24  ;;  %v4286_v12 = vmul.f32 %v4285_v47, %v7559_v3  ;;  %6012 = vmatmul.mubr.msk.f32.gmra.mrb[50].mxu0 %vm10222_vm13, %v7250_v10  ;;  %v4149_v61 = vsub.f32 1.5707964, %v4147_v18  ;;  %vm10225_vm13 = vmmov %vm10223_vm5 }
 0x38b   :  { %6014 = vmatprep.mubr.msk.f32.mxu0 %vm10223_vm5, %v7252_v41  ;;  %v4238_v21 = vadd.f32 -0.33333147, %v4237_v43 }
 0x38c   :  { %v7683_v9 = vsel %vm9933_vm11, %v4199_v54, %v4197_v24  ;;  %v4287_v26 = vmul.f32 %v4286_v12, %v7552_v40  ;;  %v4150_v3 = vsel %vm10224_vm10, %v4149_v61, %v4147_v18  ;;  %vm9935_vm11 = vcmp.lt.f32.partialorder %v10162_v34, 0.0  ;;  %v10243_v24 = vld [vmem:[#allocation91_spill] sm:$0xff]  ;;  %v10244_v54 = vld [vmem:[#allocation92_spill] sm:$0xff] }
 0x38d   :  { %v4152_v19 = vsub.f32 3.1415927, %v4150_v3  ;;  %v4239_v41 = vmul.f32 %v4238_v21, %v7581_v56  ;;  %vm10226_vm10 = vcmp.gt.f32.partialorder %v7386_v4, %v7420_v52  ;;  %v3652_v12 = vand.u32 2147483648, %v10233_v58  ;;  %v10247_v61 = vld [vmem:[#allocation40_spill] sm:$0xff]  ;;  %v10249_v21 = vld [vmem:[#allocation95_spill] sm:$0xff] }
 0x38e   :  { %v4288_v10 = vadd.f32 %v4287_v26, %v7552_v40  ;;  %6015 = vmatmul.mubr.msk.f32.gmra.mrb[52].mxu0 %vm10225_vm13, %v7282_v59  ;;  %vm10227_vm13 = vmmov %vm10223_vm5  ;;  %v10248_v26 = vld [vmem:[#allocation41_spill] sm:$0xff] }
 0x38f   :  { %6017 = vmatprep.mubr.msk.f32.mxu0 %vm10223_vm5, %v7284_v62  ;;  %v7698_v46 = vsel %vm9935_vm11, %v4152_v19, %v4150_v3  ;;  %v4240_v15 = vmul.f32 %v4239_v41, %v7572_v35  ;;  %vm3637_vm11 = vcmp.lt.s32.totalorder %v6831_v1, 0  ;;  %v10252_v3 = vld [vmem:[#allocation51_spill] sm:$0xff]  ;;  %v10254_v19 = vld [vmem:[#allocation57_spill] sm:$0xff] }
 0x390   :  { %v4290_v60 = vsub.f32 1.5707964, %v4288_v10  ;;  %v3638_v48 = vsel %vm3637_vm11, 3.1415927, %v9938_v23  ;;  %vm3648_vm11 = vcmp.eq.s32.totalorder %v10241_v32, inf  ;;  %v10261_v32 = vld [vmem:[#allocation22_spill] sm:$0xff] }
 0x391   :  { %v4241_v56 = vadd.f32 %v4240_v15, %v7572_v35  ;;  %v10230_v35 = vld [vmem:[#allocation66_spill] sm:$0xff] }
 0x392   :  { %v4291_v40 = vsel %vm10226_vm10, %v4290_v60, %v4288_v10  ;;  %6018 = vmatmul.mubr.msk.f32.gmra.mrb[54].mxu0 %vm10227_vm13, %v7338_v28  ;;  %vm10228_vm10 = vmmov %vm10223_vm5  ;;  %vm10229_vm13 = vcmp.gt.f32.partialorder %v7427_v33, %v7473_v55  ;;  %v10253_v10 = vld [vmem:[#allocation52_spill] sm:$0xff] }
 0x393   :  { %v4293_v59 = vsub.f32 3.1415927, %v4291_v40  ;;  %6020 = vmatprep.mubr.msk.f32.mxu0 %vm10223_vm5, %v7340_v51  ;;  %v4243_v0 = vsub.f32 1.5707964, %v4241_v56  ;;  %vm9937_vm5 = vcmp.lt.f32.partialorder %v10232_v42, 0.0 }
 0x395   :  { %v7712_v62 = vsel %vm9936_vm1, %v4293_v59, %v4291_v40  ;;  %v4244_v28 = vsel %vm10229_vm13, %v4243_v0, %v4241_v56  ;;  %vm3639_vm1 = vcmp.eq.f32.partialorder %v10233_v58, 0.0  ;;  %vm10238_vm13 = vmmov %vm10231_vm0 }
 0x396   :  { %6021 = vmatmul.mubr.msk.f32.gmra.mrb[56].mxu0 %vm10228_vm10, %v7381_v53  ;;  %v4246_v51 = vsub.f32 3.1415927, %v4244_v28  ;;  %v10234_v53 = vld [vmem:[#allocation70_spill] sm:$0xff]  ;;  %vm10235_vm10 = vmmov %vm10231_vm0  ;;  %v3640_v37 = vsel %vm3639_vm1, %v3638_v48, %v10236_v8  ;;  %v10256_v48 = vld [vmem:[#allocation75_spill] sm:$0xff] }
 0x397   :  { %6023 = vmatprep.mubr.msk.f32.mxu0 %vm10231_vm0, %v10230_v35  ;;  %v3644_v27 = vsel %vm6857_vm4, nan, %v3640_v37  ;;  %vm3647_vm0 = vcmp.eq.s32.totalorder %v10240_v13, inf  ;;  %vm10245_vm1 = vmmov %vm10235_vm10  ;;  %vm3684_vm4 = vcmp.lt.s32.totalorder %v10247_v61, 0  ;;  %v10255_v35 = vld [vmem:[#allocation21_spill] sm:$0xff]  ;;  %v10258_v8 = vld [vmem:[#allocation42_spill] sm:$0xff] }
 0x398   :  { %v7727_v44 = vsel %vm9937_vm5, %v4246_v51, %v4244_v28  ;;  %vm10242_vm5 = vcmp.lt.f32.partialorder %v6831_v1, 0.0  ;;  %vm3649_vm6 = vmand %vm3647_vm0, %vm3648_vm11  ;;  %v10251_v1 = vld [vmem:[#allocation45_spill] sm:$0xff]  ;;  %vm3919_vm0 = vcmp.lt.s32.totalorder %v10252_v3, 0  ;;  %vm4013_vm11 = vcmp.lt.s32.totalorder %v10254_v19, 0 }
 0x399   :  { %v3646_v47 = vsel %vm10242_vm5, 2.3561945, %v9940_v6  ;;  %vm10250_vm3 = vmmov %vm10245_vm1  ;;  %vm3778_vm5 = vcmp.lt.s32.totalorder %v10251_v1, 0  ;;  %v3685_v41 = vsel %vm3684_vm4, 3.1415927, %v9938_v23  ;;  %vm3686_vm4 = vcmp.eq.f32.partialorder %v10255_v35, 0.0 }
 0x39a   :  { %6024 = vmatmul.mubr.msk.f32.gmra.mrb[58].mxu0 %vm10235_vm10, %v10234_v53  ;;  %v3650_v17 = vsel %vm3649_vm6, %v3646_v47, %v3644_v27  ;;  %vm3872_vm6 = vcmp.lt.s32.totalorder %v10253_v10, 0  ;;  %v3779_v15 = vsel %vm3778_vm5, 3.1415927, %v9938_v23  ;;  %v3920_v40 = vsel %vm3919_vm0, 3.1415927, %v9938_v23  ;;  %v10257_v53 = vld [vmem:[#allocation44_spill] sm:$0xff] }
 0x39b   :  { %6026 = vmatprep.mubr.msk.f32.mxu0 %vm10238_vm13, %v10237_v45  ;;  %v3651_v18 = vand.u32 2147483647, %v3650_v17  ;;  %vm3825_vm13 = vcmp.lt.s32.totalorder %v10248_v26, 0  ;;  %v3873_v59 = vsel %vm3872_vm6, 3.1415927, %v9938_v23  ;;  %v3687_v58 = vsel %vm3686_vm4, %v3685_v41, %v10256_v48  ;;  %v10262_v47 = vld [vmem:[#allocation50_spill] sm:$0xff] }
 0x39c   :  { %v3826_v60 = vsel %vm3825_vm13, 3.1415927, %v9938_v23  ;;  %v7765_v56 = vsel %vm4013_vm11, 3.1415927, %v9938_v23  ;;  %vm3694_vm13 = vcmp.eq.s32.totalorder %v10257_v53, inf  ;;  %vm3695_vm5 = vcmp.eq.s32.totalorder %v10258_v8, inf }
 0x39d   :  { %v7746_v43 = vor.u32 %v3652_v12, %v3651_v18  ;;  %v7782_v37 = vsel %vm4201_vm14, 3.1415927, %v9938_v23  ;;  %v3691_v5 = vsel %vm6898_vm8, nan, %v3687_v58  ;;  %vm10260_vm0 = vcmp.lt.f32.partialorder %v10247_v61, 0.0  ;;  %vm3696_vm6 = vmand %vm3694_vm13, %vm3695_vm5  ;;  %v10264_v12 = vld [vmem:[#allocation46_spill] sm:$0xff]  ;;  %v10267_v48 = vld [vmem:[#allocation23_spill] sm:$0xff] }
 0x39e   :  { %6027 = vmatmul.mubr.msk.f32.gmra.mrb[60].mxu0 %vm10235_vm10, %v10243_v24  ;;  %vm3966_vm10 = vcmp.lt.s32.totalorder %v6959_v63, 0  ;;  %v3693_v27 = vsel %vm10260_vm0, 2.3561945, %v9940_v6  ;;  %vm4154_vm11 = vcmp.lt.s32.totalorder %v10162_v34, 0  ;;  %v3699_v17 = vand.u32 2147483648, %v10255_v35 }
 0x39f   :  { %6029 = vmatprep.mubr.msk.f32.mxu0 %vm10245_vm1, %v10244_v54  ;;  %10246 = vst [vmem:[#allocation66_spill] sm:$0xff] %v7746_v43  ;;  %vm4107_vm1 = vcmp.lt.s32.totalorder %v6988_v36, 0  ;;  %v7769_v0 = vsel %vm3966_vm10, 3.1415927, %v9938_v23  ;;  %v3697_v13 = vsel %vm3696_vm6, %v3693_v27, %v3691_v5  ;;  %vm3827_vm10 = vcmp.eq.f32.partialorder %v10261_v32, 0.0  ;;  %v10263_v54 = vld [vmem:[#allocation77_spill] sm:$0xff] }
 0x3a0   :  { %v7772_v28 = vsel %vm4107_vm1, 3.1415927, %v9938_v23  ;;  %vm3835_vm1 = vcmp.eq.s32.totalorder %v10262_v47, inf  ;;  %v3698_v24 = vand.u32 2147483647, %v3697_v13  ;;  %v3828_v18 = vsel %vm3827_vm10, %v3826_v60, %v10263_v54  ;;  %v10269_v60 = vld [vmem:[#allocation78_spill] sm:$0xff] }
 0x3a1   :  { %vm3836_vm14 = vcmp.eq.s32.totalorder %v10264_v12, inf  ;;  %vm4295_vm8 = vcmp.lt.s32.totalorder %v10170_v39, 0  ;;  %v3832_v61 = vsel %vm6928_vm12, nan, %v3828_v18  ;;  %vm3780_vm13 = vcmp.eq.f32.partialorder %v10267_v48, 0.0  ;;  %v10271_v13 = vld [vmem:[#allocation54_spill] sm:$0xff]  ;;  %v10276_v54 = vld [vmem:[#allocation81_spill] sm:$0xff] }
 0x3a2   :  { %6030 = vmatmul.mubr.msk.f32.gmra.mrb[62].mxu0 %vm10250_vm3, %v10249_v21  ;;  %vm4060_vm3 = vcmp.lt.s32.totalorder %v6994_v50, 0  ;;  %vm3837_vm4 = vmand %vm3835_vm1, %vm3836_vm14  ;;  %vm4248_vm5 = vcmp.lt.s32.totalorder %v10232_v42, 0  ;;  %v7803_v58 = vor.u32 %v3699_v17, %v3698_v24  ;;  %v3781_v53 = vsel %vm3780_vm13, %v3779_v15, %v10269_v60  ;;  %v10272_v24 = vld [vmem:[#allocation48_spill] sm:$0xff]  ;;  %v10277_v12 = vld [vmem:[#allocation59_spill] sm:$0xff] }
 0x3a3   :  { %v7776_v51 = vsel %vm4060_vm3, 3.1415927, %v9938_v23  ;;  %vm10266_vm3 = vcmp.lt.f32.partialorder %v10248_v26, 0.0  ;;  %v3840_v45 = vand.u32 2147483648, %v10261_v32  ;;  %v3785_v27 = vsel %vm6947_vm15, nan, %v3781_v53  ;;  %v10273_v17 = vld [vmem:[#allocation24_spill] sm:$0xff] }
 0x3a4   :  { %v3834_v41 = vsel %vm10266_vm3, 2.3561945, %v9940_v6  ;;  %10268 = vst [vmem:[#allocation71_spill] sm:$0xff] %v7803_v58  ;;  %vm3788_vm12 = vcmp.eq.s32.totalorder %v10271_v13, inf  ;;  %v7813_v26 = vsel %vm4154_vm11, 3.1415927, %v9938_v23 }
 0x3a5   :  { %v3838_v35 = vsel %vm3837_vm4, %v3834_v41, %v3832_v61  ;;  %v7816_v47 = vsel %vm4295_vm8, 3.1415927, %v9938_v23  ;;  %vm3789_vm0 = vcmp.eq.s32.totalorder %v10272_v24, inf  ;;  %vm3921_vm6 = vcmp.eq.f32.partialorder %v10273_v17, 0.0  ;;  %v10279_v60 = vld [vmem:[#allocation58_spill] sm:$0xff]  ;;  %v10282_v13 = vld [vmem:[#allocation84_spill] sm:$0xff] }
 0x3a6   :  { %v3839_v8 = vand.u32 2147483647, %v3838_v35  ;;  %vm10275_vm10 = vcmp.lt.f32.partialorder %v10251_v1, 0.0  ;;  %vm3790_vm15 = vmand %vm3788_vm12, %vm3789_vm0  ;;  %v3922_v18 = vsel %vm3921_vm6, %v3920_v40, %v10276_v54  ;;  %vm3929_vm1 = vcmp.eq.s32.totalorder %v10277_v12, inf  ;;  %v10283_v24 = vld [vmem:[#allocation63_spill] sm:$0xff]  ;;  %v10286_v12 = vld [vmem:[#allocation62_spill] sm:$0xff] }
 0x3a7   :  { %v3787_v32 = vsel %vm10275_vm10, 2.3561945, %v9940_v6  ;;  %v7830_v21 = vsel %vm4248_vm5, 3.1415927, %v9938_v23  ;;  %v3926_v35 = vsel %vm6984_vm9, nan, %v3922_v18  ;;  %vm3930_vm11 = vcmp.eq.s32.totalorder %v10279_v60, inf }
 0x3a8   :  { %v7820_v15 = vor.u32 %v3840_v45, %v3839_v8  ;;  %v3791_v61 = vsel %vm3790_vm15, %v3787_v32, %v3785_v27  ;;  %v3793_v1 = vand.u32 2147483648, %v10267_v48  ;;  %vm10280_vm14 = vcmp.lt.f32.partialorder %v10252_v3, 0.0  ;;  %vm3931_vm8 = vmand %vm3929_vm1, %vm3930_vm11  ;;  %v10281_v8 = vld [vmem:[#allocation25_spill] sm:$0xff]  ;;  %v10297_v18 = vld [vmem:[#allocation79_spill] sm:$0xff] }
 0x3a9   :  { %v3792_v53 = vand.u32 2147483647, %v3791_v61  ;;  %v3928_v40 = vsel %vm10280_vm14, 2.3561945, %v9940_v6  ;;  %vm3874_vm3 = vcmp.eq.f32.partialorder %v10281_v8, 0.0  ;;  %v3934_v5 = vand.u32 2147483648, %v10273_v17 }
 0x3aa   :  { %10274 = vst [vmem:[#allocation18_spill] sm:$0xff] %v7820_v15  ;;  %v3932_v45 = vsel %vm3931_vm8, %v3928_v40, %v3926_v35  ;;  %v3875_v27 = vsel %vm3874_vm3, %v3873_v59, %v10282_v13  ;;  %vm3882_vm4 = vcmp.eq.s32.totalorder %v10283_v24, inf  ;;  %vm3883_vm9 = vcmp.eq.s32.totalorder %v10286_v12, inf  ;;  %v10288_v17 = vld [vmem:[#allocation26_spill] sm:$0xff]  ;;  %v10289_v59 = vld [vmem:[#allocation69_spill] sm:$0xff]  ;;  %v10295_v13 = vld [vmem:[#allocation27_spill] sm:$0xff] }
 0x3ab   :  { %v7843_v32 = vor.u32 %v3793_v1, %v3792_v53  ;;  %v3933_v54 = vand.u32 2147483647, %v3932_v45  ;;  %v3879_v48 = vsel %vm7030_vm2, nan, %v3875_v27  ;;  %vm10287_vm13 = vcmp.lt.f32.partialorder %v10253_v10, 0.0  ;;  %vm3884_vm5 = vmand %vm3882_vm4, %vm3883_vm9  ;;  %v10291_v60 = vld [vmem:[#allocation97_spill] sm:$0xff]  ;;  %v10292_v1 = vld [vmem:[#allocation67_spill] sm:$0xff] }
 0x3ac   :  { %v3881_v3 = vsel %vm10287_vm13, 2.3561945, %v9940_v6  ;;  %v3887_v61 = vand.u32 2147483648, %v10281_v8  ;;  %vm4015_vm12 = vcmp.eq.f32.partialorder %v10288_v17, 0.0  ;;  %vm4023_vm0 = vcmp.eq.s32.totalorder %v10289_v59, inf  ;;  %v10305_v59 = vld [vmem:[#allocation29_spill] sm:$0xff] }
 0x3ad   :  { %10284 = vst [vmem:[#allocation70_spill] sm:$0xff] %v7843_v32  ;;  %v7854_v41 = vor.u32 %v3934_v5, %v3933_v54  ;;  %v3885_v35 = vsel %vm3884_vm5, %v3881_v3, %v3879_v48  ;;  %v4016_v53 = vsel %vm4015_vm12, %v7765_v56, %v10291_v60  ;;  %vm4024_vm2 = vcmp.eq.s32.totalorder %v10292_v1, inf  ;;  %v10300_v3 = vld [vmem:[#allocation28_spill] sm:$0xff]  ;;  %v10312_v45 = vld [vmem:[#allocation86_spill] sm:$0xff] }
 0x3ae   :  { %v3886_v40 = vand.u32 2147483647, %v3885_v35  ;;  %v4020_v10 = vsel %vm7171_vm7, nan, %v4016_v53  ;;  %vm10294_vm6 = vcmp.lt.f32.partialorder %v10254_v19, 0.0  ;;  %vm4025_vm10 = vmand %vm4023_vm0, %vm4024_vm2  ;;  %vm3968_vm15 = vcmp.eq.f32.partialorder %v10295_v13, 0.0 }
 0x3af   :  { %10290 = vst [vmem:[#allocation73_spill] sm:$0xff] %v7854_v41  ;;  %v4022_v8 = vsel %vm10294_vm6, 2.3561945, %v9940_v6  ;;  %v4028_v5 = vand.u32 2147483648, %v10288_v17  ;;  %v3969_v24 = vsel %vm3968_vm15, %v7769_v0, %v7622_v16  ;;  %vm3976_vm1 = vcmp.eq.s32.totalorder %v7188_v14, inf }
 0x3b0   :  { %v4026_v27 = vsel %vm4025_vm10, %v4022_v8, %v4020_v10  ;;  %v7869_v56 = vor.u32 %v3887_v61, %v3886_v40  ;;  %vm10298_vm7 = vnez %v10297_v18  ;;  %vm3977_vm11 = vcmp.eq.s32.totalorder %v7123_v38, inf  ;;  %v10302_v61 = vld [vmem:[#allocation82_spill] sm:$0xff]  ;;  %v10315_v8 = vld [vmem:[#allocation31_spill] sm:$0xff]  ;;  %v10322_v18 = vld [vmem:[#allocation96_spill] sm:$0xff] }
 0x3b1   :  { %v4027_v54 = vand.u32 2147483647, %v4026_v27  ;;  %v3973_v48 = vsel %vm10298_vm7, nan, %v3969_v24  ;;  %vm10299_vm14 = vcmp.lt.f32.partialorder %v6959_v63, 0.0  ;;  %vm3978_vm8 = vmand %vm3976_vm1, %vm3977_vm11  ;;  %v3981_v12 = vand.u32 2147483648, %v10295_v13  ;;  %v10310_v40 = vld [vmem:[#allocation30_spill] sm:$0xff] }
 0x3b2   :  { %10296 = vst [vmem:[#allocation89_spill] sm:$0xff] %v7869_v56  ;;  %v3975_v19 = vsel %vm10299_vm14, 2.3561945, %v9940_v6  ;;  %vm4109_vm3 = vcmp.eq.f32.partialorder %v10300_v3, 0.0  ;;  %vm4117_vm4 = vcmp.eq.s32.totalorder %v7248_v30, inf  ;;  %vm4118_vm9 = vcmp.eq.s32.totalorder %v7135_v7, inf }
 0x3b3   :  { %v7880_v14 = vor.u32 %v4028_v5, %v4027_v54  ;;  %v3979_v16 = vsel %vm3978_vm8, %v3975_v19, %v3973_v48  ;;  %v4110_v0 = vsel %vm4109_vm3, %v7772_v28, %v7647_v29  ;;  %vm10303_vm13 = vnez %v10302_v61  ;;  %vm4119_vm12 = vmand %vm4117_vm4, %vm4118_vm9  ;;  %v10307_v28 = vld [vmem:[#allocation85_spill] sm:$0xff]  ;;  %v10325_v19 = vld [vmem:[#allocation32_spill] sm:$0xff] }
 0x3b4   :  { %v3980_v38 = vand.u32 2147483647, %v3979_v16  ;;  %v4114_v63 = vsel %vm10303_vm13, nan, %v4110_v0  ;;  %vm10304_vm5 = vcmp.lt.f32.partialorder %v6988_v36, 0.0  ;;  %vm4062_vm0 = vcmp.eq.f32.partialorder %v10305_v59, 0.0  ;;  %v10320_v54 = vld [vmem:[#allocation33_spill] sm:$0xff] }
 0x3b5   :  { %10301 = vst [vmem:[#allocation38_spill] sm:$0xff] %v7880_v14  ;;  %v4116_v17 = vsel %vm10304_vm5, 2.3561945, %v9940_v6  ;;  %v4122_v35 = vand.u32 2147483648, %v10300_v3  ;;  %v4063_v60 = vsel %vm4062_vm0, %v7776_v51, %v7667_v2  ;;  %vm4070_vm2 = vcmp.eq.s32.totalorder %v7300_v57, inf  ;;  %v10359_v56 = vld [vmem:[#allocation90_spill] sm:$0xff] }
 0x3b6   :  { %v4120_v30 = vsel %vm4119_vm12, %v4116_v17, %v4114_v63  ;;  %v7895_v7 = vor.u32 %v3981_v12, %v3980_v38  ;;  %vm10308_vm6 = vnez %v10307_v28  ;;  %vm4071_vm10 = vcmp.eq.s32.totalorder %v7224_v49, inf  ;;  %v10333_v17 = vld [vmem:[#allocation39_spill] sm:$0xff] }
 0x3b7   :  { %v4121_v29 = vand.u32 2147483647, %v4120_v30  ;;  %v4067_v53 = vsel %vm10308_vm6, nan, %v4063_v60  ;;  %vm10309_vm15 = vcmp.lt.f32.partialorder %v6994_v50, 0.0  ;;  %vm4072_vm1 = vmand %vm4070_vm2, %vm4071_vm10  ;;  %v4075_v1 = vand.u32 2147483648, %v10305_v59 }
 0x3b8   :  { %10306 = vst [vmem:[#allocation35_spill] sm:$0xff] %v7895_v7  ;;  %v4069_v36 = vsel %vm10309_vm15, 2.3561945, %v9940_v6  ;;  %vm4203_vm7 = vcmp.eq.f32.partialorder %v10310_v40, 0.0  ;;  %vm4211_vm11 = vcmp.eq.s32.totalorder %v7346_v20, inf  ;;  %vm4212_vm14 = vcmp.eq.s32.totalorder %v7287_v11, inf }
 0x3b9   :  { %v7906_v57 = vor.u32 %v4122_v35, %v4121_v29  ;;  %v4073_v2 = vsel %vm4072_vm1, %v4069_v36, %v4067_v53  ;;  %v4204_v51 = vsel %vm4203_vm7, %v7782_v37, %v7683_v9  ;;  %vm10313_vm8 = vnez %v10312_v45  ;;  %vm4213_vm4 = vmand %vm4211_vm11, %vm4212_vm14  ;;  %v10317_v37 = vld [vmem:[#allocation88_spill] sm:$0xff] }
 0x3ba   :  { %v4074_v49 = vand.u32 2147483647, %v4073_v2  ;;  %v4208_v50 = vsel %vm10313_vm8, nan, %v4204_v51  ;;  %vm10314_vm3 = vcmp.lt.f32.partialorder %v10156_v31, 0.0  ;;  %vm4156_vm9 = vcmp.eq.f32.partialorder %v10315_v8, 0.0 }
 0x3bb   :  { %10311 = vst [vmem:[#allocation34_spill] sm:$0xff] %v7906_v57  ;;  %v4210_v10 = vsel %vm10314_vm3, 2.3561945, %v9940_v6  ;;  %v4216_v13 = vand.u32 2147483648, %v10310_v40  ;;  %v4157_v27 = vsel %vm4156_vm9, %v7813_v26, %v7698_v46  ;;  %vm4164_vm13 = vcmp.eq.s32.totalorder %v7379_v25, inf  ;;  %v10357_v57 = vld [vmem:[#allocation94_spill] sm:$0xff] }
 0x3bc   :  { %v4214_v20 = vsel %vm4213_vm4, %v4210_v10, %v4208_v50  ;;  %v7921_v11 = vor.u32 %v4075_v1, %v4074_v49  ;;  %vm10318_vm5 = vnez %v10317_v37  ;;  %vm4165_vm12 = vcmp.eq.s32.totalorder %v7343_v22, inf }
 0x3bd   :  { %v4215_v9 = vand.u32 2147483647, %v4214_v20  ;;  %v4161_v5 = vsel %vm10318_vm5, nan, %v4157_v27  ;;  %vm10319_vm0 = vcmp.lt.f32.partialorder %v10162_v34, 0.0  ;;  %vm4166_vm2 = vmand %vm4164_vm13, %vm4165_vm12  ;;  %v4169_v24 = vand.u32 2147483648, %v10315_v8 }
 0x3be   :  { %10316 = vst [vmem:[#allocation91_spill] sm:$0xff] %v7921_v11  ;;  %v4163_v31 = vsel %vm10319_vm0, 2.3561945, %v9940_v6  ;;  %vm4250_vm6 = vcmp.eq.f32.partialorder %v10320_v54, 0.0  ;;  %vm4258_vm10 = vcmp.eq.s32.totalorder %v7473_v55, inf  ;;  %vm4259_vm15 = vcmp.eq.s32.totalorder %v7427_v33, inf }
 0x3bf   :  { %v7932_v25 = vor.u32 %v4216_v13, %v4215_v9  ;;  %v4167_v46 = vsel %vm4166_vm2, %v4163_v31, %v4161_v5  ;;  %v4251_v26 = vsel %vm4250_vm6, %v7830_v21, %v7727_v44  ;;  %vm10323_vm1 = vnez %v10322_v18  ;;  %vm4260_vm11 = vmand %vm4258_vm10, %vm4259_vm15  ;;  %v10327_v21 = vld [vmem:[#allocation93_spill] sm:$0xff]  ;;  %v10356_v11 = vld [vmem:[#allocation87_spill] sm:$0xff] }
 0x3c0   :  { %v4168_v22 = vand.u32 2147483647, %v4167_v46  ;;  %v4255_v34 = vsel %vm10323_vm1, nan, %v4251_v26  ;;  %vm10324_vm7 = vcmp.lt.f32.partialorder %v10232_v42, 0.0  ;;  %vm4297_vm14 = vcmp.eq.f32.partialorder %v10325_v19, 0.0 }
 0x3c1   :  { %10321 = vst [vmem:[#allocation92_spill] sm:$0xff] %v7932_v25  ;;  %v4257_v48 = vsel %vm10324_vm7, 2.3561945, %v9940_v6  ;;  %v4263_v12 = vand.u32 2147483648, %v10320_v54  ;;  %v4298_v3 = vsel %vm4297_vm14, %v7816_v47, %v7712_v62  ;;  %vm4305_vm8 = vcmp.eq.s32.totalorder %v7420_v52, inf  ;;  %v10332_v47 = vld [vmem:[#allocation36_spill] sm:$0xff] }
 0x3c2   :  { %v4261_v55 = vsel %vm4260_vm11, %v4257_v48, %v4255_v34  ;;  %v7947_v33 = vor.u32 %v4169_v24, %v4168_v22  ;;  %vm10328_vm3 = vnez %v10327_v21  ;;  %vm4306_vm4 = vcmp.eq.s32.totalorder %v7386_v4, inf  ;;  %v10334_v4 = vld [vmem:[#allocation19_spill] sm:$0xff] }
 0x3c3   :  { %v4262_v44 = vand.u32 2147483647, %v4261_v55  ;;  %v4302_v16 = vsel %vm10328_vm3, nan, %v4298_v3  ;;  %vm10329_vm9 = vcmp.lt.f32.partialorder %v10170_v39, 0.0  ;;  %vm4307_vm13 = vmand %vm4305_vm8, %vm4306_vm4  ;;  %v4310_v62 = vand.u32 2147483648, %v10325_v19  ;;  %v10335_v39 = vld [vmem:[#allocation20_spill] sm:$0xff] }
 0x3c4   :  { %10326 = vst [vmem:[#allocation40_spill] sm:$0xff] %v7947_v33  ;;  %v4304_v42 = vsel %vm10329_vm9, 2.3561945, %v9940_v6  ;;  %v7961_v63 = vand.u32 2147483647, %v10332_v47  ;;  %vm3590_vm12 = vcmp.lt.s32.totalorder %v10332_v47, 0 }
 0x3c5   :  { %v7955_v0 = vor.u32 %v4263_v12, %v4262_v44  ;;  %v4308_v38 = vsel %vm4307_vm13, %v4304_v42, %v4302_v16  ;;  %v7964_v59 = vand.u32 2147483647, %v10333_v17  ;;  %v7967_v30 = vand.u32 2147483647, %v10334_v4 }
 0x3c6   :  { %v4309_v61 = vand.u32 2147483647, %v4308_v38  ;;  %v7970_v35 = vand.u32 2147483647, %v10335_v39  ;;  %vm3731_vm2 = vcmp.lt.s32.totalorder %v10333_v17, 0  ;;  %vm3587_vm6 = vcmp.lt.f32.partialorder %v10332_v47, 0.0 }
 0x3c7   :  { %10330 = vst [vmem:[#allocation41_spill] sm:$0xff] %v7955_v0  ;;  %v3563_v60 = vmax.f32 %v7961_v63, %v7967_v30  ;;  %v3562_v36 = vmin.f32 %v7961_v63, %v7967_v30  ;;  %vm3584_vm5 = vcmp.gt.f32.partialorder %v7967_v30, %v7961_v63  ;;  %vm9942_vm10 = vcmp.lt.f32.partialorder %v10333_v17, 0.0  ;;  %v10348_v0 = vld [vmem:[#allocation72_spill] sm:$0xff] }
 0x3c8   :  { %v7958_v52 = vor.u32 %v4310_v62, %v4309_v61  ;;  %v3704_v29 = vmax.f32 %v7964_v59, %v7970_v35  ;;  %v3703_v1 = vmin.f32 %v7964_v59, %v7970_v35  ;;  %vm3725_vm0 = vcmp.gt.f32.partialorder %v7970_v35, %v7964_v59 }
 0x3c9   :  { %6150 = vrcp.f32 %v3563_v60  ;;  %v3224_v60 = vmul.f32 %v10332_v47, %v10332_v47 }
 0x3ca   :  { %10331 = vst [vmem:[#allocation95_spill] sm:$0xff] %v7958_v52  ;;  %6152 = vrcp.f32 %v3704_v29 }
 0x3d3   :  { %v6151_v28 = vpop.eup %6150 }
 0x3d4   :  { %v6153_v53 = vpop.eup %6152  ;;  %v3565_v40 = vmul.f32 %v6151_v28, %v3562_v36 }
 0x3d5   :  { %v3706_v2 = vmul.f32 %v6153_v53, %v3703_v1  ;;  %v3227_v53 = vmul.f32 %v10333_v17, %v10333_v17 }
 0x3d6   :  { %v3566_v51 = vmul.f32 %v3565_v40, %v3565_v40 }
 0x3d7   :  { %v3707_v49 = vmul.f32 %v3706_v2, %v3706_v2 }
 0x3d8   :  { %v3567_v45 = vmul.f32 0.002785687, %v3566_v51 }
 0x3d9   :  { %v3708_v50 = vmul.f32 0.002785687, %v3707_v49 }
 0x3da   :  { %v3568_v10 = vadd.f32 -0.015866, %v3567_v45  ;;  %v3240_v45 = vmul.f32 %v10334_v4, %v10334_v4 }
 0x3db   :  { %v3709_v8 = vadd.f32 -0.015866, %v3708_v50  ;;  %v3243_v50 = vmul.f32 %v10335_v39, %v10335_v39 }
 0x3dc   :  { %v3569_v20 = vmul.f32 %v3568_v10, %v3566_v51  ;;  %v8000_v10 = vadd.f32 %v3240_v45, %v3224_v60 }
 0x3dd   :  { %v3710_v13 = vmul.f32 %v3709_v8, %v3707_v49 }
 0x3de   :  { %v3570_v27 = vadd.f32 0.04247222, %v3569_v20  ;;  %vm3274_vm1 = vcmp.eq.f32.partialorder %v8000_v10, inf  ;;  %vm3276_vm14 = vcmp.eq.f32.partialorder %v8000_v10, 0.0 }
 0x3df   :  { %v3711_v9 = vadd.f32 0.04247222, %v3710_v13  ;;  %v8004_v13 = vadd.f32 %v3243_v50, %v3227_v53  ;;  %v8041_v50 = vsel %vm3590_vm12, 3.1415927, %v9938_v23  ;;  %vm3594_vm12 = vcmp.ne.f32.partialorder %v10332_v47, %v10332_v47 }
 0x3e0   :  { %v3571_v37 = vmul.f32 %v3570_v27, %v3566_v51 }
 0x3e1   :  { %v3712_v5 = vmul.f32 %v3711_v9, %v3707_v49  ;;  %vm3295_vm7 = vcmp.eq.f32.partialorder %v8004_v13, inf  ;;  %vm3297_vm8 = vcmp.eq.f32.partialorder %v8004_v13, 0.0 }
 0x3e2   :  { %v3572_v31 = vadd.f32 -0.074975304, %v3571_v37  ;;  %v10336_v37 = vld [vmem:[#allocation37_spill] sm:$0xff] }
 0x3e3   :  { %v3713_v24 = vadd.f32 -0.074975304, %v3712_v5  ;;  %6154 = vrsqrt.f32 %v10336_v37  ;;  %vm3281_vm15 = vcmp.eq.f32.partialorder %v10336_v37, inf  ;;  %vm3283_vm11 = vcmp.eq.f32.partialorder %v10336_v37, 0.0 }
 0x3e4   :  { %v3573_v54 = vmul.f32 %v3572_v31, %v3566_v51  ;;  %6156 = vrsqrt.f32 %v8000_v10 }
 0x3e5   :  { %v3714_v46 = vmul.f32 %v3713_v24, %v3707_v49  ;;  %6158 = vrsqrt.f32 %v8004_v13 }
 0x3e6   :  { %v3574_v26 = vadd.f32 0.1064488, %v3573_v54 }
 0x3e7   :  { %v3715_v22 = vadd.f32 0.1064488, %v3714_v46 }
 0x3e8   :  { %v3575_v18 = vmul.f32 %v3574_v26, %v3566_v51 }
 0x3e9   :  { %v3716_v34 = vmul.f32 %v3715_v22, %v3707_v49 }
 0x3ea   :  { %v3576_v48 = vadd.f32 -0.14207031, %v3575_v18 }
 0x3eb   :  { %v3717_v19 = vadd.f32 -0.14207031, %v3716_v34 }
 0x3ec   :  { %v3577_v55 = vmul.f32 %v3576_v48, %v3566_v51 }
 0x3ed   :  { %v3718_v12 = vmul.f32 %v3717_v19, %v3707_v49  ;;  %v6155_v34 = vpop.eup %6154 }
 0x3ee   :  { %v3578_v3 = vadd.f32 0.19993454, %v3577_v55  ;;  %v6157_v55 = vpop.eup %6156  ;;  %v3280_v60 = vmul.f32 %v6155_v34, %v10336_v37 }
 0x3ef   :  { %v3719_v21 = vadd.f32 0.19993454, %v3718_v12  ;;  %v10337_v12 = vld [vmem:[#allocation43_spill] sm:$0xff]  ;;  %v3273_v53 = vmul.f32 %v6157_v55, %v8000_v10  ;;  %v3284_v55 = vand.u32 2147483648, %v10336_v37 }
 0x3f0   :  { %v3579_v42 = vmul.f32 %v3578_v3, %v3566_v51  ;;  %6160 = vrsqrt.f32 %v10337_v12  ;;  %v6159_v3 = vpop.eup %6158  ;;  %v3282_v34 = vsel %vm3281_vm15, %v10336_v37, %v3280_v60  ;;  %v3277_v60 = vand.u32 2147483648, %v8000_v10 }
 0x3f1   :  { %v3720_v61 = vmul.f32 %v3719_v21, %v3707_v49  ;;  %v8073_v52 = vsel %vm3283_vm11, %v3284_v55, %v3282_v34  ;;  %vm3288_vm3 = vcmp.eq.f32.partialorder %v10337_v12, inf  ;;  %vm3290_vm4 = vcmp.eq.f32.partialorder %v10337_v12, 0.0 }
 0x3f2   :  { %v3580_v29 = vadd.f32 -0.33333147, %v3579_v42  ;;  %10344 = vst [vmem:[#allocation52_spill] sm:$0xff] %v8073_v52  ;;  %vm3736_vm11 = vcmp.ne.f32.partialorder %v10335_v39, %v10335_v39 }
 0x3f3   :  { %v3721_v36 = vadd.f32 -0.33333147, %v3720_v61 }
 0x3f4   :  { %v3581_v8 = vmul.f32 %v3580_v29, %v3566_v51  ;;  %v10339_v29 = vld [vmem:[#allocation55_spill] sm:$0xff] }
 0x3f5   :  { %v3722_v27 = vmul.f32 %v3721_v36, %v3707_v49  ;;  %v3294_v36 = vmul.f32 %v6159_v3, %v8004_v13  ;;  %v3275_v3 = vsel %vm3274_vm1, %v8000_v10, %v3273_v53  ;;  %v10350_v10 = vld [vmem:[#allocation76_spill] sm:$0xff]  ;;  %vm3595_vm1 = vcmp.ne.f32.partialorder %v10334_v4, %v10334_v4 }
 0x3f6   :  { %v3582_v5 = vmul.f32 %v3581_v8, %v3565_v40  ;;  %v10340_v8 = vld [vmem:[#allocation60_spill] sm:$0xff] }
 0x3f7   :  { %v3723_v24 = vmul.f32 %v3722_v27, %v3706_v2  ;;  %vm3323_vm15 = vcmp.eq.f32.partialorder %v10340_v8, inf  ;;  %v3326_v25 = vand.u32 2147483648, %v10340_v8 }
 0x3f8   :  { %v3583_v51 = vadd.f32 %v3582_v5, %v3565_v40  ;;  %v10338_v40 = vld [vmem:[#allocation49_spill] sm:$0xff]  ;;  %v8046_v5 = vsel %vm3731_vm2, 3.1415927, %v9938_v23  ;;  %v3296_v23 = vsel %vm3295_vm7, %v8004_v13, %v3294_v36  ;;  %v8080_v36 = vsel %vm3276_vm14, %v3277_v60, %v3275_v3 }
 0x3f9   :  { %v3724_v26 = vadd.f32 %v3723_v24, %v3706_v2  ;;  %6162 = vrsqrt.f32 %v10338_v40  ;;  %10346 = vst [vmem:[#allocation21_spill] sm:$0xff] %v8080_v36  ;;  %vm3309_vm9 = vcmp.eq.f32.partialorder %v10338_v40, inf  ;;  %vm3311_vm13 = vcmp.eq.f32.partialorder %v10338_v40, 0.0 }
 0x3fa   :  { %v3585_v49 = vsub.f32 1.5707964, %v3583_v51  ;;  %6164 = vrsqrt.f32 %v10339_v29  ;;  %v6161_v6 = vpop.eup %6160  ;;  %vm3735_vm2 = vcmp.ne.f32.partialorder %v10333_v17, %v10333_v17  ;;  %vm3325_vm7 = vcmp.eq.f32.partialorder %v10340_v8, 0.0 }
 0x3fb   :  { %v3726_v48 = vsub.f32 1.5707964, %v3724_v26  ;;  %6166 = vrsqrt.f32 %v10340_v8 }
 0x3fc   :  { %v3586_v21 = vsel %vm3584_vm5, %v3585_v49, %v3583_v51  ;;  %v10341_v51 = vld [vmem:[#allocation64_spill] sm:$0xff]  ;;  %vm3302_vm5 = vcmp.eq.f32.partialorder %v10339_v29, inf }
 0x3fd   :  { %v3727_v42 = vsel %vm3725_vm0, %v3726_v48, %v3724_v26  ;;  %v3588_v45 = vsub.f32 3.1415927, %v3586_v21  ;;  %6168 = vrsqrt.f32 %v10341_v51  ;;  %vm3304_vm0 = vcmp.eq.f32.partialorder %v10339_v29, 0.0 }
 0x3fe   :  { %v3729_v27 = vsub.f32 3.1415927, %v3727_v42  ;;  %6170 = vrsqrt.f32 %v10348_v0  ;;  %vm3316_vm14 = vcmp.eq.f32.partialorder %v10341_v51, inf }
 0x3ff   :  { %6172 = vrsqrt.f32 %v10350_v10 }
 0x418   :  { %v7980_v44 = vpop.f32.mrb[32].mxu0 }
 0x419   :  { %v7982_v16 = vpop.f32.mrb[33].mxu0 }
 0x41c   :  { %v7984_v38 = vpop.f32.mrb[34].mxu0 }
 0x41d   :  { %v7986_v62 = vpop.f32.mrb[35].mxu0 }
 0x420   :  { %v7990_v28 = vpop.f32.mrb[36].mxu0 }
 0x421   :  { %v7994_v1 = vpop.f32.mrb[37].mxu0 }
 0x424   :  { %v8002_v20 = vpop.f32.mrb[38].mxu0 }
 0x425   :  { %v8006_v9 = vpop.f32.mrb[39].mxu0 }
 0x428   :  { %v8009_v31 = vpop.f32.mrb[40].mxu0 }
 0x429   :  { %v8012_v54 = vpop.f32.mrb[41].mxu0 }
 0x42c   :  { %v8015_v46 = vpop.f32.mrb[42].mxu0 }
 0x42d   :  { %v8017_v22 = vpop.f32.mrb[43].mxu0 }
 0x430   :  { %v8019_v18 = vpop.f32.mrb[44].mxu0 }
 0x431   :  { %v8021_v19 = vpop.f32.mrb[45].mxu0 }
 0x434   :  { %v8030_v2 = vpop.f32.mrb[46].mxu0 }
 0x435   :  { %v8033_v61 = vpop.f32.mrb[47].mxu0 }
 0x438   :  { %v5954_v24 = vpop.f32.mrb[80].mxu1 }
 0x439   :  { %v8051_v26 = vsub.f32 %v5954_v24, %v7980_v44  ;;  %v2839_v49 = vpop.f32.mrb[81].mxu1  ;;  %v8064_v44 = vsel %vm3587_vm6, %v3588_v45, %v3586_v21  ;;  %v3298_v24 = vand.u32 2147483648, %v8004_v13  ;;  %v6163_v21 = vpop.eup %6162 }
 0x43a   :  { %v8057_v48 = vsub.f32 %v2839_v49, %v7982_v16  ;;  %v8071_v16 = vsel %vm9942_vm10, %v3729_v27, %v3727_v42  ;;  %v6165_v13 = vpop.eup %6164  ;;  %v3291_v27 = vand.u32 2147483648, %v10337_v12  ;;  %v3308_v55 = vmul.f32 %v6163_v21, %v10338_v40 }
 0x43b   :  { %10342 = vst [vmem:[#allocation45_spill] sm:$0xff] %v8051_v26  ;;  %v8082_v45 = vsel %vm3297_vm8, %v3298_v24, %v3296_v23  ;;  %v10351_v23 = vld [vmem:[#allocation80_spill] sm:$0xff]  ;;  %v6167_v3 = vpop.eup %6166  ;;  %v3305_v24 = vand.u32 2147483648, %v10339_v29  ;;  %v3301_v33 = vmul.f32 %v6165_v13, %v10339_v29  ;;  %vm3318_vm8 = vcmp.eq.f32.partialorder %v10341_v51, 0.0 }
 0x43c   :  { %10343 = vst [vmem:[#allocation51_spill] sm:$0xff] %v8057_v48  ;;  %v5957_v49 = vpop.f32.mrb[82].mxu1  ;;  %10347 = vst [vmem:[#allocation75_spill] sm:$0xff] %v8082_v45  ;;  %6174 = vrsqrt.f32 %v10351_v23  ;;  %v6169_v21 = vpop.eup %6168  ;;  %v3310_v13 = vsel %vm3309_vm9, %v10338_v40, %v3308_v55  ;;  %vm3330_vm9 = vcmp.eq.f32.partialorder %v10350_v10, inf  ;;  %vm3353_vm10 = vcmp.eq.f32.partialorder %v10351_v23, 0.0 }
 0x43d   :  { %v8078_v53 = vsub.f32 %v5957_v49, %v7984_v38  ;;  %v2849_v37 = vpop.f32.mrb[83].mxu1  ;;  %v3287_v38 = vmul.f32 %v6161_v6, %v10337_v12  ;;  %v10353_v49 = vld [vmem:[#allocation83_spill] sm:$0xff]  ;;  %v3315_v14 = vmul.f32 %v6169_v21, %v10341_v51 }
 0x43e   :  { %v8086_v42 = vsub.f32 %v2849_v37, %v7986_v62  ;;  %v3312_v62 = vand.u32 2147483648, %v10338_v40  ;;  %6176 = vrsqrt.f32 %v10353_v49 }
 0x43f   :  { %10345 = vst [vmem:[#allocation57_spill] sm:$0xff] %v8078_v53  ;;  %v3317_v32 = vsel %vm3316_vm14, %v10341_v51, %v3315_v14  ;;  %vm3344_vm14 = vcmp.eq.f32.partialorder %v10353_v49, inf }
 0x440   :  { %10349 = vst [vmem:[#allocation44_spill] sm:$0xff] %v8086_v42  ;;  %v5960_v34 = vpop.f32.mrb[84].mxu1  ;;  %v8150_v21 = vsel %vm3311_vm13, %v3312_v62, %v3310_v13  ;;  %vm3339_vm13 = vcmp.eq.f32.partialorder %v10348_v0, 0.0 }
 0x441   :  { %v8102_v6 = vsub.f32 %v5960_v34, %v7990_v28  ;;  %v2859_v60 = vpop.f32.mrb[85].mxu1  ;;  %v10355_v28 = vld [vmem:[#allocation65_spill] sm:$0xff]  ;;  %v3289_v34 = vsel %vm3288_vm3, %v10337_v12, %v3287_v38  ;;  %10362 = vst [vmem:[#allocation46_spill] sm:$0xff] %v8150_v21  ;;  %vm3337_vm3 = vcmp.eq.f32.partialorder %v10348_v0, inf }
 0x442   :  { %v8110_v37 = vsub.f32 %v2859_v60, %v7994_v1  ;;  %6178 = vrsqrt.f32 %v10355_v28  ;;  %v3322_v60 = vmul.f32 %v6167_v3, %v10340_v8  ;;  %v8142_v55 = vsel %vm3290_vm4, %v3291_v27, %v3289_v34 }
 0x443   :  { %10352 = vst [vmem:[#allocation42_spill] sm:$0xff] %v8102_v6  ;;  %6180 = vrsqrt.f32 %v10356_v11  ;;  %10361 = vst [vmem:[#allocation77_spill] sm:$0xff] %v8142_v55  ;;  %v3303_v3 = vsel %vm3302_vm5, %v10339_v29, %v3301_v33  ;;  %v3333_v33 = vand.u32 2147483648, %v10350_v10  ;;  %vm3351_vm4 = vcmp.eq.f32.partialorder %v10351_v23, inf }
 0x444   :  { %10354 = vst [vmem:[#allocation47_spill] sm:$0xff] %v8110_v37  ;;  %v5963_v1 = vpop.f32.mrb[86].mxu1  ;;  %6182 = vrsqrt.f32 %v10357_v57  ;;  %v3324_v27 = vsel %vm3323_vm15, %v10340_v8, %v3322_v60  ;;  %vm3592_vm5 = vcmp.eq.f32.partialorder %v10334_v4, 0.0  ;;  %vm3332_vm15 = vcmp.eq.f32.partialorder %v10350_v10, 0.0 }
 0x445   :  { %v8132_v38 = vsub.f32 %v5963_v1, %v8002_v20  ;;  %v2869_v7 = vpop.f32.mrb[87].mxu1  ;;  %6184 = vrsqrt.f32 %v10359_v56  ;;  %v3319_v20 = vand.u32 2147483648, %v10341_v51  ;;  %v6171_v1 = vpop.eup %6170  ;;  %v8184_v14 = vsel %vm3325_vm7, %v3326_v25, %v3324_v27 }
 0x446   :  { %v8138_v41 = vsub.f32 %v2869_v7, %v8006_v9  ;;  %v6173_v9 = vpop.eup %6172  ;;  %v8166_v7 = vsel %vm3304_vm0, %v3305_v24, %v3303_v3  ;;  %v3336_v40 = vmul.f32 %v6171_v1, %v10348_v0  ;;  %vm3733_vm0 = vcmp.eq.f32.partialorder %v10335_v39, 0.0  ;;  %10366 = vst [vmem:[#allocation56_spill] sm:$0xff] %v8184_v14 }
 0x447   :  { %10358 = vst [vmem:[#allocation22_spill] sm:$0xff] %v8132_v38  ;;  %v6175_v62 = vpop.eup %6174  ;;  %10364 = vst [vmem:[#allocation23_spill] sm:$0xff] %v8166_v7  ;;  %v3329_v24 = vmul.f32 %v6173_v9, %v10350_v10  ;;  %v3734_v3 = vsel %vm3733_vm0, %v8046_v5, %v8071_v16  ;;  %v8203_v8 = vsel %vm3318_vm8, %v3319_v20, %v3317_v32  ;;  %vm3365_vm7 = vcmp.eq.f32.partialorder %v10355_v28, inf }
 0x448   :  { %10360 = vst [vmem:[#allocation50_spill] sm:$0xff] %v8138_v41  ;;  %v5966_v12 = vpop.f32.mrb[88].mxu1  ;;  %v6177_v29 = vpop.eup %6176  ;;  %10369 = vst [vmem:[#allocation54_spill] sm:$0xff] %v8203_v8  ;;  %v3368_v5 = vand.u32 2147483648, %v10355_v28  ;;  %vm3600_vm0 = vcmp.eq.s32.totalorder %v7961_v63, inf  ;;  %vm3741_vm8 = vcmp.eq.s32.totalorder %v7964_v59, inf }
 0x449   :  { %v8162_v34 = vsub.f32 %v5966_v12, %v8009_v31  ;;  %v2879_v13 = vpop.f32.mrb[89].mxu1  ;;  %v3593_v31 = vsel %vm3592_vm5, %v8041_v50, %v8064_v44  ;;  %vm8197_vm5 = vmor %vm3594_vm12, %vm3595_vm1  ;;  %v3350_v44 = vmul.f32 %v6175_v62, %v10351_v23  ;;  %v3338_v62 = vsel %vm3337_vm3, %v10348_v0, %v3336_v40 }
 0x44a   :  { %v8174_v60 = vsub.f32 %v2879_v13, %v8012_v54  ;;  %vm8215_vm12 = vmor %vm3735_vm2, %vm3736_vm11  ;;  %v3597_v20 = vsel %vm8197_vm5, nan, %v3593_v31  ;;  %vm3346_vm2 = vcmp.eq.f32.partialorder %v10353_v49, 0.0  ;;  %vm3601_vm11 = vcmp.eq.s32.totalorder %v7967_v30, inf }
 0x44b   :  { %10363 = vst [vmem:[#allocation53_spill] sm:$0xff] %v8162_v34  ;;  %v3331_v31 = vsel %vm3330_vm9, %v10350_v10, %v3329_v24  ;;  %vm3367_vm5 = vcmp.eq.f32.partialorder %v10355_v28, 0.0  ;;  %vm3360_vm1 = vcmp.eq.f32.partialorder %v10356_v11, 0.0  ;;  %v10374_v50 = vmov 0.7853982   ;;  %vm3602_vm3 = vmand %vm3600_vm0, %vm3601_vm11 }
 0x44c   :  { %10365 = vst [vmem:[#allocation78_spill] sm:$0xff] %v8174_v60  ;;  %v6179_v1 = vpop.eup %6178  ;;  %v5969_v25 = vpop.f32.mrb[90].mxu1  ;;  %v3599_v40 = vsel %vm3587_vm6, 2.3561945, %v10374_v50  ;;  %v3352_v24 = vsel %vm3351_vm4, %v10351_v23, %v3350_v44  ;;  %vm10375_vm9 = vcmp.lt.f32.partialorder %v10333_v17, 0.0  ;;  %vm3372_vm4 = vcmp.eq.f32.partialorder %v10357_v57, inf }
 0x44d   :  { %v6181_v16 = vpop.eup %6180  ;;  %v8220_v32 = vsub.f32 %v5969_v25, %v8015_v46  ;;  %v2889_v51 = vpop.f32.mrb[91].mxu1  ;;  %v3738_v46 = vsel %vm8215_vm12, nan, %v3734_v3  ;;  %vm3742_vm12 = vcmp.eq.s32.totalorder %v7970_v35, inf  ;;  %v3343_v3 = vmul.f32 %v6177_v29, %v10353_v49 }
 0x44e   :  { %v6183_v12 = vpop.eup %6182  ;;  %v8227_v27 = vsub.f32 %v2889_v51, %v8017_v22  ;;  %v3361_v22 = vand.u32 2147483648, %v10356_v11  ;;  %v3603_v25 = vsel %vm3602_vm3, %v3599_v40, %v3597_v20  ;;  %v3740_v9 = vsel %vm10375_vm9, 2.3561945, %v10374_v50  ;;  %vm3743_vm6 = vmand %vm3741_vm8, %vm3742_vm12 }
 0x44f   :  { %10372 = vst [vmem:[#allocation48_spill] sm:$0xff] %v8220_v32  ;;  %v6185_v13 = vpop.eup %6184  ;;  %v3364_v35 = vmul.f32 %v6179_v1, %v10355_v28  ;;  %v3357_v51 = vmul.f32 %v6181_v16, %v10356_v11  ;;  %v3744_v54 = vsel %vm3743_vm6, %v3740_v9, %v3738_v46  ;;  %v10378_v29 = vand.u32 2147483648, %v10348_v0 }
 0x450   :  { %10373 = vst [vmem:[#allocation24_spill] sm:$0xff] %v8227_v27  ;;  %v5972_v30 = vpop.f32.mrb[92].mxu1  ;;  %v3371_v59 = vmul.f32 %v6183_v12, %v10357_v57  ;;  %v8277_v1 = vsel %vm3332_vm15, %v3333_v33, %v3331_v31  ;;  %v10381_v16 = vand.u32 2147483648, %v10351_v23  ;;  %v3604_v20 = vand.u32 2147483647, %v3603_v25 }
 0x451   :  { %v8258_v47 = vsub.f32 %v5972_v30, %v8019_v18  ;;  %v2899_v63 = vpop.f32.mrb[93].mxu1  ;;  %v8269_v17 = vsel %vm3339_vm13, %v10378_v29, %v3338_v62  ;;  %v3378_v18 = vmul.f32 %v6185_v13, %v10359_v56  ;;  %10380 = vst [vmem:[#allocation58_spill] sm:$0xff] %v8277_v1  ;;  %v3605_v0 = vand.u32 2147483648, %v10334_v4 }
 0x452   :  { %v8263_v44 = vsub.f32 %v2899_v63, %v8021_v19  ;;  %10379 = vst [vmem:[#allocation61_spill] sm:$0xff] %v8269_v17  ;;  %v8283_v19 = vsel %vm3353_vm10, %v10381_v16, %v3352_v24  ;;  %v3345_v12 = vsel %vm3344_vm14, %v10353_v49, %v3343_v3  ;;  %vm3374_vm13 = vcmp.eq.f32.partialorder %v10357_v57, 0.0 }
 0x453   :  { %10376 = vst [vmem:[#allocation81_spill] sm:$0xff] %v8258_v47  ;;  %10382 = vst [vmem:[#allocation25_spill] sm:$0xff] %v8283_v19  ;;  %v3745_v10 = vand.u32 2147483647, %v3744_v54  ;;  %v3366_v23 = vsel %vm3365_vm7, %v10355_v28, %v3364_v35  ;;  %vm10384_vm10 = vcmp.eq.f32.partialorder %v10356_v11, inf  ;;  %vm3379_vm15 = vcmp.eq.f32.partialorder %v10359_v56, inf }
 0x454   :  { %10377 = vst [vmem:[#allocation59_spill] sm:$0xff] %v8263_v44  ;;  %v5975_v62 = vpop.f32.mrb[94].mxu1  ;;  %v3359_v4 = vsel %vm10384_vm10, %v10356_v11, %v3357_v51  ;;  %v3373_v31 = vsel %vm3372_vm4, %v10357_v57, %v3371_v59  ;;  %v3746_v54 = vand.u32 2147483648, %v10335_v39  ;;  %v10386_v40 = vand.u32 2147483648, %v10353_v49 }
 0x455   :  { %v8292_v33 = vsub.f32 %v5975_v62, %v8030_v2  ;;  %v2909_v46 = vpop.f32.mrb[95].mxu1  ;;  %v3380_v2 = vsel %vm3379_vm15, %v10359_v56, %v3378_v18  ;;  %v8313_v24 = vor.u32 %v3605_v0, %v3604_v20  ;;  %v3375_v3 = vand.u32 2147483648, %v10357_v57 }
 0x456   :  { %v8302_v13 = vsub.f32 %v2909_v46, %v8033_v61  ;;  %v8311_v30 = vsel %vm3346_vm2, %v10386_v40, %v3345_v12  ;;  %v3382_v25 = vand.u32 2147483648, %v10359_v56  ;;  %v8321_v9 = vsel %vm3367_vm5, %v3368_v5, %v3366_v23 }
 0x457   :  { %10383 = vst [vmem:[#allocation84_spill] sm:$0xff] %v8292_v33  ;;  %10387 = vst [vmem:[#allocation68_spill] sm:$0xff] %v8311_v30  ;;  %v8325_v39 = vsel %vm3360_vm1, %v3361_v22, %v3359_v4  ;;  %v8327_v63 = vor.u32 %v3746_v54, %v3745_v10  ;;  %vm3381_vm14 = vcmp.eq.f32.partialorder %v10359_v56, 0.0  ;;  %v8331_v49 = vand.u32 2147483647, %v8051_v26 }
 0x458   :  { %10385 = vst [vmem:[#allocation63_spill] sm:$0xff] %v8302_v13  ;;  %10388 = vst [vmem:[#allocation62_spill] sm:$0xff] %v8313_v24  ;;  %v8340_v28 = vsel %vm3374_vm13, %v3375_v3, %v3373_v31  ;;  %v8342_v5 = vsel %vm3381_vm14, %v3382_v25, %v3380_v2  ;;  %v8345_v11 = vand.u32 2147483647, %v8057_v48  ;;  %v8349_v56 = vmul.f32 %v8051_v26, %v8051_v26 }
 0x459   :  { %v8317_v61 = vpop.f32.mrb[48].mxu0  ;;  %10390 = vst [vmem:[#allocation69_spill] sm:$0xff] %v8321_v9  ;;  %10391 = vst [vmem:[#allocation97_spill] sm:$0xff] %v8325_v39  ;;  %v8353_v22 = vmul.f32 %v8057_v48, %v8057_v48  ;;  %v8359_v57 = vand.u32 2147483647, %v8078_v53  ;;  %v8368_v16 = vmul.f32 %v8078_v53, %v8078_v53  ;;  %v3402_v12 = vmul.f32 %v8086_v42, %v8086_v42 }
 0x45a   :  { %10389 = vst [vmem:[#allocation26_spill] sm:$0xff] %v8317_v61  ;;  %10392 = vst [vmem:[#allocation67_spill] sm:$0xff] %v8327_v63  ;;  %v8334_v35 = vand.u32 2147483647, %v8317_v61  ;;  %v8336_v51 = vpop.f32.mrb[49].mxu0  ;;  %vm4441_vm7 = vcmp.ne.f32.partialorder %v8086_v42, %v8086_v42  ;;  %v3405_v23 = vmul.f32 %v8102_v6, %v8102_v6  ;;  %vm4582_vm0 = vcmp.ne.f32.partialorder %v8102_v6, %v8102_v6 }
 0x45b   :  { %10393 = vst [vmem:[#allocation74_spill] sm:$0xff] %v8331_v49  ;;  %10395 = vst [vmem:[#allocation79_spill] sm:$0xff] %v8340_v28  ;;  %v8356_v29 = vand.u32 2147483647, %v8336_v51  ;;  %v8362_v59 = vand.u32 2147483647, %v8086_v42  ;;  %v3404_v54 = vmul.f32 %v8110_v37, %v8110_v37  ;;  %vm4535_vm1 = vcmp.ne.f32.partialorder %v8110_v37, %v8110_v37 }
 0x45c   :  { %10394 = vst [vmem:[#allocation27_spill] sm:$0xff] %v8334_v35  ;;  %10396 = vst [vmem:[#allocation28_spill] sm:$0xff] %v8342_v5  ;;  %v4362_v18 = vmax.f32 %v8334_v35, %v8331_v49  ;;  %v8371_v20 = vand.u32 2147483647, %v8102_v6  ;;  %v8382_v10 = vand.u32 2147483647, %v8110_v37  ;;  %v3407_v3 = vmul.f32 %v8132_v38, %v8132_v38 }
 0x45d   :  { %10397 = vst [vmem:[#allocation82_spill] sm:$0xff] %v8345_v11  ;;  %10398 = vst [vmem:[#allocation29_spill] sm:$0xff] %v8356_v29  ;;  %v4315_v0 = vmax.f32 %v8356_v29, %v8345_v11  ;;  %v8375_v62 = vpop.f32.mrb[50].mxu0  ;;  %v8391_v4 = vand.u32 2147483647, %v8132_v38  ;;  %v8409_v25 = vmul.f32 %v8138_v41, %v8138_v41  ;;  %v8423_v58 = vmul.f32 %v8162_v34, %v8162_v34 }
 0x45e   :  { %10399 = vst [vmem:[#allocation85_spill] sm:$0xff] %v8359_v57  ;;  %10400 = vst [vmem:[#allocation30_spill] sm:$0xff] %v8362_v59  ;;  %6186 = vrcp.f32 %v4362_v18  ;;  %v8384_v46 = vpop.f32.mrb[51].mxu0  ;;  %v8394_v31 = vand.u32 2147483647, %v8375_v62  ;;  %v8437_v9 = vmul.f32 %v8174_v60, %v8174_v60  ;;  %vm4676_vm5 = vcmp.ne.f32.partialorder %v8132_v38, %v8132_v38 }
 0x45f   :  { %10401 = vst [vmem:[#allocation86_spill] sm:$0xff] %v8371_v20  ;;  %10402 = vst [vmem:[#allocation31_spill] sm:$0xff] %v8375_v62  ;;  %6188 = vrcp.f32 %v4315_v0  ;;  %v8399_v2 = vand.u32 2147483647, %v8138_v41  ;;  %v3386_v40 = vmul.f32 %v8384_v46, %v8384_v46  ;;  %v8412_v18 = vand.u32 2147483647, %v8162_v34 }
 0x460   :  { %10403 = vst [vmem:[#allocation88_spill] sm:$0xff] %v8382_v10  ;;  %10404 = vst [vmem:[#allocation33_spill] sm:$0xff] %v8384_v46  ;;  %v8415_v0 = vand.u32 2147483647, %v8174_v60  ;;  %v4456_v5 = vmax.f32 %v8394_v31, %v8359_v57  ;;  %v8426_v28 = vand.u32 2147483647, %v8220_v32  ;;  %vm4440_vm8 = vcmp.ne.f32.partialorder %v8384_v46, %v8384_v46 }
 0x461   :  { %10405 = vst [vmem:[#allocation96_spill] sm:$0xff] %v8391_v4  ;;  %10406 = vst [vmem:[#allocation32_spill] sm:$0xff] %v8394_v31  ;;  %v8419_v15 = vpop.f32.mrb[52].mxu0  ;;  %v8428_v63 = vadd.f32 %v3402_v12, %v3386_v40  ;;  %v8431_v24 = vand.u32 2147483647, %v8384_v46  ;;  %v8445_v12 = vmul.f32 %v8220_v32, %v8220_v32  ;;  %v8477_v42 = vmul.f32 %v8227_v27, %v8227_v27 }
 0x462   :  { %10407 = vst [vmem:[#allocation93_spill] sm:$0xff] %v8399_v2  ;;  %10408 = vst [vmem:[#allocation36_spill] sm:$0xff] %v8412_v18  ;;  %v8433_v39 = vpop.f32.mrb[53].mxu0  ;;  %6190 = vrcp.f32 %v4456_v5  ;;  %v3389_v43 = vmul.f32 %v8419_v15, %v8419_v15  ;;  %v8448_v40 = vand.u32 2147483647, %v8227_v27  ;;  %v10417_v5 = vmov 0 }
 0x463   :  { %10409 = vst [vmem:[#allocation39_spill] sm:$0xff] %v8415_v0  ;;  %10410 = vst [vmem:[#allocation19_spill] sm:$0xff] %v8419_v15  ;;  %v4409_v53 = vmax.f32 %v8431_v24, %v8362_v59  ;;  %vm4430_vm2 = vcmp.gt.f32.partialorder %v8362_v59, %v8431_v24  ;;  %v8466_v19 = vand.u32 2147483647, %v8258_v47  ;;  %v8471_v1 = vand.u32 2147483647, %v8419_v15 }
 0x464   :  { %10411 = vst [vmem:[#allocation20_spill] sm:$0xff] %v8426_v28  ;;  %10412 = vst [vmem:[#allocation37_spill] sm:$0xff] %v8428_v63  ;;  %v8468_v30 = vadd.f32 %v3405_v23, %v3389_v43  ;;  %vm4581_vm3 = vcmp.ne.f32.partialorder %v8419_v15, %v8419_v15  ;;  %v3388_v43 = vmul.f32 %v8433_v39, %v8433_v39  ;;  %v8501_v50 = vand.u32 2147483647, %v8433_v39 }
 0x465   :  { %10413 = vst [vmem:[#allocation43_spill] sm:$0xff] %v8431_v24  ;;  %10414 = vst [vmem:[#allocation49_spill] sm:$0xff] %v8433_v39  ;;  %v8473_v48 = vpop.f32.mrb[54].mxu0  ;;  %6192 = vrcp.f32 %v4409_v53  ;;  %v4550_v8 = vmax.f32 %v8471_v1, %v8371_v20  ;;  %vm4571_vm12 = vcmp.gt.f32.partialorder %v8371_v20, %v8471_v1  ;;  %v10426_v53 = vmov 0 }
 0x466   :  { %10415 = vst [vmem:[#allocation55_spill] sm:$0xff] %v8445_v12  ;;  %10416 = vst [vmem:[#allocation60_spill] sm:$0xff] %v8448_v40  ;;  %v8485_v23 = vpop.f32.mrb[55].mxu0  ;;  %v4314_v17 = vmin.f32 %v8356_v29, %v8345_v11  ;;  %v8505_v7 = vadd.f32 %v3404_v54, %v3388_v43  ;;  %vm4534_vm6 = vcmp.ne.f32.partialorder %v8433_v39, %v8433_v39  ;;  %v10432_v54 = vmov 0 }
 0x467   :  { %vm8459_vm11 = vmor %vm4440_vm8, %vm4441_vm7  ;;  %10420 = vst [vmem:[#allocation72_spill] sm:$0xff] %v8466_v19  ;;  %v8511_v26 = vmul.f32 %v8258_v47, %v8258_v47  ;;  %6194 = vrcp.f32 %v4550_v8  ;;  %v4503_v55 = vmax.f32 %v8501_v50, %v8382_v10  ;;  %vm4524_vm13 = vcmp.gt.f32.partialorder %v8382_v10, %v8501_v50 }
 0x468   :  { %v10418_v5 = vsel %vm8459_vm11, 4294967295, %v10417_v5  ;;  %10421 = vst [vmem:[#allocation76_spill] sm:$0xff] %v8468_v30  ;;  %10422 = vst [vmem:[#allocation80_spill] sm:$0xff] %v8471_v1  ;;  %v6187_v14 = vpop.eup %6186  ;;  %v3391_v8 = vmul.f32 %v8473_v48, %v8473_v48  ;;  %vm4629_vm10 = vcmp.ne.f32.partialorder %v8138_v41, %v8138_v41  ;;  %v4455_v37 = vmin.f32 %v8394_v31, %v8359_v57 }
 0x469   :  { %10419 = vst [vmem:[#allocation64_spill] sm:$0xff] %v10418_v5  ;;  %10423 = vst [vmem:[#allocation83_spill] sm:$0xff] %v8473_v48  ;;  %v4361_v5 = vmin.f32 %v8334_v35, %v8331_v49  ;;  %v6189_v6 = vpop.eup %6188  ;;  %v8526_v43 = vpop.f32.mrb[56].mxu0  ;;  %6196 = vrcp.f32 %v4503_v55  ;;  %vm4675_vm15 = vcmp.ne.f32.partialorder %v8473_v48, %v8473_v48  ;;  %v8589_v38 = vand.u32 2147483647, %v8485_v23 }
 0x46a   :  { %10424 = vst [vmem:[#allocation65_spill] sm:$0xff] %v8477_v42  ;;  %10425 = vst [vmem:[#allocation87_spill] sm:$0xff] %v8485_v23  ;;  %v8558_v45 = vadd.f32 %v3407_v3, %v3391_v8  ;;  %v10440_v3 = vmov 0 }
 0x46b   :  { %vm8496_vm9 = vmor %vm4581_vm3, %vm4582_vm0  ;;  %10429 = vst [vmem:[#allocation90_spill] sm:$0xff] %v8501_v50  ;;  %v8513_v21 = vmul.f32 %v6187_v14, %v4361_v5  ;;  %v8531_v14 = vmul.f32 %v6189_v6, %v4314_v17  ;;  %v8537_v5 = vpop.f32.mrb[57].mxu0  ;;  %v8550_v6 = vmul.f32 %v8263_v44, %v8263_v44  ;;  %vm4618_vm0 = vcmp.gt.f32.partialorder %v8399_v2, %v8589_v38 }
 0x46c   :  { %v10427_v53 = vsel %vm8496_vm9, 4294967295, %v10426_v53  ;;  %10430 = vst [vmem:[#allocation98_spill] sm:$0xff] %v8505_v7  ;;  %10431 = vst [vmem:[#allocation99_spill] sm:$0xff] %v8511_v26  ;;  %v8529_v7 = vand.u32 2147483647, %v8263_v44  ;;  %v6191_v55 = vpop.eup %6190 }
 0x46d   :  { %10428 = vst [vmem:[#allocation94_spill] sm:$0xff] %v10427_v53  ;;  %vm8522_vm4 = vmor %vm4534_vm6, %vm4535_vm1  ;;  %v8541_v53 = vmul.f32 %v8513_v21, %v8513_v21  ;;  %v8554_v17 = vmul.f32 %v8531_v14, %v8531_v14  ;;  %v8576_v8 = vpop.f32.mrb[58].mxu0  ;;  %v8582_v52 = vmul.f32 %v6191_v55, %v4455_v37  ;;  %vm4628_vm1 = vcmp.ne.f32.partialorder %v8485_v23, %v8485_v23 }
 0x46e   :  { %v10433_v54 = vsel %vm8522_vm4, 4294967295, %v10432_v54  ;;  %10435 = vst [vmem:[#allocation101_spill] sm:$0xff] %v8526_v43  ;;  %10436 = vst [vmem:[#allocation102_spill] sm:$0xff] %v8529_v7  ;;  %v3390_v7 = vmul.f32 %v8485_v23, %v8485_v23  ;;  %vm4342_vm6 = vcmp.lt.s32.totalorder %v8336_v51, 0 }
 0x46f   :  { %10434 = vst [vmem:[#allocation100_spill] sm:$0xff] %v10433_v54  ;;  %v8544_v54 = vand.u32 2147483647, %v8473_v48  ;;  %10438 = vst [vmem:[#allocation104_spill] sm:$0xff] %v8550_v6  ;;  %v4366_v30 = vmul.f32 0.002785687, %v8541_v53  ;;  %v6193_v26 = vpop.eup %6192  ;;  %v8600_v55 = vmul.f32 %v8582_v52, %v8582_v52 }
 0x470   :  { %10439 = vst [vmem:[#allocation105_spill] sm:$0xff] %v8558_v45  ;;  %vm8572_vm7 = vmor %vm4675_vm15, %vm4676_vm5  ;;  %v8579_v45 = vand.u32 2147483647, %v8292_v33  ;;  %v4319_v63 = vmul.f32 0.002785687, %v8554_v17  ;;  %v8586_v6 = vpop.f32.mrb[59].mxu0  ;;  %v8603_v40 = vadd.f32 %v8409_v25, %v3390_v7 }
 0x471   :  { %10437 = vst [vmem:[#allocation103_spill] sm:$0xff] %v8544_v54  ;;  %v4644_v36 = vmax.f32 %v8544_v54, %v8391_v4  ;;  %vm4665_vm14 = vcmp.gt.f32.partialorder %v8391_v4, %v8544_v54  ;;  %v10441_v3 = vsel %vm8572_vm7, 4294967295, %v10440_v3  ;;  %10443 = vst [vmem:[#allocation107_spill] sm:$0xff] %v8576_v8  ;;  %v4367_v19 = vadd.f32 -0.015866, %v4366_v30  ;;  %v6195_v25 = vpop.eup %6194 }
 0x472   :  { %10442 = vst [vmem:[#allocation106_spill] sm:$0xff] %v10441_v3  ;;  %10444 = vst [vmem:[#allocation108_spill] sm:$0xff] %v8579_v45  ;;  %v8593_v3 = vmul.f32 %v8292_v33, %v8292_v33  ;;  %v8596_v45 = vand.u32 2147483647, %v8302_v13  ;;  %v4320_v37 = vadd.f32 -0.015866, %v4319_v63  ;;  %v10450_v30 = vmin.f32 %v8431_v24, %v8362_v59 }
 0x473   :  { %10445 = vst [vmem:[#allocation109_spill] sm:$0xff] %v8586_v6  ;;  %6198 = vrcp.f32 %v4644_v36  ;;  %10446 = vst [vmem:[#allocation110_spill] sm:$0xff] %v8589_v38  ;;  %v4368_v36 = vmul.f32 %v4367_v19, %v8541_v53  ;;  %v4597_v63 = vmax.f32 %v8589_v38, %v8399_v2  ;;  %v4460_v7 = vmul.f32 0.002785687, %v8600_v55 }
 0x474   :  { %10447 = vst [vmem:[#allocation111_spill] sm:$0xff] %v8593_v3  ;;  %10448 = vst [vmem:[#allocation112_spill] sm:$0xff] %v8596_v45  ;;  %v8609_v42 = vmul.f32 %v6193_v26, %v10450_v30  ;;  %v8615_v45 = vpop.f32.mrb[60].mxu0  ;;  %v4321_v33 = vmul.f32 %v4320_v37, %v8554_v17  ;;  %v8625_v26 = vmul.f32 %v8302_v13, %v8302_v13  ;;  %v6197_v13 = vpop.eup %6196  ;;  %vm4389_vm5 = vcmp.lt.s32.totalorder %v8317_v61, 0 }
 0x475   :  { %10449 = vst [vmem:[#allocation113_spill] sm:$0xff] %v8603_v40  ;;  %10451 = vst [vmem:[#allocation114_spill] sm:$0xff] %v8615_v45  ;;  %v8621_v19 = vpop.f32.mrb[61].mxu0  ;;  %v4369_v30 = vadd.f32 0.04247222, %v4368_v36  ;;  %6200 = vrcp.f32 %v4597_v63  ;;  %v10454_v45 = vmin.f32 %v8471_v1, %v8371_v20  ;;  %v10455_v36 = vmov 0 }
 0x476   :  { %10452 = vst [vmem:[#allocation115_spill] sm:$0xff] %v8621_v19  ;;  %10453 = vst [vmem:[#allocation116_spill] sm:$0xff] %v8625_v26  ;;  %v8629_v3 = vmul.f32 %v8609_v42, %v8609_v42  ;;  %v4322_v37 = vadd.f32 0.04247222, %v4321_v33  ;;  %v4461_v40 = vadd.f32 -0.015866, %v4460_v7  ;;  %v3393_v63 = vmul.f32 %v8526_v43, %v8526_v43 }
 0x477   :  { %v8636_v19 = vmul.f32 %v6195_v25, %v10454_v45  ;;  %vm8641_vm8 = vmor %vm4628_vm1, %vm4629_vm10  ;;  %v4370_v26 = vmul.f32 %v4369_v30, %v8541_v53  ;;  %v8651_v45 = vand.u32 2147483647, %v8526_v43  ;;  %v8653_v7 = vpop.f32.mrb[62].mxu0  ;;  %v10460_v30 = vmin.f32 %v8501_v50, %v8382_v10 }
 0x478   :  { %v10456_v36 = vsel %vm8641_vm8, 4294967295, %v10455_v36  ;;  %v4413_v33 = vmul.f32 0.002785687, %v8629_v3  ;;  %10459 = vst [vmem:[#allocation119_spill] sm:$0xff] %v8653_v7  ;;  %v4323_v25 = vmul.f32 %v4322_v37, %v8554_v17  ;;  %v4462_v41 = vmul.f32 %v4461_v40, %v8600_v55  ;;  %v8666_v6 = vpop.f32.mrb[63].mxu0 }
 0x479   :  { %10457 = vst [vmem:[#allocation117_spill] sm:$0xff] %v10456_v36  ;;  %10458 = vst [vmem:[#allocation118_spill] sm:$0xff] %v8651_v45  ;;  %v8659_v36 = vmul.f32 %v8636_v19, %v8636_v19  ;;  %v8664_v44 = vmul.f32 %v6197_v13, %v10460_v30  ;;  %v4371_v47 = vadd.f32 -0.074975304, %v4370_v26  ;;  %v8669_v28 = vadd.f32 %v8423_v58, %v3393_v63 }
 0x47a   :  { %10461 = vst [vmem:[#allocation120_spill] sm:$0xff] %v8666_v6  ;;  %v4414_v23 = vadd.f32 -0.015866, %v4413_v33  ;;  %v4324_v40 = vadd.f32 -0.074975304, %v4323_v25  ;;  %v4738_v58 = vmax.f32 %v8651_v45, %v8412_v18  ;;  %v3385_v37 = vmul.f32 %v8317_v61, %v8317_v61 }
 0x47b   :  { %10462 = vst [vmem:[#allocation121_spill] sm:$0xff] %v8669_v28  ;;  %v4463_v7 = vadd.f32 0.04247222, %v4462_v41  ;;  %v4554_v12 = vmul.f32 0.002785687, %v8659_v36  ;;  %v8676_v57 = vmul.f32 %v8664_v44, %v8664_v44  ;;  %v4372_v30 = vmul.f32 %v4371_v47, %v8541_v53  ;;  %v10543_v59 = vld [vmem:[#allocation111_spill] sm:$0xff] }
 0x47c   :  { %v4415_v26 = vmul.f32 %v4414_v23, %v8629_v3  ;;  %v4325_v63 = vmul.f32 %v4324_v40, %v8554_v17  ;;  %v10463_v23 = vmin.f32 %v8544_v54, %v8391_v4  ;;  %6202 = vrcp.f32 %v4738_v58  ;;  %v10512_v50 = vld [vmem:[#allocation114_spill] sm:$0xff] }
 0x47d   :  { %v6199_v13 = vpop.eup %6198  ;;  %v4464_v41 = vmul.f32 %v4463_v7, %v8600_v55  ;;  %v4555_v33 = vadd.f32 -0.015866, %v4554_v12  ;;  %v4507_v25 = vmul.f32 0.002785687, %v8676_v57  ;;  %v4373_v28 = vadd.f32 0.1064488, %v4372_v30 }
 0x47e   :  { %v4416_v47 = vadd.f32 0.04247222, %v4415_v26  ;;  %v8692_v6 = vmul.f32 %v6199_v13, %v10463_v23  ;;  %v4326_v31 = vadd.f32 0.1064488, %v4325_v63  ;;  %v10464_v7 = vmov 0.0  }
 0x47f   :  { %v4465_v8 = vadd.f32 -0.074975304, %v4464_v41  ;;  %v4556_v11 = vmul.f32 %v4555_v33, %v8659_v36  ;;  %v4508_v40 = vadd.f32 -0.015866, %v4507_v25  ;;  %v6201_v29 = vpop.eup %6200  ;;  %v4374_v12 = vmul.f32 %v4373_v28, %v8541_v53 }
 0x480   :  { %v8699_v49 = vsel %vm4389_vm5, 3.1415927, %v10464_v7  ;;  %v4417_v30 = vmul.f32 %v4416_v47, %v8629_v3  ;;  %v8704_v26 = vmul.f32 %v8692_v6, %v8692_v6  ;;  %v4327_v13 = vmul.f32 %v4326_v31, %v8554_v17 }
 0x481   :  { %10465 = vst [vmem:[#allocation122_spill] sm:$0xff] %v8699_v49  ;;  %v4466_v63 = vmul.f32 %v4465_v8, %v8600_v55  ;;  %v4557_v41 = vadd.f32 0.04247222, %v4556_v11  ;;  %v4509_v33 = vmul.f32 %v4508_v40, %v8676_v57  ;;  %v4375_v25 = vadd.f32 -0.14207031, %v4374_v12 }
 0x482   :  { %v4418_v28 = vadd.f32 -0.074975304, %v4417_v30  ;;  %v4648_v23 = vmul.f32 0.002785687, %v8704_v26  ;;  %v10466_v49 = vmin.f32 %v8589_v38, %v8399_v2  ;;  %v4328_v47 = vadd.f32 -0.14207031, %v4327_v13 }
 0x483   :  { %v4467_v54 = vadd.f32 0.1064488, %v4466_v63  ;;  %v4558_v4 = vmul.f32 %v4557_v41, %v8659_v36  ;;  %v4510_v35 = vadd.f32 0.04247222, %v4509_v33  ;;  %v3384_v31 = vmul.f32 %v8336_v51, %v8336_v51 }
 0x484   :  { %v8713_v61 = vmul.f32 %v6201_v29, %v10466_v49  ;;  %v4419_v11 = vmul.f32 %v4418_v28, %v8629_v3  ;;  %v4649_v8 = vadd.f32 -0.015866, %v4648_v23  ;;  %v8724_v12 = vadd.f32 %v8349_v56, %v3385_v37 }
 0x485   :  { %v4468_v49 = vmul.f32 %v4467_v54, %v8600_v55  ;;  %v4559_v29 = vadd.f32 -0.074975304, %v4558_v4  ;;  %v4511_v30 = vmul.f32 %v4510_v35, %v8676_v57  ;;  %v4376_v13 = vmul.f32 %v4375_v25, %v8541_v53 }
 0x486   :  { %v8721_v40 = vmul.f32 %v8713_v61, %v8713_v61  ;;  %v4420_v63 = vadd.f32 0.1064488, %v4419_v11  ;;  %v4650_v41 = vmul.f32 %v4649_v8, %v8704_v26  ;;  %v4329_v28 = vmul.f32 %v4328_v47, %v8554_v17 }
 0x487   :  { %v4469_v23 = vadd.f32 -0.14207031, %v4468_v49  ;;  %v4560_v38 = vmul.f32 %v4559_v29, %v8659_v36  ;;  %v4512_v2 = vadd.f32 -0.074975304, %v4511_v30  ;;  %v8734_v56 = vadd.f32 %v8353_v22, %v3384_v31 }
 0x488   :  { %v4601_v33 = vmul.f32 0.002785687, %v8721_v40  ;;  %v4421_v4 = vmul.f32 %v4420_v63, %v8629_v3  ;;  %v4651_v54 = vadd.f32 0.04247222, %v4650_v41  ;;  %v4377_v8 = vadd.f32 0.19993454, %v4376_v13 }
 0x489   :  { %10467 = vst [vmem:[#allocation123_spill] sm:$0xff] %v8734_v56  ;;  %v4470_v37 = vmul.f32 %v4469_v23, %v8600_v55  ;;  %v4561_v25 = vadd.f32 0.1064488, %v4560_v38  ;;  %v4513_v11 = vmul.f32 %v4512_v2, %v8676_v57  ;;  %v4330_v30 = vadd.f32 0.19993454, %v4329_v28 }
 0x48a   :  { %v4602_v35 = vadd.f32 -0.015866, %v4601_v33  ;;  %v4422_v47 = vadd.f32 -0.14207031, %v4421_v4  ;;  %v4652_v49 = vmul.f32 %v4651_v54, %v8704_v26  ;;  %v8747_v38 = vsel %vm4342_vm6, 3.1415927, %v10464_v7 }
 0x48b   :  { %v4562_v22 = vmul.f32 %v4561_v25, %v8659_v36  ;;  %v4514_v31 = vadd.f32 0.1064488, %v4513_v11  ;;  %v4471_v63 = vadd.f32 0.19993454, %v4470_v37  ;;  %10468 = vst [vmem:[#allocation124_spill] sm:$0xff] %v8747_v38  ;;  %vm4483_vm10 = vcmp.lt.s32.totalorder %v8375_v62, 0 }
 0x48c   :  { %v4603_v29 = vmul.f32 %v4602_v35, %v8721_v40  ;;  %v4423_v41 = vmul.f32 %v4422_v47, %v8629_v3  ;;  %v4653_v33 = vadd.f32 -0.074975304, %v4652_v49  ;;  %v4378_v28 = vmul.f32 %v4377_v8, %v8541_v53 }
 0x48d   :  { %v4563_v2 = vadd.f32 -0.14207031, %v4562_v22  ;;  %v4515_v13 = vmul.f32 %v4514_v31, %v8676_v57  ;;  %v4331_v54 = vmul.f32 %v4330_v30, %v8554_v17  ;;  %v3387_v35 = vmul.f32 %v8375_v62, %v8375_v62 }
 0x48e   :  { %v4604_v56 = vadd.f32 0.04247222, %v4603_v29  ;;  %v4424_v23 = vadd.f32 0.19993454, %v4423_v41  ;;  %v4654_v58 = vmul.f32 %v4653_v33, %v8704_v26  ;;  %v4472_v11 = vmul.f32 %v4471_v63, %v8600_v55 }
 0x48f   :  { %v4564_v37 = vmul.f32 %v4563_v2, %v8659_v36  ;;  %v4516_v25 = vadd.f32 -0.14207031, %v4515_v13  ;;  %v8761_v8 = vsel %vm4483_vm10, 3.1415927, %v10464_v7  ;;  %vm4436_vm15 = vcmp.lt.s32.totalorder %v8384_v46, 0 }
 0x490   :  { %v4605_v4 = vmul.f32 %v4604_v56, %v8721_v40  ;;  %v4425_v47 = vmul.f32 %v4424_v23, %v8629_v3  ;;  %v4655_v49 = vadd.f32 0.1064488, %v4654_v58  ;;  %10469 = vst [vmem:[#allocation125_spill] sm:$0xff] %v8761_v8  ;;  %v4379_v22 = vadd.f32 -0.33333147, %v4378_v28 }
 0x491   :  { %v4565_v56 = vadd.f32 0.19993454, %v4564_v37  ;;  %v4517_v30 = vmul.f32 %v4516_v25, %v8676_v57  ;;  %v4332_v2 = vadd.f32 -0.33333147, %v4331_v54  ;;  %vm4577_vm1 = vcmp.lt.s32.totalorder %v8419_v15, 0  ;;  %v6203_v37 = vpop.eup %6202 }
 0x492   :  { %v4606_v29 = vadd.f32 -0.074975304, %v4605_v4  ;;  %v4426_v31 = vadd.f32 -0.33333147, %v4425_v47  ;;  %v4656_v41 = vmul.f32 %v4655_v49, %v8704_v26  ;;  %v4473_v23 = vadd.f32 -0.33333147, %v4472_v11 }
 0x493   :  { %v4566_v63 = vmul.f32 %v4565_v56, %v8659_v36  ;;  %v4518_v13 = vadd.f32 0.19993454, %v4517_v30  ;;  %v8771_v25 = vadd.f32 %v8368_v16, %v3387_v35  ;;  %v8776_v28 = vsel %vm4436_vm15, 3.1415927, %v10464_v7 }
 0x494   :  { %v4607_v33 = vmul.f32 %v4606_v29, %v8721_v40  ;;  %v4427_v58 = vmul.f32 %v4426_v31, %v8629_v3  ;;  %v4657_v4 = vadd.f32 -0.14207031, %v4656_v41  ;;  %10470 = vst [vmem:[#allocation126_spill] sm:$0xff] %v8776_v28  ;;  %vm4530_vm5 = vcmp.lt.s32.totalorder %v8433_v39, 0 }
 0x495   :  { %v4567_v54 = vadd.f32 -0.33333147, %v4566_v63  ;;  %vm4770_vm6 = vcmp.ne.f32.partialorder %v8162_v34, %v8162_v34  ;;  %v4380_v11 = vmul.f32 %v4379_v22, %v8541_v53  ;;  %vm10017_vm10 = vcmp.lt.f32.partialorder %v8384_v46, 0.0  ;;  %v10503_v34 = vld [vmem:[#allocation59_spill] sm:$0xff] }
 0x496   :  { %v4608_v8 = vadd.f32 0.1064488, %v4607_v33  ;;  %v4428_v3 = vmul.f32 %v4427_v58, %v8609_v42  ;;  %v4519_v16 = vmul.f32 %v4518_v13, %v8676_v57  ;;  %v4658_v35 = vmul.f32 %v4657_v4, %v8704_v26 }
 0x497   :  { %v4333_v47 = vmul.f32 %v4332_v2, %v8554_v17  ;;  %v4568_v49 = vmul.f32 %v4567_v54, %v8659_v36  ;;  %v8791_v29 = vsel %vm4577_vm1, 3.1415927, %v10464_v7  ;;  %v4474_v53 = vmul.f32 %v4473_v23, %v8600_v55 }
 0x498   :  { %10471 = vst [vmem:[#allocation127_spill] sm:$0xff] %v8791_v29  ;;  %v4609_v56 = vmul.f32 %v4608_v8, %v8721_v40  ;;  %v4429_v30 = vadd.f32 %v4428_v3, %v8609_v42  ;;  %v4520_v22 = vadd.f32 -0.33333147, %v4519_v16  ;;  %v4659_v31 = vadd.f32 0.19993454, %v4658_v35 }
 0x499   :  { %v4569_v41 = vmul.f32 %v4568_v49, %v8636_v19  ;;  %vm10016_vm15 = vcmp.lt.f32.partialorder %v8419_v15, 0.0  ;;  %v8801_v17 = vsel %vm4530_vm5, 3.1415927, %v10464_v7  ;;  %v10473_v33 = vmin.f32 %v8651_v45, %v8412_v18  ;;  %v10524_v15 = vld [vmem:[#allocation102_spill] sm:$0xff] }
 0x49a   :  { %10472 = vst [vmem:[#allocation128_spill] sm:$0xff] %v8801_v17  ;;  %v4610_v36 = vadd.f32 -0.14207031, %v4609_v56  ;;  %v4381_v55 = vmul.f32 %v4380_v11, %v8513_v21  ;;  %v4431_v42 = vsub.f32 1.5707964, %v4429_v30  ;;  %v4521_v2 = vmul.f32 %v4520_v22, %v8676_v57 }
 0x49b   :  { %v8806_v8 = vmul.f32 %v6203_v37, %v10473_v33  ;;  %v4660_v63 = vmul.f32 %v4659_v31, %v8704_v26  ;;  %v4334_v13 = vmul.f32 %v4333_v47, %v8531_v14  ;;  %v4570_v23 = vadd.f32 %v4569_v41, %v8636_v19 }
 0x49c   :  { %v4611_v58 = vmul.f32 %v4610_v36, %v8721_v40  ;;  %v4475_v37 = vmul.f32 %v4474_v53, %v8582_v52  ;;  %v4432_v54 = vsel %vm4430_vm2, %v4431_v42, %v4429_v30  ;;  %v4522_v57 = vmul.f32 %v4521_v2, %v8664_v44 }
 0x49d   :  { %v8816_v4 = vmul.f32 %v8806_v8, %v8806_v8  ;;  %v4661_v11 = vadd.f32 -0.33333147, %v4660_v63  ;;  %v4434_v3 = vsub.f32 3.1415927, %v4432_v54  ;;  %v4572_v16 = vsub.f32 1.5707964, %v4570_v23 }
 0x49e   :  { %v4612_v35 = vadd.f32 0.19993454, %v4611_v58  ;;  %vm4769_vm1 = vcmp.ne.f32.partialorder %v8526_v43, %v8526_v43  ;;  %vm4723_vm5 = vcmp.ne.f32.partialorder %v8174_v60, %v8174_v60  ;;  %v4523_v19 = vadd.f32 %v4522_v57, %v8664_v44 }
 0x49f   :  { %v4662_v47 = vmul.f32 %v4661_v11, %v8704_v26  ;;  %v4742_v49 = vmul.f32 0.002785687, %v8816_v4  ;;  %vm8833_vm2 = vmor %vm4769_vm1, %vm4770_vm6  ;;  %v10474_v56 = vmov 0  ;;  %v3392_v53 = vmul.f32 %v8537_v5, %v8537_v5 }
 0x4a0   :  { %v10475_v56 = vsel %vm8833_vm2, 4294967295, %v10474_v56  ;;  %v8841_v30 = vsel %vm10017_vm10, %v4434_v3, %v4432_v54  ;;  %v4573_v44 = vsel %vm4571_vm12, %v4572_v16, %v4570_v23  ;;  %v4613_v26 = vmul.f32 %v4612_v35, %v8721_v40 }
 0x4a1   :  { %10476 = vst [vmem:[#allocation129_spill] sm:$0xff] %v10475_v56  ;;  %10477 = vst [vmem:[#allocation130_spill] sm:$0xff] %v8841_v30  ;;  %v8848_v22 = vand.u32 2147483647, %v8537_v5  ;;  %v4575_v31 = vsub.f32 3.1415927, %v4573_v44  ;;  %v4663_v36 = vmul.f32 %v4662_v47, %v8692_v6  ;;  %v8852_v2 = vadd.f32 %v8437_v9, %v3392_v53 }
 0x4a2   :  { %v4525_v41 = vsub.f32 1.5707964, %v4523_v19  ;;  %v4743_v33 = vadd.f32 -0.015866, %v4742_v49  ;;  %v4614_v42 = vadd.f32 -0.33333147, %v4613_v26  ;;  %vm4864_vm12 = vcmp.ne.f32.partialorder %v8220_v32, %v8220_v32 }
 0x4a3   :  { %v4691_v23 = vmax.f32 %v8848_v22, %v8415_v0  ;;  %v8860_v58 = vsel %vm10016_vm15, %v4575_v31, %v4573_v44  ;;  %v4664_v57 = vadd.f32 %v4663_v36, %v8692_v6  ;;  %vm10018_vm1 = vcmp.lt.f32.partialorder %v8433_v39, 0.0  ;;  %v10481_v49 = vld [vmem:[#allocation74_spill] sm:$0xff]  ;;  %v10482_v53 = vld [vmem:[#allocation29_spill] sm:$0xff]  ;;  %v10489_v36 = vld [vmem:[#allocation107_spill] sm:$0xff] }
 0x4a4   :  { %10478 = vst [vmem:[#allocation131_spill] sm:$0xff] %v8860_v58  ;;  %v4526_v54 = vsel %vm4524_vm13, %v4525_v41, %v4523_v19  ;;  %v4744_v11 = vmul.f32 %v4743_v33, %v8816_v4  ;;  %v4615_v3 = vmul.f32 %v4614_v42, %v8721_v40  ;;  %vm10023_vm15 = vcmp.lt.f32.partialorder %v8473_v48, 0.0  ;;  %v10480_v40 = vld [vmem:[#allocation27_spill] sm:$0xff]  ;;  %v10483_v44 = vld [vmem:[#allocation82_spill] sm:$0xff]  ;;  %v10505_v32 = vld [vmem:[#allocation60_spill] sm:$0xff] }
 0x4a5   :  { %v4528_v9 = vsub.f32 3.1415927, %v4526_v54  ;;  %6204 = vrcp.f32 %v4691_v23  ;;  %v4666_v16 = vsub.f32 1.5707964, %v4664_v57  ;;  %v4382_v6 = vadd.f32 %v4381_v55, %v8513_v21  ;;  %v10506_v39 = vld [vmem:[#allocation26_spill] sm:$0xff] }
 0x4a6   :  { %v4745_v35 = vadd.f32 0.04247222, %v4744_v11  ;;  %v4616_v47 = vmul.f32 %v4615_v3, %v8713_v61  ;;  %vm4722_vm13 = vcmp.ne.f32.partialorder %v8537_v5, %v8537_v5  ;;  %vm4817_vm10 = vcmp.ne.f32.partialorder %v8227_v27, %v8227_v27  ;;  %v10491_v11 = vld [vmem:[#allocation85_spill] sm:$0xff] }
 0x4a7   :  { %v8877_v19 = vsel %vm10018_vm1, %v4528_v9, %v4526_v54  ;;  %vm4383_vm6 = vcmp.gt.f32.partialorder %v10481_v49, %v10480_v40  ;;  %v4667_v55 = vsel %vm4665_vm14, %v4666_v16, %v4664_v57  ;;  %vm8895_vm1 = vmor %vm4722_vm13, %vm4723_vm5  ;;  %v10486_v41 = vmov 0  ;;  %v10490_v57 = vld [vmem:[#allocation32_spill] sm:$0xff] }
 0x4a8   :  { %10479 = vst [vmem:[#allocation132_spill] sm:$0xff] %v8877_v19  ;;  %v4746_v31 = vmul.f32 %v4745_v35, %v8816_v4  ;;  %v10487_v41 = vsel %vm8895_vm1, 4294967295, %v10486_v41  ;;  %v3395_v33 = vmul.f32 %v10489_v36, %v10489_v36  ;;  %v8902_v42 = vand.u32 2147483647, %v10489_v36  ;;  %v10492_v35 = vld [vmem:[#allocation55_spill] sm:$0xff] }
 0x4a9   :  { %10488 = vst [vmem:[#allocation27_spill] sm:$0xff] %v10487_v41  ;;  %v4335_v23 = vadd.f32 %v4334_v13, %v8531_v14  ;;  %v4476_v54 = vadd.f32 %v4475_v37, %v8582_v52  ;;  %v4669_v9 = vsub.f32 3.1415927, %v4667_v55  ;;  %v4617_v3 = vadd.f32 %v4616_v47, %v8713_v61  ;;  %v10493_v41 = vld [vmem:[#allocation20_spill] sm:$0xff]  ;;  %v10495_v13 = vld [vmem:[#allocation87_spill] sm:$0xff]  ;;  %v10496_v61 = vld [vmem:[#allocation81_spill] sm:$0xff] }
 0x4aa   :  { %v4747_v16 = vadd.f32 -0.074975304, %v4746_v31  ;;  %v8910_v63 = vadd.f32 %v10492_v35, %v3395_v33  ;;  %v4832_v56 = vmax.f32 %v8902_v42, %v10493_v41  ;;  %vm10032_vm5 = vcmp.lt.f32.partialorder %v10495_v13, 0.0  ;;  %v10497_v47 = vld [vmem:[#allocation109_spill] sm:$0xff] }
 0x4ab   :  { %v8918_v14 = vsel %vm10023_vm15, %v4669_v9, %v4667_v55  ;;  %v4619_v52 = vsub.f32 1.5707964, %v4617_v3  ;;  %vm4863_vm3 = vcmp.ne.f32.partialorder %v10489_v36, %v10489_v36  ;;  %v3394_v31 = vmul.f32 %v10497_v47, %v10497_v47  ;;  %v10504_v9 = vld [vmem:[#allocation65_spill] sm:$0xff] }
 0x4ac   :  { %10494 = vst [vmem:[#allocation74_spill] sm:$0xff] %v8918_v14  ;;  %v4748_v37 = vmul.f32 %v4747_v16, %v8816_v4  ;;  %6206 = vrcp.f32 %v4832_v56  ;;  %v4384_v55 = vsub.f32 1.5707964, %v4382_v6  ;;  %v4337_v33 = vsub.f32 1.5707964, %v4335_v23  ;;  %vm8937_vm13 = vmor %vm4863_vm3, %vm4864_vm12 }
 0x4ad   :  { %v4620_v60 = vsel %vm4618_vm0, %v4619_v52, %v4617_v3  ;;  %v10500_v16 = vmov 0  ;;  %v8942_v56 = vand.u32 2147483647, %v10497_v47  ;;  %vm4911_vm14 = vcmp.ne.f32.partialorder %v10503_v34, %v10503_v34 }
 0x4ae   :  { %v10501_v16 = vsel %vm8937_vm13, 4294967295, %v10500_v16  ;;  %v4478_v26 = vsub.f32 1.5707964, %v4476_v54  ;;  %v4622_v21 = vsub.f32 3.1415927, %v4620_v60  ;;  %v8948_v3 = vadd.f32 %v10504_v9, %v3394_v31 }
 0x4af   :  { %10502 = vst [vmem:[#allocation107_spill] sm:$0xff] %v10501_v16  ;;  %v4749_v14 = vadd.f32 0.1064488, %v4748_v37  ;;  %v6205_v52 = vpop.eup %6204  ;;  %v4785_v35 = vmax.f32 %v8942_v56, %v10505_v32  ;;  %vm4816_vm12 = vcmp.ne.f32.partialorder %v10497_v47, %v10497_v47  ;;  %vm10043_vm15 = vcmp.lt.f32.partialorder %v10506_v39, 0.0 }
 0x4b0   :  { %v8962_v37 = vsel %vm10032_vm5, %v4622_v21, %v4620_v60  ;;  %v10508_v9 = vmin.f32 %v8848_v22, %v8415_v0  ;;  %vm8973_vm3 = vmor %vm4816_vm12, %vm4817_vm10  ;;  %v10509_v10 = vmov 0  ;;  %v3397_v17 = vmul.f32 %v10512_v50, %v10512_v50 }
 0x4b1   :  { %10507 = vst [vmem:[#allocation55_spill] sm:$0xff] %v8962_v37  ;;  %v4750_v31 = vmul.f32 %v4749_v14, %v8816_v4  ;;  %v10510_v10 = vsel %vm8973_vm3, 4294967295, %v10509_v10  ;;  %v4385_v60 = vsel %vm4383_vm6, %v4384_v55, %v4382_v6  ;;  %vm10513_vm5 = vcmp.gt.f32.partialorder %v10483_v44, %v10482_v53  ;;  %v10515_v55 = vld [vmem:[#allocation99_spill] sm:$0xff] }
 0x4b2   :  { %v8968_v16 = vmul.f32 %v6205_v52, %v10508_v9  ;;  %10511 = vst [vmem:[#allocation109_spill] sm:$0xff] %v10510_v10  ;;  %v4338_v21 = vsel %vm10513_vm5, %v4337_v33, %v4335_v23  ;;  %6208 = vrcp.f32 %v4785_v35  ;;  %v8987_v14 = vand.u32 2147483647, %v10512_v50  ;;  %v10516_v23 = vld [vmem:[#allocation72_spill] sm:$0xff] }
 0x4b3   :  { %vm10514_vm10 = vcmp.gt.f32.partialorder %v10491_v11, %v10490_v57  ;;  %v4751_v9 = vadd.f32 -0.14207031, %v4750_v31  ;;  %v8998_v10 = vadd.f32 %v10515_v55, %v3397_v17  ;;  %vm4957_vm5 = vcmp.ne.f32.partialorder %v10512_v50, %v10512_v50  ;;  %v10521_v31 = vld [vmem:[#allocation115_spill] sm:$0xff]  ;;  %v10547_v11 = vld [vmem:[#allocation120_spill] sm:$0xff] }
 0x4b4   :  { %v4479_v52 = vsel %vm10514_vm10, %v4478_v26, %v4476_v54  ;;  %v8995_v6 = vmul.f32 %v8968_v16, %v8968_v16  ;;  %v4926_v35 = vmax.f32 %v8987_v14, %v10516_v23  ;;  %vm10517_vm10 = vcmp.ne.f32.partialorder %v10496_v61, %v10496_v61  ;;  %v10522_v61 = vld [vmem:[#allocation104_spill] sm:$0xff] }
 0x4b5   :  { %v4752_v26 = vmul.f32 %v4751_v9, %v8816_v4  ;;  %vm9013_vm12 = vmor %vm4957_vm5, %vm10517_vm10  ;;  %v10518_v17 = vmov 0  ;;  %v3396_v55 = vmul.f32 %v10521_v31, %v10521_v31  ;;  %v9020_v33 = vand.u32 2147483647, %v10521_v31 }
 0x4b6   :  { %v4695_v54 = vmul.f32 0.002785687, %v8995_v6  ;;  %v10519_v17 = vsel %vm9013_vm12, 4294967295, %v10518_v17  ;;  %v4387_v27 = vsub.f32 3.1415927, %v4385_v60  ;;  %6210 = vrcp.f32 %v4926_v35  ;;  %v6207_v9 = vpop.eup %6206 }
 0x4b7   :  { %10520 = vst [vmem:[#allocation65_spill] sm:$0xff] %v10519_v17  ;;  %v4340_v37 = vsub.f32 3.1415927, %v4338_v21  ;;  %vm4910_vm6 = vcmp.ne.f32.partialorder %v10521_v31, %v10521_v31  ;;  %v4753_v19 = vadd.f32 0.19993454, %v4752_v26  ;;  %v9025_v1 = vadd.f32 %v10522_v61, %v3396_v55 }
 0x4b8   :  { %v4696_v20 = vadd.f32 -0.015866, %v4695_v54  ;;  %vm9032_vm5 = vmor %vm4910_vm6, %vm4911_vm14  ;;  %v10525_v29 = vmov 0  ;;  %v4481_v35 = vsub.f32 3.1415927, %v4479_v52  ;;  %v10528_v58 = vmin.f32 %v8902_v42, %v10493_v41 }
 0x4b9   :  { %10523 = vst [vmem:[#allocation60_spill] sm:$0xff] %v9025_v1  ;;  %v10526_v29 = vsel %vm9032_vm5, 4294967295, %v10525_v29  ;;  %v4879_v61 = vmax.f32 %v9020_v33, %v10524_v15  ;;  %vm10529_vm0 = vcmp.lt.s32.totalorder %v8473_v48, 0  ;;  %v4754_v54 = vmul.f32 %v4753_v19, %v8816_v4  ;;  %v10541_v48 = vld [vmem:[#allocation119_spill] sm:$0xff] }
 0x4ba   :  { %10527 = vst [vmem:[#allocation26_spill] sm:$0xff] %v10526_v29  ;;  %v9039_v46 = vmul.f32 %v6207_v9, %v10528_v58  ;;  %v9048_v26 = vsel %vm10529_vm0, 3.1415927, %v10464_v7  ;;  %v4697_v55 = vmul.f32 %v4696_v20, %v8995_v6  ;;  %6212 = vrsqrt.f32 %v8724_v12  ;;  %v10533_v29 = vld [vmem:[#allocation84_spill] sm:$0xff] }
 0x4bb   :  { %10530 = vst [vmem:[#allocation114_spill] sm:$0xff] %v9048_v26  ;;  %v9055_v58 = vsel %vm10043_vm15, %v4387_v27, %v4385_v60  ;;  %vm10531_vm14 = vcmp.lt.s32.totalorder %v10495_v13, 0  ;;  %6214 = vrcp.f32 %v4879_v61  ;;  %vm5052_vm0 = vcmp.ne.f32.partialorder %v10533_v29, %v10533_v29 }
 0x4bc   :  { %v9060_v9 = vsel %vm10531_vm14, 3.1415927, %v10464_v7  ;;  %v9064_v17 = vmul.f32 %v9039_v46, %v9039_v46  ;;  %vm10534_vm6 = vcmp.lt.f32.partialorder %v8336_v51, 0.0  ;;  %v4755_v19 = vadd.f32 -0.33333147, %v4754_v54  ;;  %v6209_v34 = vpop.eup %6208 }
 0x4bd   :  { %10532 = vst [vmem:[#allocation99_spill] sm:$0xff] %v9060_v9  ;;  %v9070_v20 = vsel %vm10534_vm6, %v4340_v37, %v4338_v21  ;;  %vm10536_vm15 = vcmp.lt.s32.totalorder %v8526_v43, 0  ;;  %v4698_v60 = vadd.f32 0.04247222, %v4697_v55  ;;  %vm10538_vm14 = vcmp.lt.f32.partialorder %v8375_v62, 0.0  ;;  %v10540_v9 = vld [vmem:[#allocation123_spill] sm:$0xff] }
 0x4be   :  { %10535 = vst [vmem:[#allocation72_spill] sm:$0xff] %v9070_v20  ;;  %v9075_v27 = vsel %vm10536_vm15, 3.1415927, %v10464_v7  ;;  %v9079_v13 = vsel %vm10538_vm14, %v4481_v35, %v4479_v52  ;;  %v4836_v61 = vmul.f32 0.002785687, %v9064_v17  ;;  %6216 = vrsqrt.f32 %v10540_v9 }
 0x4bf   :  { %10537 = vst [vmem:[#allocation115_spill] sm:$0xff] %v9075_v27  ;;  %10539 = vst [vmem:[#allocation104_spill] sm:$0xff] %v9079_v13  ;;  %v3399_v37 = vmul.f32 %v10541_v48, %v10541_v48  ;;  %v4756_v21 = vmul.f32 %v4755_v19, %v8816_v4  ;;  %v4699_v54 = vmul.f32 %v4698_v60, %v8995_v6  ;;  %vm3441_vm15 = vcmp.eq.f32.partialorder %v8724_v12, inf }
 0x4c0   :  { %v10542_v27 = vmin.f32 %v8942_v56, %v10505_v32  ;;  %v9094_v52 = vand.u32 2147483647, %v10541_v48  ;;  %v4837_v35 = vadd.f32 -0.015866, %v4836_v61  ;;  %v3444_v26 = vand.u32 2147483648, %v8724_v12  ;;  %v6211_v61 = vpop.eup %6210 }
 0x4c1   :  { %v9099_v28 = vadd.f32 %v10543_v59, %v3399_v37  ;;  %v4757_v4 = vmul.f32 %v4756_v21, %v8806_v8  ;;  %v4700_v19 = vadd.f32 -0.074975304, %v4699_v54  ;;  %v3437_v24 = vand.u32 2147483648, %v10540_v9 }
 0x4c2   :  { %v9090_v55 = vmul.f32 %v6209_v34, %v10542_v27  ;;  %v10545_v27 = vld [vmem:[#allocation108_spill] sm:$0xff]  ;;  %v4838_v30 = vmul.f32 %v4837_v35, %v9064_v17  ;;  %v10546_v60 = vmin.f32 %v8987_v14, %v10516_v23  ;;  %vm5051_vm6 = vcmp.ne.f32.partialorder %v10541_v48, %v10541_v48 }
 0x4c3   :  { %10544 = vst [vmem:[#allocation102_spill] sm:$0xff] %v9099_v28  ;;  %v5020_v59 = vmax.f32 %v9094_v52, %v10545_v27  ;;  %v4758_v37 = vadd.f32 %v4757_v4, %v8806_v8  ;;  %v4701_v21 = vmul.f32 %v4700_v19, %v8995_v6  ;;  %v3398_v57 = vmul.f32 %v10547_v11, %v10547_v11  ;;  %vm9136_vm14 = vmor %vm5051_vm6, %vm5052_vm0 }
 0x4c4   :  { %v9105_v34 = vmul.f32 %v9090_v55, %v9090_v55  ;;  %v9121_v28 = vmul.f32 %v6211_v61, %v10546_v60  ;;  %v4839_v35 = vadd.f32 0.04247222, %v4838_v30  ;;  %v6213_v8 = vpop.eup %6212  ;;  %v10548_v30 = vmov 0 }
 0x4c5   :  { %6218 = vrcp.f32 %v5020_v59  ;;  %v4760_v4 = vsub.f32 1.5707964, %v4758_v37  ;;  %v4702_v19 = vadd.f32 0.1064488, %v4701_v21  ;;  %v10549_v30 = vsel %vm9136_vm14, 4294967295, %v10548_v30  ;;  %v6215_v60 = vpop.eup %6214  ;;  %v10551_v21 = vld [vmem:[#allocation116_spill] sm:$0xff] }
 0x4c6   :  { %v4789_v54 = vmul.f32 0.002785687, %v9105_v34  ;;  %v9130_v44 = vmul.f32 %v9121_v28, %v9121_v28  ;;  %10550 = vst [vmem:[#allocation123_spill] sm:$0xff] %v10549_v30  ;;  %v4840_v61 = vmul.f32 %v4839_v35, %v9064_v17  ;;  %v3440_v59 = vmul.f32 %v6213_v8, %v8724_v12 }
 0x4c7   :  { %v9146_v38 = vand.u32 2147483647, %v10547_v11  ;;  %vm10552_vm10 = vcmp.gt.f32.partialorder %v8412_v18, %v8651_v45  ;;  %v4703_v29 = vmul.f32 %v4702_v19, %v8995_v6  ;;  %vm10555_vm0 = vcmp.lt.f32.partialorder %v8526_v43, 0.0 }
 0x4c8   :  { %v4790_v13 = vadd.f32 -0.015866, %v4789_v54  ;;  %v9143_v54 = vadd.f32 %v10551_v21, %v3398_v57  ;;  %v4761_v20 = vsel %vm10552_vm10, %v4760_v4, %v4758_v37  ;;  %v4930_v30 = vmul.f32 0.002785687, %v9130_v44  ;;  %v6217_v62 = vpop.eup %6216 }
 0x4c9   :  { %v4763_v35 = vsub.f32 3.1415927, %v4761_v20  ;;  %v4841_v1 = vadd.f32 -0.074975304, %v4840_v61  ;;  %v10553_v57 = vmin.f32 %v9020_v33, %v10524_v15  ;;  %v3442_v21 = vsel %vm3441_vm15, %v8724_v12, %v3440_v59 }
 0x4ca   :  { %v4791_v53 = vmul.f32 %v4790_v13, %v9105_v34  ;;  %v4704_v18 = vadd.f32 -0.14207031, %v4703_v29  ;;  %v4931_v4 = vadd.f32 -0.015866, %v4930_v30  ;;  %vm10554_vm10 = vcmp.eq.f32.partialorder %v8724_v12, 0.0 }
 0x4cb   :  { %v9157_v8 = vmul.f32 %v6215_v60, %v10553_v57  ;;  %v3445_v13 = vsel %vm10554_vm10, %v3444_v26, %v3442_v21  ;;  %v9166_v19 = vsel %vm10555_vm0, %v4763_v35, %v4761_v20  ;;  %vm4718_vm6 = vcmp.lt.s32.totalorder %v8537_v5, 0  ;;  %v10557_v57 = vld [vmem:[#allocation52_spill] sm:$0xff] }
 0x4cc   :  { %v4792_v37 = vadd.f32 0.04247222, %v4791_v53  ;;  %10556 = vst [vmem:[#allocation119_spill] sm:$0xff] %v9166_v19  ;;  %v4842_v61 = vmul.f32 %v4841_v1, %v9064_v17  ;;  %v3545_v59 = vsub.f32 %v10557_v57, %v3445_v13  ;;  %v4705_v29 = vmul.f32 %v4704_v18, %v8995_v6  ;;  %v10558_v21 = vld [vmem:[#allocation112_spill] sm:$0xff] }
 0x4cd   :  { %v9172_v60 = vmul.f32 %v9157_v8, %v9157_v8  ;;  %v4932_v12 = vmul.f32 %v4931_v4, %v9130_v44  ;;  %v3433_v26 = vmul.f32 %v6217_v62, %v10540_v9  ;;  %vm10559_vm15 = vcmp.eq.f32.partialorder %v10540_v9, inf }
 0x4ce   :  { %v4793_v53 = vmul.f32 %v4792_v37, %v9105_v34  ;;  %v4843_v20 = vadd.f32 0.1064488, %v4842_v61  ;;  %v5081_v35 = vand.u32 2147483647, %v3545_v59  ;;  %v4706_v43 = vadd.f32 0.19993454, %v4705_v29 }
 0x4cf   :  { %v4883_v30 = vmul.f32 0.002785687, %v9172_v60  ;;  %v4933_v19 = vadd.f32 0.04247222, %v4932_v12  ;;  %v3435_v18 = vsel %vm10559_vm15, %v10540_v9, %v3433_v26  ;;  %v6219_v13 = vpop.eup %6218  ;;  %vm10560_vm10 = vcmask 130048  }
 0x4d0   :  { %v4794_v45 = vadd.f32 -0.074975304, %v4793_v53  ;;  %v4844_v37 = vmul.f32 %v4843_v20, %v9064_v17  ;;  %v5115_v62 = vsel %vm10560_vm10, %v5081_v35, 0.0  ;;  %vm10561_vm0 = vcmp.eq.f32.partialorder %v10540_v9, 0.0  ;;  %v10562_v53 = vld [vmem:[#allocation21_spill] sm:$0xff]  ;;  %v10564_v9 = vld [vmem:[#allocation63_spill] sm:$0xff] }
 0x4d1   :  { %v4884_v4 = vadd.f32 -0.015866, %v4883_v30  ;;  %v3438_v61 = vsel %vm10561_vm0, %v3437_v24, %v3435_v18  ;;  %v4707_v57 = vmul.f32 %v4706_v43, %v8995_v6  ;;  %v4934_v29 = vmul.f32 %v4933_v19, %v9130_v44  ;;  %5116 = vadd.xlane.f32.xlu1 %v5115_v62  ;;  %vm10565_vm0 = vmmov %vm10560_vm10 }
 0x4d2   :  { %v4795_v59 = vmul.f32 %v4794_v45, %v9105_v34  ;;  %v3544_v12 = vsub.f32 %v10562_v53, %v3438_v61  ;;  %v4845_v1 = vadd.f32 -0.14207031, %v4844_v37  ;;  %v10563_v20 = vmin.f32 %v9094_v52, %v10545_v27 }
 0x4d3   :  { %v4885_v26 = vmul.f32 %v4884_v4, %v9172_v60  ;;  %v4973_v24 = vmax.f32 %v9146_v38, %v10558_v21  ;;  %v4708_v43 = vadd.f32 -0.33333147, %v4707_v57  ;;  %v4935_v19 = vadd.f32 -0.074975304, %v4934_v29 }
 0x4d4   :  { %v9197_v30 = vmul.f32 %v6219_v13, %v10563_v20  ;;  %v4796_v45 = vadd.f32 0.1064488, %v4795_v59  ;;  %v4846_v35 = vmul.f32 %v4845_v1, %v9064_v17  ;;  %v5080_v37 = vand.u32 2147483647, %v3544_v12 }
 0x4d5   :  { %v4886_v18 = vadd.f32 0.04247222, %v4885_v26  ;;  %v4709_v4 = vmul.f32 %v4708_v43, %v8995_v6  ;;  %v4936_v61 = vmul.f32 %v4935_v19, %v9130_v44  ;;  %6220 = vrcp.f32 %v4973_v24 }
 0x4d6   :  { %v9208_v13 = vmul.f32 %v9197_v30, %v9197_v30  ;;  %v4797_v62 = vmul.f32 %v4796_v45, %v9105_v34  ;;  %v4847_v57 = vadd.f32 0.19993454, %v4846_v35  ;;  %v5112_v29 = vsel %vm10565_vm0, %v5080_v37, 0.0 }
 0x4d7   :  { %v4887_v59 = vmul.f32 %v4886_v18, %v9172_v60  ;;  %v4710_v53 = vmul.f32 %v4709_v4, %v8968_v16  ;;  %v9221_v6 = vsel %vm4718_vm6, 3.1415927, %v10464_v7  ;;  %v4937_v26 = vadd.f32 0.1064488, %v4936_v61  ;;  %5113 = vadd.xlane.f32.xlu0 %v5112_v29 }
 0x4d8   :  { %v5024_v1 = vmul.f32 0.002785687, %v9208_v13  ;;  %v4798_v12 = vadd.f32 -0.14207031, %v4797_v62  ;;  %v4848_v20 = vmul.f32 %v4847_v57, %v9064_v17  ;;  %vm5004_vm6 = vcmp.ne.f32.partialorder %v10547_v11, %v10547_v11 }
 0x4d9   :  { %v4888_v24 = vadd.f32 -0.074975304, %v4887_v59  ;;  %v4711_v45 = vadd.f32 %v4710_v53, %v8968_v16  ;;  %v4938_v35 = vmul.f32 %v4937_v26, %v9130_v44  ;;  %vm10566_vm10 = vcmp.ne.f32.partialorder %v10564_v9, %v10564_v9  ;;  %v10776_v16 = vld [vmem:[#allocation40_spill] sm:$0xff] }
 0x4da   :  { %v5025_v43 = vadd.f32 -0.015866, %v5024_v1  ;;  %v4799_v19 = vmul.f32 %v4798_v12, %v9105_v34  ;;  %v4849_v18 = vadd.f32 -0.33333147, %v4848_v20  ;;  %vm9236_vm15 = vmor %vm5004_vm6, %vm10566_vm10  ;;  %6222 = vrsqrt.f32 %v8771_v25 }
 0x4db   :  { %v4889_v37 = vmul.f32 %v4888_v24, %v9172_v60  ;;  %v4713_v62 = vsub.f32 1.5707964, %v4711_v45  ;;  %v4939_v57 = vadd.f32 -0.14207031, %v4938_v35  ;;  %vm10569_vm0 = vcmp.lt.s32.totalorder %v10489_v36, 0 }
 0x4dc   :  { %v5026_v4 = vmul.f32 %v5025_v43, %v9208_v13  ;;  %v4800_v61 = vadd.f32 0.19993454, %v4799_v19  ;;  %v4850_v59 = vmul.f32 %v4849_v18, %v9064_v17  ;;  %v9245_v29 = vsel %vm10569_vm0, 3.1415927, %v10464_v7 }
 0x4dd   :  { %10570 = vst [vmem:[#allocation111_spill] sm:$0xff] %v9245_v29  ;;  %v4890_v1 = vadd.f32 0.1064488, %v4889_v37  ;;  %vm10571_vm14 = vcmp.gt.f32.partialorder %v8415_v0, %v8848_v22  ;;  %vm10572_vm10 = vcmp.lt.s32.totalorder %v10497_v47, 0  ;;  %v4940_v17 = vmul.f32 %v4939_v57, %v9130_v44 }
 0x4de   :  { %v5027_v53 = vadd.f32 0.04247222, %v5026_v4  ;;  %v4714_v12 = vsel %vm10571_vm14, %v4713_v62, %v4711_v45  ;;  %v4801_v26 = vmul.f32 %v4800_v61, %v9105_v34  ;;  %v9254_v20 = vsel %vm10572_vm10, 3.1415927, %v10464_v7 }
 0x4df   :  { %10573 = vst [vmem:[#allocation108_spill] sm:$0xff] %v9254_v20  ;;  %v4716_v24 = vsub.f32 3.1415927, %v4714_v12  ;;  %v4851_v43 = vmul.f32 %v4850_v59, %v9039_v46  ;;  %v4891_v19 = vmul.f32 %v4890_v1, %v9172_v60  ;;  %v6221_v18 = vpop.eup %6220  ;;  %v4941_v37 = vadd.f32 0.19993454, %v4940_v17 }
 0x4e0   :  { %v5028_v35 = vmul.f32 %v5027_v53, %v9208_v13  ;;  %v4802_v45 = vadd.f32 -0.33333147, %v4801_v26  ;;  %vm4953_vm14 = vcmp.lt.s32.totalorder %v10512_v50, 0  ;;  %vm10574_vm6 = vcmp.lt.f32.partialorder %v8537_v5, 0.0  ;;  %v10576_v26 = vld [vmem:[#allocation37_spill] sm:$0xff] }
 0x4e1   :  { %v9264_v4 = vsel %vm10574_vm6, %v4716_v24, %v4714_v12  ;;  %v4852_v62 = vadd.f32 %v4851_v43, %v9039_v46  ;;  %v4892_v61 = vadd.f32 -0.14207031, %v4891_v19  ;;  %v4942_v1 = vmul.f32 %v4941_v37, %v9130_v44 }
 0x4e2   :  { %v5029_v57 = vadd.f32 -0.074975304, %v5028_v35  ;;  %v4803_v59 = vmul.f32 %v4802_v45, %v9105_v34  ;;  %v10575_v53 = vmin.f32 %v9146_v38, %v10558_v21  ;;  %6224 = vrsqrt.f32 %v10576_v26 }
 0x4e3   :  { %v4854_v17 = vsub.f32 1.5707964, %v4852_v62  ;;  %v9276_v29 = vsel %vm4953_vm14, 3.1415927, %v10464_v7  ;;  %v4893_v12 = vmul.f32 %v4892_v61, %v9172_v60  ;;  %v4943_v34 = vadd.f32 -0.33333147, %v4942_v1 }
 0x4e4   :  { %v9272_v20 = vmul.f32 %v6221_v18, %v10575_v53  ;;  %10577 = vst [vmem:[#allocation120_spill] sm:$0xff] %v9276_v29  ;;  %v5030_v46 = vmul.f32 %v5029_v57, %v9208_v13  ;;  %v4804_v24 = vmul.f32 %v4803_v59, %v9090_v55  ;;  %vm3455_vm6 = vcmp.eq.f32.partialorder %v8771_v25, inf  ;;  %v6223_v37 = vpop.eup %6222 }
 0x4e5   :  { %vm10578_vm0 = vcmp.gt.f32.partialorder %v10493_v41, %v8902_v42  ;;  %v4894_v35 = vadd.f32 0.19993454, %v4893_v12  ;;  %v3458_v45 = vand.u32 2147483648, %v8771_v25  ;;  %v4944_v59 = vmul.f32 %v4943_v34, %v9130_v44  ;;  %v10579_v41 = vld [vmem:[#allocation76_spill] sm:$0xff] }
 0x4e6   :  { %v9284_v43 = vmul.f32 %v9272_v20, %v9272_v20  ;;  %v4855_v19 = vsel %vm10578_vm0, %v4854_v17, %v4852_v62  ;;  %v5031_v18 = vadd.f32 0.1064488, %v5030_v46  ;;  %v4805_v57 = vadd.f32 %v4804_v24, %v9090_v55 }
 0x4e7   :  { %v4857_v61 = vsub.f32 3.1415927, %v4855_v19  ;;  %v4895_v53 = vmul.f32 %v4894_v35, %v9172_v60  ;;  %v3454_v0 = vmul.f32 %v6223_v37, %v8771_v25  ;;  %6226 = vrsqrt.f32 %v10579_v41 }
 0x4e8   :  { %v4977_v1 = vmul.f32 0.002785687, %v9284_v43  ;;  %v5032_v29 = vmul.f32 %v5031_v18, %v9208_v13  ;;  %vm10580_vm0 = vcmp.lt.f32.partialorder %v10489_v36, 0.0  ;;  %v4807_v17 = vsub.f32 1.5707964, %v4805_v57 }
 0x4e9   :  { %v9300_v62 = vsel %vm10580_vm0, %v4857_v61, %v4855_v19  ;;  %v4945_v12 = vmul.f32 %v4944_v59, %v9121_v28  ;;  %v4896_v55 = vadd.f32 -0.33333147, %v4895_v53  ;;  %v3456_v24 = vsel %vm3455_vm6, %v8771_v25, %v3454_v0  ;;  %v10582_v59 = vld [vmem:[#allocation75_spill] sm:$0xff] }
 0x4ea   :  { %v4978_v44 = vadd.f32 -0.015866, %v4977_v1  ;;  %v5033_v46 = vadd.f32 -0.14207031, %v5032_v29  ;;  %vm3457_vm10 = vcmp.eq.f32.partialorder %v8771_v25, 0.0  ;;  %vm10581_vm5 = vcmp.gt.f32.partialorder %v10505_v32, %v8942_v56 }
 0x4eb   :  { %v4808_v34 = vsel %vm10581_vm5, %v4807_v17, %v4805_v57  ;;  %v4946_v19 = vadd.f32 %v4945_v12, %v9121_v28  ;;  %v3459_v18 = vsel %vm3457_vm10, %v3458_v45, %v3456_v24  ;;  %v4897_v29 = vmul.f32 %v4896_v55, %v9172_v60 }
 0x4ec   :  { %v4979_v35 = vmul.f32 %v4978_v44, %v9284_v43  ;;  %v4810_v37 = vsub.f32 3.1415927, %v4808_v34  ;;  %v5034_v61 = vmul.f32 %v5033_v46, %v9208_v13  ;;  %v3547_v0 = vsub.f32 %v10582_v59, %v3459_v18  ;;  %v6225_v1 = vpop.eup %6224  ;;  %v10585_v46 = vld [vmem:[#allocation98_spill] sm:$0xff] }
 0x4ed   :  { %v4948_v25 = vsub.f32 1.5707964, %v4946_v19  ;;  %vm3448_vm5 = vcmp.eq.f32.partialorder %v10576_v26, inf  ;;  %v3451_v28 = vand.u32 2147483648, %v10576_v26  ;;  %vm10583_vm0 = vcmp.lt.f32.partialorder %v10497_v47, 0.0 }
 0x4ee   :  { %v4980_v53 = vadd.f32 0.04247222, %v4979_v35  ;;  %v9322_v57 = vsel %vm10583_vm0, %v4810_v37, %v4808_v34  ;;  %v4898_v45 = vmul.f32 %v4897_v29, %v9157_v8  ;;  %v5035_v60 = vadd.f32 0.19993454, %v5034_v61 }
 0x4ef   :  { %v5083_v17 = vand.u32 2147483647, %v3547_v0  ;;  %vm10584_vm14 = vcmp.gt.f32.partialorder %v10516_v23, %v8987_v14  ;;  %v3447_v55 = vmul.f32 %v6225_v1, %v10576_v26  ;;  %6228 = vrsqrt.f32 %v10585_v46 }
 0x4f0   :  { %v4949_v12 = vsel %vm10584_vm14, %v4948_v25, %v4946_v19  ;;  %v4981_v44 = vmul.f32 %v4980_v53, %v9284_v43  ;;  %v4899_v34 = vadd.f32 %v4898_v45, %v9157_v8  ;;  %v5036_v35 = vmul.f32 %v5035_v60, %v9208_v13  ;;  %v10588_v25 = vld [vmem:[#allocation77_spill] sm:$0xff] }
 0x4f1   :  { %v4951_v24 = vsub.f32 3.1415927, %v4949_v12  ;;  %vm10586_vm0 = vcmask 130048   ;;  %v3449_v29 = vsel %vm3448_vm5, %v10576_v26, %v3447_v55  ;;  %vm3450_vm14 = vcmp.eq.f32.partialorder %v10576_v26, 0.0  ;;  %v6227_v19 = vpop.eup %6226 }
 0x4f2   :  { %v5121_v18 = vsel %vm10586_vm0, %v5083_v17, 0.0  ;;  %v4982_v37 = vadd.f32 -0.074975304, %v4981_v44  ;;  %vm3469_vm6 = vcmp.eq.f32.partialorder %v10579_v41, inf  ;;  %vm10587_vm10 = vcmp.lt.f32.partialorder %v10512_v50, 0.0 }
 0x4f3   :  { %5122 = vadd.xlane.f32.xlu0 %v5121_v18  ;;  %v9342_v61 = vsel %vm10587_vm10, %v4951_v24, %v4949_v12  ;;  %v4901_v8 = vsub.f32 1.5707964, %v4899_v34  ;;  %v5037_v59 = vadd.f32 -0.33333147, %v5036_v35  ;;  %v3452_v0 = vsel %vm3450_vm14, %v3451_v28, %v3449_v29  ;;  %v10590_v12 = vld [vmem:[#allocation105_spill] sm:$0xff] }
 0x4f4   :  { %v4983_v1 = vmul.f32 %v4982_v37, %v9284_v43  ;;  %v3546_v53 = vsub.f32 %v10588_v25, %v3452_v0  ;;  %v3468_v45 = vmul.f32 %v6227_v19, %v10579_v41  ;;  %vm3471_vm5 = vcmp.eq.f32.partialorder %v10579_v41, 0.0  ;;  %v10594_v19 = vld [vmem:[#allocation46_spill] sm:$0xff]  ;;  %v10596_v0 = vld [vmem:[#allocation113_spill] sm:$0xff] }
 0x4f5   :  { %vm10589_vm0 = vcmp.gt.f32.partialorder %v10524_v15, %v9020_v33  ;;  %v5038_v60 = vmul.f32 %v5037_v59, %v9208_v13  ;;  %v3472_v17 = vand.u32 2147483648, %v10579_v41  ;;  %6230 = vrsqrt.f32 %v10590_v12 }
 0x4f6   :  { %v4902_v26 = vsel %vm10589_vm0, %v4901_v8, %v4899_v34  ;;  %v4984_v28 = vadd.f32 0.1064488, %v4983_v1  ;;  %v5082_v55 = vand.u32 2147483647, %v3546_v53  ;;  %v3470_v24 = vsel %vm3469_vm6, %v10579_v41, %v3468_v45  ;;  %v10597_v45 = vld [vmem:[#allocation121_spill] sm:$0xff] }
 0x4f7   :  { %v4904_v44 = vsub.f32 3.1415927, %v4902_v26  ;;  %vm10591_vm10 = vcmp.lt.s32.totalorder %v10521_v31, 0  ;;  %v5039_v34 = vmul.f32 %v5038_v60, %v9197_v30  ;;  %v3473_v13 = vsel %vm3471_vm5, %v3472_v17, %v3470_v24  ;;  %v10598_v17 = vld [vmem:[#allocation45_spill] sm:$0xff] }
 0x4f8   :  { %v9360_v35 = vsel %vm10591_vm10, 3.1415927, %v10464_v7  ;;  %vm10592_vm0 = vcmp.lt.f32.partialorder %v10521_v31, 0.0  ;;  %v4985_v37 = vmul.f32 %v4984_v28, %v9284_v43  ;;  %vm10593_vm12 = vcmask 130048  }
 0x4f9   :  { %v9366_v18 = vsel %vm10592_vm0, %v4904_v44, %v4902_v26  ;;  %v5118_v29 = vsel %vm10593_vm12, %v5082_v55, 0.0  ;;  %v3549_v41 = vsub.f32 %v10594_v19, %v3473_v13  ;;  %v5040_v8 = vadd.f32 %v5039_v34, %v9197_v30  ;;  %v6229_v1 = vpop.eup %6228  ;;  %vm10599_vm14 = vmmov %vm10593_vm12 }
 0x4fa   :  { %vm10595_vm6 = vcmp.lt.s32.totalorder %v10547_v11, 0  ;;  %5119 = vadd.xlane.f32.xlu0 %v5118_v29  ;;  %6232 = vrsqrt.f32 %v10596_v0  ;;  %v4986_v25 = vadd.f32 -0.14207031, %v4985_v37  ;;  %v3461_v26 = vmul.f32 %v6229_v1, %v10585_v46 }
 0x4fb   :  { %v9375_v59 = vsel %vm10595_vm6, 3.1415927, %v10464_v7  ;;  %v5085_v53 = vand.u32 2147483647, %v3549_v41  ;;  %6234 = vrsqrt.f32 %v10597_v45  ;;  %v5042_v30 = vsub.f32 1.5707964, %v5040_v8 }
 0x4fc   :  { %v3465_v60 = vand.u32 2147483648, %v10585_v46  ;;  %v4987_v44 = vmul.f32 %v4986_v25, %v9284_v43  ;;  %vm3485_vm10 = vcmp.eq.f32.partialorder %v10590_v12, 0.0  ;;  %6236 = vrsqrt.f32 %v8852_v2 }
 0x4fd   :  { %v5127_v28 = vsel %vm10599_vm14, %v5085_v53, 0.0  ;;  %vm10600_vm5 = vcmp.gt.f32.partialorder %v10545_v27, %v9094_v52  ;;  %vm10601_vm0 = vcmp.eq.f32.partialorder %v10585_v46, inf  ;;  %v3486_v34 = vand.u32 2147483648, %v10590_v12 }
 0x4fe   :  { %v5043_v55 = vsel %vm10600_vm5, %v5042_v30, %v5040_v8  ;;  %5128 = vadd.xlane.f32.xlu0 %v5127_v28  ;;  %v3463_v24 = vsel %vm10601_vm0, %v10585_v46, %v3461_v26  ;;  %v4988_v37 = vadd.f32 0.19993454, %v4987_v44  ;;  %vm10602_vm14 = vcmp.eq.f32.partialorder %v10585_v46, 0.0  ;;  %v10603_v8 = vld [vmem:[#allocation23_spill] sm:$0xff] }
 0x4ff   :  { %v5045_v13 = vsub.f32 3.1415927, %v5043_v55  ;;  %v3466_v29 = vsel %vm10602_vm14, %v3465_v60, %v3463_v24  ;;  %v3479_v19 = vand.u32 2147483648, %v10596_v0  ;;  %v6231_v41 = vpop.eup %6230  ;;  %6238 = vrsqrt.f32 %v8910_v63 }
 0x500   :  { %v3548_v1 = vsub.f32 %v10603_v8, %v3466_v29  ;;  %vm10604_vm6 = vcmp.lt.f32.partialorder %v10541_v48, 0.0  ;;  %v4989_v46 = vmul.f32 %v4988_v37, %v9284_v43  ;;  %v3482_v53 = vmul.f32 %v6231_v41, %v10590_v12  ;;  %v10607_v8 = vld [vmem:[#allocation56_spill] sm:$0xff] }
 0x501   :  { %v9411_v25 = vsel %vm10604_vm6, %v5045_v13, %v5043_v55  ;;  %v3500_v30 = vand.u32 2147483648, %v10597_v45  ;;  %6240 = vrsqrt.f32 %v8948_v3  ;;  %vm10605_vm0 = vcmp.eq.f32.partialorder %v10590_v12, inf  ;;  %vm10606_vm6 = vmmov %vm10593_vm12 }
 0x502   :  { %v5084_v26 = vand.u32 2147483647, %v3548_v1  ;;  %v4990_v60 = vadd.f32 -0.33333147, %v4989_v46  ;;  %v3484_v44 = vsel %vm10605_vm0, %v10590_v12, %v3482_v53  ;;  %v3493_v28 = vand.u32 2147483648, %v8852_v2 }
 0x503   :  { %6242 = vrsqrt.f32 %v8998_v10  ;;  %v3487_v13 = vsel %vm3485_vm10, %v3486_v34, %v3484_v44  ;;  %v3514_v37 = vand.u32 2147483648, %v8910_v63  ;;  %v3507_v53 = vand.u32 2147483648, %v8948_v3  ;;  %v10612_v34 = vld [vmem:[#allocation122_spill] sm:$0xff] }
 0x504   :  { %v6233_v55 = vpop.eup %6232  ;;  %v5124_v24 = vsel %vm10606_vm6, %v5084_v26, 0.0  ;;  %v4991_v41 = vmul.f32 %v4990_v60, %v9284_v43  ;;  %v3551_v1 = vsub.f32 %v10607_v8, %v3487_v13  ;;  %vm10608_vm6 = vcmp.ne.f32.partialorder %v10598_v17, %v10598_v17 }
 0x505   :  { %v6235_v29 = vpop.eup %6234  ;;  %5125 = vadd.xlane.f32.xlu0 %v5124_v24  ;;  %v3475_v46 = vmul.f32 %v6233_v55, %v10596_v0  ;;  %vm10609_vm10 = vcmp.ne.f32.partialorder %v10506_v39, %v10506_v39  ;;  %vm10613_vm0 = vcmp.eq.f32.partialorder %v10598_v17, 0.0  ;;  %v10614_v60 = vmov 0.7853982  }
 0x506   :  { %vm9440_vm14 = vmor %vm10609_vm10, %vm10608_vm6  ;;  %v3496_v43 = vmul.f32 %v6235_v29, %v10597_v45  ;;  %v4392_v26 = vsel %vm10613_vm0, %v10612_v34, %v9055_v58  ;;  %vm10615_vm5 = vcmp.lt.f32.partialorder %v10506_v39, 0.0  ;;  %v6237_v55 = vpop.eup %6236  ;;  %v4992_v24 = vmul.f32 %v4991_v41, %v9272_v20  ;;  %v10620_v34 = vld [vmem:[#allocation54_spill] sm:$0xff] }
 0x507   :  { %v4398_v44 = vsel %vm10615_vm5, 2.3561945, %v10614_v60  ;;  %v5087_v13 = vand.u32 2147483647, %v3551_v1  ;;  %vm10616_vm12 = vcmp.eq.f32.partialorder %v10596_v0, inf  ;;  %v4396_v39 = vsel %vm9440_vm14, nan, %v4392_v26 }
 0x508   :  { %v3477_v29 = vsel %vm10616_vm12, %v10596_v0, %v3475_v46  ;;  %vm10617_vm3 = vcmp.eq.f32.partialorder %v10596_v0, 0.0  ;;  %vm10618_vm6 = vcmp.eq.f32.partialorder %v10597_v45, inf  ;;  %v3489_v8 = vmul.f32 %v6237_v55, %v8852_v2 }
 0x509   :  { %v3480_v58 = vsel %vm10617_vm3, %v3479_v19, %v3477_v29  ;;  %v3498_v41 = vsel %vm10618_vm6, %v10597_v45, %v3496_v43  ;;  %vm4400_vm10 = vcmp.eq.s32.totalorder %v10481_v49, inf  ;;  %v4993_v1 = vadd.f32 %v4992_v24, %v9272_v20  ;;  %v6239_v0 = vpop.eup %6238  ;;  %v10623_v19 = vld [vmem:[#allocation61_spill] sm:$0xff]  ;;  %v10626_v29 = vld [vmem:[#allocation51_spill] sm:$0xff] }
 0x50a   :  { %vm10619_vm12 = vcmask 130048   ;;  %v3550_v12 = vsub.f32 %v10620_v34, %v3480_v58  ;;  %vm10621_vm14 = vcmp.eq.f32.partialorder %v10597_v45, 0.0  ;;  %vm10622_vm5 = vcmp.eq.s32.totalorder %v10480_v40, inf }
 0x50b   :  { %v5133_v46 = vsel %vm10619_vm12, %v5087_v13, 0.0  ;;  %v3501_v26 = vsel %vm10621_vm14, %v3500_v30, %v3498_v41  ;;  %vm4401_vm3 = vmand %vm10622_vm5, %vm4400_vm10  ;;  %vm10624_vm0 = vcmp.eq.f32.partialorder %v8852_v2, inf  ;;  %v4404_v55 = vand.u32 2147483648, %v10598_v17  ;;  %v6241_v13 = vpop.eup %6240  ;;  %v10627_v41 = vld [vmem:[#allocation58_spill] sm:$0xff] }
 0x50c   :  { %5134 = vadd.xlane.f32.xlu0 %v5133_v46  ;;  %v3553_v43 = vsub.f32 %v10623_v19, %v3501_v26  ;;  %v3491_v49 = vsel %vm10624_vm0, %v8852_v2, %v3489_v8  ;;  %v4402_v20 = vsel %vm4401_vm3, %v4398_v44, %v4396_v39  ;;  %v4995_v24 = vsub.f32 1.5707964, %v4993_v1  ;;  %v10628_v26 = vld [vmem:[#allocation60_spill] sm:$0xff]  ;;  %v10632_v8 = vld [vmem:[#allocation31_spill] sm:$0xff] }
 0x50d   :  { %v5086_v45 = vand.u32 2147483647, %v3550_v12  ;;  %vm10625_vm12 = vcmp.eq.f32.partialorder %v8852_v2, 0.0  ;;  %v3510_v30 = vmul.f32 %v6239_v0, %v8910_v63  ;;  %v4403_v34 = vand.u32 2147483647, %v4402_v20  ;;  %v6243_v44 = vpop.eup %6242 }
 0x50e   :  { %v3494_v40 = vsel %vm10625_vm12, %v3493_v28, %v3491_v49  ;;  %v5089_v58 = vand.u32 2147483647, %v3553_v43  ;;  %6244 = vrsqrt.f32 %v10628_v26  ;;  %vm10629_vm0 = vcmp.gt.f32.partialorder %v10558_v21, %v9146_v38 }
 0x50f   :  { %v3552_v46 = vsub.f32 %v10627_v41, %v3494_v40  ;;  %v4996_v17 = vsel %vm10629_vm0, %v4995_v24, %v4993_v1  ;;  %vm10630_vm5 = vcmask 130048   ;;  %vm10631_vm14 = vcmp.eq.f32.partialorder %v8910_v63, inf  ;;  %v10634_v1 = vld [vmem:[#allocation25_spill] sm:$0xff] }
 0x510   :  { %v5130_v2 = vsel %vm10630_vm5, %v5086_v45, 0.0  ;;  %v3512_v28 = vsel %vm10631_vm14, %v8910_v63, %v3510_v30  ;;  %v3503_v39 = vmul.f32 %v6241_v13, %v8948_v3  ;;  %v4998_v12 = vsub.f32 3.1415927, %v4996_v17  ;;  %v10636_v45 = vld [vmem:[#allocation57_spill] sm:$0xff]  ;;  %v10641_v13 = vld [vmem:[#allocation68_spill] sm:$0xff] }
 0x511   :  { %5131 = vadd.xlane.f32.xlu0 %v5130_v2  ;;  %v5088_v0 = vand.u32 2147483647, %v3552_v46  ;;  %vm10633_vm12 = vcmp.eq.f32.partialorder %v8910_v63, 0.0  ;;  %vm3525_vm6 = vcmp.eq.f32.partialorder %v8998_v10, inf  ;;  %vm10635_vm0 = vcmp.eq.f32.partialorder %v8948_v3, inf  ;;  %v10645_v2 = vld [vmem:[#allocation69_spill] sm:$0xff] }
 0x512   :  { %v3515_v19 = vsel %vm10633_vm12, %v3514_v37, %v3512_v28  ;;  %v3505_v49 = vsel %vm10635_vm0, %v8948_v3, %v3503_v39  ;;  %v3524_v20 = vmul.f32 %v6243_v44, %v8998_v10  ;;  %v4405_v24 = vor.u32 %v4404_v55, %v4403_v34  ;;  %vm10640_vm0 = vmmov %vm10630_vm5  ;;  %v10643_v44 = vld [vmem:[#allocation66_spill] sm:$0xff] }
 0x513   :  { %v3555_v43 = vsub.f32 %v10634_v1, %v3515_v19  ;;  %vm10637_vm14 = vcmp.lt.f32.partialorder %v10547_v11, 0.0  ;;  %vm10638_vm3 = vcmp.eq.f32.partialorder %v8948_v3, 0.0  ;;  %vm3527_vm12 = vcmp.eq.f32.partialorder %v8998_v10, 0.0  ;;  %v10651_v1 = vld [vmem:[#allocation72_spill] sm:$0xff] }
 0x514   :  { %v4999_v40 = vsel %vm10637_vm14, %v4998_v12, %v4996_v17  ;;  %v3508_v63 = vsel %vm10638_vm3, %v3507_v53, %v3505_v49  ;;  %v3528_v37 = vand.u32 2147483648, %v8998_v10  ;;  %vm10639_vm10 = vcmp.eq.f32.partialorder %v10564_v9, 0.0  ;;  %v10646_v12 = vld [vmem:[#allocation29_spill] sm:$0xff] }
 0x515   :  { %v9521_v30 = vsel %vm10639_vm10, %v9375_v59, %v4999_v40  ;;  %v5139_v55 = vsel %vm10640_vm0, %v5089_v58, 0.0  ;;  %v3554_v41 = vsub.f32 %v10641_v13, %v3508_v63  ;;  %v3526_v46 = vsel %vm3525_vm6, %v8998_v10, %v3524_v20  ;;  %vm10644_vm10 = vmmov %vm10640_vm0  ;;  %v10653_v20 = vld [vmem:[#allocation82_spill] sm:$0xff] }
 0x516   :  { %vm10642_vm14 = vcmp.lt.s32.totalorder %v10541_v48, 0  ;;  %v5007_v53 = vsel %vm9236_vm15, nan, %v9521_v30  ;;  %5140 = vadd.xlane.f32.xlu0 %v5139_v55  ;;  %v3529_v34 = vsel %vm3527_vm12, %v3528_v37, %v3526_v46  ;;  %v5065_v59 = vsub.f32 %v10643_v44, %v4405_v24  ;;  %vm10654_vm15 = vmmov %vm10644_vm10 }
 0x517   :  { %v9529_v3 = vsel %vm10642_vm14, 3.1415927, %v10464_v7  ;;  %v5136_v17 = vsel %vm10644_vm10, %v5088_v0, 0.0  ;;  %v5091_v58 = vand.u32 2147483647, %v3555_v43  ;;  %v3557_v28 = vsub.f32 %v10645_v2, %v3529_v34  ;;  %v10652_v43 = vld [vmem:[#allocation124_spill] sm:$0xff] }
 0x518   :  { %v5090_v10 = vand.u32 2147483647, %v3554_v41  ;;  %v5097_v39 = vand.u32 2147483647, %v5065_v59  ;;  %vm4344_vm3 = vcmp.eq.f32.partialorder %v10626_v29, 0.0  ;;  %vm4352_vm0 = vcmp.eq.s32.totalorder %v10646_v12, inf  ;;  %v6245_v24 = vpop.eup %6244 }
 0x519   :  { %vm10647_vm14 = vcmp.ne.f32.partialorder %v10626_v29, %v10626_v29  ;;  %vm10648_vm12 = vcmp.ne.f32.partialorder %v8336_v51, %v8336_v51  ;;  %v5093_v0 = vand.u32 2147483647, %v3557_v28  ;;  %v4345_v49 = vsel %vm4344_vm3, %v10652_v43, %v10651_v1  ;;  %vm10656_vm3 = vmmov %vm10644_vm10  ;;  %v10663_v2 = vld [vmem:[#allocation104_spill] sm:$0xff]  ;;  %v10668_v1 = vld [vmem:[#allocation97_spill] sm:$0xff] }
 0x51a   :  { %vm9546_vm5 = vmor %vm10648_vm12, %vm10647_vm14  ;;  %vm4353_vm6 = vcmp.eq.s32.totalorder %v10653_v20, inf  ;;  %5137 = vadd.xlane.f32.xlu0 %v5136_v17  ;;  %v5184_v40 = vsel %vm10654_vm15, %v5097_v39, 0.0  ;;  %vm10655_vm14 = vcmp.lt.f32.partialorder %v8336_v51, 0.0  ;;  %6246 = vrsqrt.f32 %v9143_v54  ;;  %v10670_v20 = vld [vmem:[#allocation102_spill] sm:$0xff] }
 0x51b   :  { %v4349_v63 = vsel %vm9546_vm5, nan, %v4345_v49  ;;  %v4351_v37 = vsel %vm10655_vm14, 2.3561945, %v10614_v60  ;;  %vm4354_vm12 = vmand %vm4352_vm0, %vm4353_vm6  ;;  %v5145_v55 = vsel %vm10644_vm10, %v5091_v58, 0.0  ;;  %5185 = vadd.xlane.f32.xlu1 %v5184_v40  ;;  %v3517_v13 = vmul.f32 %v6245_v24, %v10628_v26  ;;  %v10675_v51 = vld [vmem:[#allocation126_spill] sm:$0xff] }
 0x51c   :  { %v3521_v41 = vand.u32 2147483648, %v10628_v26  ;;  %v4355_v46 = vsel %vm4354_vm12, %v4351_v37, %v4349_v63  ;;  %v5142_v34 = vsel %vm10656_vm3, %v5090_v10, 0.0  ;;  %v4357_v59 = vand.u32 2147483648, %v10626_v29  ;;  %vm10661_vm10 = vmmov %vm10656_vm3  ;;  %v10664_v29 = vld [vmem:[#allocation125_spill] sm:$0xff]  ;;  %v10665_v10 = vld [vmem:[#allocation32_spill] sm:$0xff] }
 0x51d   :  { %v4356_v44 = vand.u32 2147483647, %v4355_v46  ;;  %vm4485_vm15 = vcmp.eq.f32.partialorder %v10636_v45, 0.0  ;;  %vm10657_vm5 = vcmp.ne.f32.partialorder %v10636_v45, %v10636_v45  ;;  %vm10658_vm6 = vcmp.ne.f32.partialorder %v10632_v8, %v10632_v8  ;;  %v10673_v46 = vld [vmem:[#allocation43_spill] sm:$0xff] }
 0x51e   :  { %vm9573_vm0 = vmor %vm10658_vm6, %vm10657_vm5  ;;  %v5151_v17 = vsel %vm10661_vm10, %v5093_v0, 0.0  ;;  %vm10662_vm14 = vcmp.eq.f32.partialorder %v10628_v26, inf  ;;  %v4486_v28 = vsel %vm4485_vm15, %v10664_v29, %v10663_v2  ;;  %vm4493_vm12 = vcmp.eq.s32.totalorder %v10665_v10, inf  ;;  %5146 = vadd.xlane.f32.xlu0 %v5145_v55  ;;  %v10667_v0 = vld [vmem:[#allocation85_spill] sm:$0xff]  ;;  %v10676_v2 = vld [vmem:[#allocation30_spill] sm:$0xff] }
 0x51f   :  { %v3519_v58 = vsel %vm10662_vm14, %v10628_v26, %v3517_v13  ;;  %vm10666_vm3 = vcmp.eq.f32.partialorder %v10628_v26, 0.0  ;;  %v4358_v12 = vor.u32 %v4357_v59, %v4356_v44  ;;  %v4490_v19 = vsel %vm9573_vm0, nan, %v4486_v28  ;;  %v10671_v26 = vld [vmem:[#allocation62_spill] sm:$0xff] }
 0x520   :  { %v3522_v39 = vsel %vm10666_vm3, %v3521_v41, %v3519_v58  ;;  %vm4494_vm6 = vcmp.eq.s32.totalorder %v10667_v0, inf  ;;  %vm10669_vm15 = vcmp.lt.f32.partialorder %v10632_v8, 0.0  ;;  %6248 = vrsqrt.f32 %v10670_v20  ;;  %v10672_v41 = vld [vmem:[#allocation44_spill] sm:$0xff]  ;;  %v10674_v59 = vld [vmem:[#allocation130_spill] sm:$0xff] }
 0x521   :  { %v3556_v43 = vsub.f32 %v10668_v1, %v3522_v39  ;;  %v4492_v49 = vsel %vm10669_vm15, 2.3561945, %v10614_v60  ;;  %vm4495_vm14 = vmand %vm4493_vm12, %vm4494_vm6  ;;  %v5064_v24 = vsub.f32 %v10671_v26, %v4358_v12  ;;  %v3535_v40 = vand.u32 2147483648, %v9143_v54  ;;  %v10679_v39 = vld [vmem:[#allocation33_spill] sm:$0xff]  ;;  %v10683_v26 = vld [vmem:[#allocation67_spill] sm:$0xff] }
 0x522   :  { %v4496_v63 = vsel %vm4495_vm14, %v4492_v49, %v4490_v19  ;;  %v4498_v37 = vand.u32 2147483648, %v10636_v45  ;;  %vm4438_vm0 = vcmp.eq.f32.partialorder %v10672_v41, 0.0  ;;  %vm4446_vm3 = vcmp.eq.s32.totalorder %v10673_v46, inf  ;;  %5143 = vadd.xlane.f32.xlu0 %v5142_v34  ;;  %vm10677_vm6 = vmmov %vm10661_vm10  ;;  %v10700_v46 = vld [vmem:[#allocation90_spill] sm:$0xff] }
 0x523   :  { %v5092_v55 = vand.u32 2147483647, %v3556_v43  ;;  %v4497_v13 = vand.u32 2147483647, %v4496_v63  ;;  %v5096_v44 = vand.u32 2147483647, %v5064_v24  ;;  %v4439_v58 = vsel %vm4438_vm0, %v10675_v51, %v10674_v59  ;;  %vm10681_vm5 = vmmov %vm10677_vm6 }
 0x524   :  { %v3542_v8 = vand.u32 2147483648, %v10670_v20  ;;  %vm4447_vm12 = vcmp.eq.s32.totalorder %v10676_v2, inf  ;;  %vm3539_vm15 = vcmp.eq.f32.partialorder %v10670_v20, inf  ;;  %v4443_v10 = vsel %vm8459_vm11, nan, %v4439_v58  ;;  %v6247_v12 = vpop.eup %6246  ;;  %v10682_v43 = vld [vmem:[#allocation42_spill] sm:$0xff]  ;;  %v10687_v59 = vld [vmem:[#allocation19_spill] sm:$0xff] }
 0x525   :  { %v5148_v29 = vsel %vm10677_vm6, %v5092_v55, 0.0  ;;  %v4499_v28 = vor.u32 %v4498_v37, %v4497_v13  ;;  %vm10680_vm14 = vcmp.lt.f32.partialorder %v10679_v39, 0.0  ;;  %vm4448_vm10 = vmand %vm4446_vm3, %vm4447_vm12  ;;  %v5181_v19 = vsel %vm10681_vm5, %v5096_v44, 0.0  ;;  %v10684_v37 = vld [vmem:[#allocation131_spill] sm:$0xff]  ;;  %v10690_v58 = vld [vmem:[#allocation86_spill] sm:$0xff] }
 0x526   :  { %v4445_v34 = vsel %vm10680_vm14, 2.3561945, %v10614_v60  ;;  %vm3541_vm0 = vcmp.eq.f32.partialorder %v10670_v20, 0.0  ;;  %v4451_v1 = vand.u32 2147483648, %v10672_v41  ;;  %vm4579_vm6 = vcmp.eq.f32.partialorder %v10682_v43, 0.0  ;;  %5182 = vadd.xlane.f32.xlu1 %v5181_v19  ;;  %v10685_v55 = vld [vmem:[#allocation127_spill] sm:$0xff]  ;;  %5152 = vadd.xlane.f32.xlu0 %v5151_v17 }
 0x527   :  { %v4449_v0 = vsel %vm4448_vm10, %v4445_v34, %v4443_v10  ;;  %v3531_v49 = vmul.f32 %v6247_v12, %v9143_v54  ;;  %v5067_v24 = vsub.f32 %v10683_v26, %v4499_v28  ;;  %v4580_v13 = vsel %vm4579_vm6, %v10685_v55, %v10684_v37  ;;  %v10689_v41 = vld [vmem:[#allocation80_spill] sm:$0xff]  ;;  %v10692_v10 = vld [vmem:[#allocation47_spill] sm:$0xff] }
 0x528   :  { %v4450_v63 = vand.u32 2147483647, %v4449_v0  ;;  %v4584_v44 = vsel %vm8496_vm9, nan, %v4580_v13  ;;  %vm10688_vm11 = vcmp.lt.f32.partialorder %v10687_v59, 0.0  ;;  %vm4587_vm5 = vcmp.eq.s32.totalorder %v10689_v41, inf  ;;  %v10694_v12 = vld [vmem:[#allocation132_spill] sm:$0xff] }
 0x529   :  { %v4586_v51 = vsel %vm10688_vm11, 2.3561945, %v10614_v60  ;;  %vm4588_vm10 = vcmp.eq.s32.totalorder %v10690_v58, inf  ;;  %vm10691_vm3 = vcmp.eq.f32.partialorder %v9143_v54, inf  ;;  %v5099_v28 = vand.u32 2147483647, %v5067_v24 }
 0x52a   :  { %v3533_v2 = vsel %vm10691_vm3, %v9143_v54, %v3531_v49  ;;  %v4452_v45 = vor.u32 %v4451_v1, %v4450_v63  ;;  %vm4589_vm12 = vmand %vm4587_vm5, %vm4588_vm10  ;;  %vm4532_vm14 = vcmp.eq.f32.partialorder %v10692_v10, 0.0  ;;  %vm10693_vm6 = vcmp.eq.f32.partialorder %v9143_v54, 0.0  ;;  %v10695_v19 = vld [vmem:[#allocation128_spill] sm:$0xff]  ;;  %v6249_v26 = vpop.eup %6248  ;;  %v10696_v37 = vld [vmem:[#allocation79_spill] sm:$0xff]  ;;  %5149 = vadd.xlane.f32.xlu0 %v5148_v29 }
 0x52b   :  { %v3536_v17 = vsel %vm10693_vm6, %v3535_v40, %v3533_v2  ;;  %v4590_v39 = vsel %vm4589_vm12, %v4586_v51, %v4584_v44  ;;  %v4592_v34 = vand.u32 2147483648, %v10682_v43  ;;  %v4533_v0 = vsel %vm4532_vm14, %v10695_v19, %v10694_v12  ;;  %v10698_v49 = vld [vmem:[#allocation71_spill] sm:$0xff]  ;;  %v10701_v43 = vld [vmem:[#allocation88_spill] sm:$0xff]  ;;  %v10702_v41 = vld [vmem:[#allocation49_spill] sm:$0xff] }
 0x52c   :  { %v3558_v55 = vsub.f32 %v10696_v37, %v3536_v17  ;;  %vm10697_vm9 = vcmask 130048   ;;  %v5066_v24 = vsub.f32 %v10698_v49, %v4452_v45  ;;  %v4591_v1 = vand.u32 2147483647, %v4590_v39  ;;  %v10704_v45 = vld [vmem:[#allocation22_spill] sm:$0xff]  ;;  %v10715_v54 = vld [vmem:[#allocation96_spill] sm:$0xff] }
 0x52d   :  { %v5190_v13 = vsel %vm10697_vm9, %v5099_v28, 0.0  ;;  %v3538_v63 = vmul.f32 %v6249_v26, %v10670_v20  ;;  %v4537_v40 = vsel %vm8522_vm4, nan, %v4533_v0  ;;  %vm4540_vm11 = vcmp.eq.s32.totalorder %v10700_v46, inf  ;;  %vm10705_vm12 = vmmov %vm10697_vm9  ;;  %v10707_v12 = vld [vmem:[#allocation18_spill] sm:$0xff]  ;;  %v10708_v0 = vld [vmem:[#allocation28_spill] sm:$0xff] }
 0x52e   :  { %5191 = vadd.xlane.f32.xlu1 %v5190_v13  ;;  %vm4541_vm5 = vcmp.eq.s32.totalorder %v10701_v43, inf  ;;  %v5094_v44 = vand.u32 2147483647, %v3558_v55  ;;  %v5098_v59 = vand.u32 2147483647, %v5066_v24  ;;  %v4593_v51 = vor.u32 %v4592_v34, %v4591_v1  ;;  %vm10706_vm14 = vmmov %vm10697_vm9  ;;  %v10709_v55 = vld [vmem:[#allocation74_spill] sm:$0xff] }
 0x52f   :  { %vm10703_vm10 = vcmp.lt.f32.partialorder %v10702_v41, 0.0  ;;  %vm4542_vm3 = vmand %vm4540_vm11, %vm4541_vm5  ;;  %v3540_v29 = vsel %vm3539_vm15, %v10670_v20, %v3538_v63  ;;  %v4545_v28 = vand.u32 2147483648, %v10692_v10  ;;  %vm4673_vm4 = vcmp.eq.f32.partialorder %v10704_v45, 0.0  ;;  %v10710_v13 = vld [vmem:[#allocation114_spill] sm:$0xff]  ;;  %v10711_v10 = vld [vmem:[#allocation103_spill] sm:$0xff] }
 0x530   :  { %v4539_v58 = vsel %vm10703_vm10, 2.3561945, %v10614_v60  ;;  %v5154_v17 = vsel %vm10705_vm12, %v5094_v44, 0.0  ;;  %v3543_v39 = vsel %vm3541_vm0, %v3542_v8, %v3540_v29  ;;  %v5187_v34 = vsel %vm10706_vm14, %v5098_v59, 0.0  ;;  %v10713_v20 = vld [vmem:[#allocation83_spill] sm:$0xff]  ;;  %v10716_v44 = vld [vmem:[#allocation50_spill] sm:$0xff]  ;;  %vm10717_vm5 = vmmov %vm10705_vm12 }
 0x531   :  { %v4543_v2 = vsel %vm4542_vm3, %v4539_v58, %v4537_v40  ;;  %v5069_v19 = vsub.f32 %v10707_v12, %v4593_v51  ;;  %5155 = vadd.xlane.f32.xlu0 %v5154_v17  ;;  %v3559_v26 = vsub.f32 %v10708_v0, %v3543_v39  ;;  %v4674_v49 = vsel %vm4673_vm4, %v10710_v13, %v10709_v55  ;;  %v10718_v41 = vld [vmem:[#allocation55_spill] sm:$0xff]  ;;  %vm10721_vm10 = vmmov %vm10717_vm5  ;;  %v10722_v39 = vld [vmem:[#allocation70_spill] sm:$0xff] }
 0x532   :  { %5188 = vadd.xlane.f32.xlu1 %v5187_v34  ;;  %v4544_v37 = vand.u32 2147483647, %v4543_v2  ;;  %vm4681_vm15 = vcmp.eq.s32.totalorder %v10711_v10, inf  ;;  %v4678_v63 = vsel %vm8572_vm7, nan, %v4674_v49  ;;  %vm10714_vm0 = vcmp.lt.f32.partialorder %v10713_v20, 0.0  ;;  %v10719_v58 = vld [vmem:[#allocation99_spill] sm:$0xff] }
 0x533   :  { %v5101_v24 = vand.u32 2147483647, %v5069_v19  ;;  %v4680_v8 = vsel %vm10714_vm0, 2.3561945, %v10614_v60  ;;  %vm4682_vm6 = vcmp.eq.s32.totalorder %v10715_v54, inf  ;;  %v4686_v43 = vand.u32 2147483648, %v10704_v45 }
 0x534   :  { %v5095_v40 = vand.u32 2147483647, %v3559_v26  ;;  %v4546_v46 = vor.u32 %v4545_v28, %v4544_v37  ;;  %vm4683_vm9 = vmand %vm4681_vm15, %vm4682_vm6  ;;  %vm4626_vm11 = vcmp.eq.f32.partialorder %v10716_v44, 0.0  ;;  %v10720_v2 = vld [vmem:[#allocation110_spill] sm:$0xff]  ;;  %v10724_v45 = vld [vmem:[#allocation87_spill] sm:$0xff]  ;;  %v4639_v37 = vand.u32 2147483648, %v10716_v44 }
 0x535   :  { %v5196_v59 = vsel %vm10717_vm5, %v5101_v24, 0.0  ;;  %v4684_v51 = vsel %vm4683_vm9, %v4680_v8, %v4678_v63  ;;  %v4627_v29 = vsel %vm4626_vm11, %v10719_v58, %v10718_v41  ;;  %vm4634_vm7 = vcmp.eq.s32.totalorder %v10720_v2, inf  ;;  %v10726_v26 = vld [vmem:[#allocation93_spill] sm:$0xff]  ;;  %v10728_v10 = vld [vmem:[#allocation119_spill] sm:$0xff]  ;;  %v10730_v63 = vld [vmem:[#allocation118_spill] sm:$0xff] }
 0x536   :  { %v5157_v17 = vsel %vm10721_vm10, %v5095_v40, 0.0  ;;  %5197 = vadd.xlane.f32.xlu1 %v5196_v59  ;;  %v5068_v34 = vsub.f32 %v10722_v39, %v4546_v46  ;;  %v4685_v12 = vand.u32 2147483647, %v4684_v51  ;;  %v4631_v19 = vsel %vm8641_vm8, nan, %v4627_v29  ;;  %v10727_v55 = vld [vmem:[#allocation53_spill] sm:$0xff]  ;;  %v10729_v24 = vld [vmem:[#allocation115_spill] sm:$0xff]  ;;  %vm10735_vm6 = vmmov %vm10717_vm5 }
 0x537   :  { %5158 = vadd.xlane.f32.xlu0 %v5157_v17  ;;  %vm10725_vm3 = vcmp.lt.f32.partialorder %v10724_v45, 0.0  ;;  %vm4635_vm4 = vcmp.eq.s32.totalorder %v10726_v26, inf  ;;  %vm4767_vm12 = vcmp.eq.f32.partialorder %v10727_v55, 0.0  ;;  %vm4775_vm15 = vcmp.eq.s32.totalorder %v10730_v63, inf  ;;  %v10732_v40 = vld [vmem:[#allocation101_spill] sm:$0xff]  ;;  %v10734_v59 = vld [vmem:[#allocation36_spill] sm:$0xff] }
 0x538   :  { %v4633_v0 = vsel %vm10725_vm3, 2.3561945, %v10614_v60  ;;  %v5100_v13 = vand.u32 2147483647, %v5068_v34  ;;  %v4687_v49 = vor.u32 %v4686_v43, %v4685_v12  ;;  %vm4636_vm14 = vmand %vm4634_vm7, %vm4635_vm4  ;;  %v4768_v1 = vsel %vm4767_vm12, %v10729_v24, %v10728_v10  ;;  %v10736_v51 = vld [vmem:[#allocation73_spill] sm:$0xff]  ;;  %v10737_v58 = vld [vmem:[#allocation78_spill] sm:$0xff] }
 0x539   :  { %v4637_v20 = vsel %vm4636_vm14, %v4633_v0, %v4631_v19  ;;  %v4772_v54 = vsel %vm8833_vm2, nan, %v4768_v1  ;;  %vm10733_vm8 = vcmp.lt.f32.partialorder %v10732_v40, 0.0  ;;  %vm4776_vm0 = vcmp.eq.s32.totalorder %v10734_v59, inf  ;;  %v10740_v0 = vld [vmem:[#allocation39_spill] sm:$0xff]  ;;  %vm10742_vm3 = vmmov %vm10735_vm6  ;;  %v10746_v1 = vld [vmem:[#allocation20_spill] sm:$0xff] }
 0x53a   :  { %v4774_v46 = vsel %vm10733_vm8, 2.3561945, %v10614_v60  ;;  %v5193_v44 = vsel %vm10735_vm6, %v5100_v13, 0.0  ;;  %v5071_v43 = vsub.f32 %v10736_v51, %v4687_v49  ;;  %v4638_v41 = vand.u32 2147483647, %v4637_v20  ;;  %vm4777_vm9 = vmand %vm4775_vm15, %vm4776_vm0  ;;  %v10747_v20 = vld [vmem:[#allocation38_spill] sm:$0xff] }
 0x53b   :  { %vm4720_vm11 = vcmp.eq.f32.partialorder %v10737_v58, 0.0  ;;  %5194 = vadd.xlane.f32.xlu1 %v5193_v44  ;;  %v4778_v29 = vsel %vm4777_vm9, %v4774_v46, %v4772_v54  ;;  %v4780_v2 = vand.u32 2147483648, %v10727_v55  ;;  %vm4728_vm2 = vcmp.eq.s32.totalorder %v8848_v22, inf  ;;  %v10741_v55 = vld [vmem:[#allocation48_spill] sm:$0xff]  ;;  %vm10750_vm0 = vmmov %vm10742_vm3 }
 0x53c   :  { %v4721_v17 = vsel %vm4720_vm11, %v9221_v6, %v9264_v4  ;;  %v5103_v39 = vand.u32 2147483647, %v5071_v43  ;;  %v4640_v34 = vor.u32 %v4639_v37, %v4638_v41  ;;  %v4779_v12 = vand.u32 2147483647, %v4778_v29  ;;  %v10743_v4 = vld [vmem:[#allocation89_spill] sm:$0xff]  ;;  %v10744_v37 = vld [vmem:[#allocation111_spill] sm:$0xff] }
 0x53d   :  { %v4725_v19 = vsel %vm8895_vm1, nan, %v4721_v17  ;;  %vm10739_vm5 = vcmp.lt.f32.partialorder %v8537_v5, 0.0  ;;  %vm4729_vm7 = vcmp.eq.s32.totalorder %v10740_v0, inf  ;;  %v4733_v26 = vand.u32 2147483648, %v10737_v58  ;;  %v10749_v59 = vld [vmem:[#allocation24_spill] sm:$0xff] }
 0x53e   :  { %v4727_v45 = vsel %vm10739_vm5, 2.3561945, %v10614_v60  ;;  %vm4861_vm10 = vcmp.eq.f32.partialorder %v10741_v55, 0.0  ;;  %v5202_v6 = vsel %vm10742_vm3, %v5103_v39, 0.0  ;;  %v5070_v22 = vsub.f32 %v10743_v4, %v4640_v34  ;;  %vm4730_vm4 = vmand %vm4728_vm2, %vm4729_vm7  ;;  %v10751_v41 = vld [vmem:[#allocation108_spill] sm:$0xff]  ;;  %v10754_v39 = vld [vmem:[#allocation109_spill] sm:$0xff] }
 0x53f   :  { %v4781_v13 = vor.u32 %v4780_v2, %v4779_v12  ;;  %v4862_v49 = vsel %vm4861_vm10, %v10744_v37, %v9300_v62  ;;  %5203 = vadd.xlane.f32.xlu1 %v5202_v6  ;;  %v4731_v10 = vsel %vm4730_vm4, %v4727_v45, %v4725_v19  ;;  %vm4869_vm1 = vcmp.eq.s32.totalorder %v8902_v42, inf  ;;  %v10753_v2 = vld [vmem:[#allocation35_spill] sm:$0xff]  ;;  %v10756_v12 = vld [vmem:[#allocation81_spill] sm:$0xff]  ;;  %vm10757_vm7 = vmmov %vm10750_vm0 }
 0x540   :  { %v4866_v5 = vsel %vm8937_vm13, nan, %v4862_v49  ;;  %vm4870_vm12 = vcmp.eq.s32.totalorder %v10746_v1, inf  ;;  %v5102_v63 = vand.u32 2147483647, %v5070_v22  ;;  %v4732_v54 = vand.u32 2147483647, %v4731_v10 }
 0x541   :  { %v5073_v8 = vsub.f32 %v10747_v20, %v4781_v13  ;;  %vm10748_vm14 = vcmp.lt.f32.partialorder %v10489_v36, 0.0  ;;  %vm4871_vm15 = vmand %vm4869_vm1, %vm4870_vm12  ;;  %v4874_v62 = vand.u32 2147483648, %v10741_v55  ;;  %vm4814_vm8 = vcmp.eq.f32.partialorder %v10749_v59, 0.0  ;;  %v10758_v19 = vld [vmem:[#allocation120_spill] sm:$0xff]  ;;  %v10759_v45 = vld [vmem:[#allocation34_spill] sm:$0xff] }
 0x542   :  { %v4868_v40 = vsel %vm10748_vm14, 2.3561945, %v10614_v60  ;;  %vm4822_vm13 = vcmp.eq.s32.totalorder %v8942_v56, inf  ;;  %v5199_v42 = vsel %vm10750_vm0, %v5102_v63, 0.0  ;;  %v4734_v51 = vor.u32 %v4733_v26, %v4732_v54  ;;  %v10760_v55 = vld [vmem:[#allocation65_spill] sm:$0xff] }
 0x543   :  { %v4872_v46 = vsel %vm4871_vm15, %v4868_v40, %v4866_v5  ;;  %v5105_v44 = vand.u32 2147483647, %v5073_v8  ;;  %5200 = vadd.xlane.f32.xlu1 %v5199_v42  ;;  %v4815_v58 = vsel %vm4814_vm8, %v10751_v41, %v9322_v57  ;;  %vm10752_vm6 = vcmp.lt.f32.partialorder %v10497_v47, 0.0  ;;  %v10771_v8 = vld [vmem:[#allocation84_spill] sm:$0xff]  ;;  %v10774_v42 = vld [vmem:[#allocation123_spill] sm:$0xff] }
 0x544   :  { %v4873_v43 = vand.u32 2147483647, %v4872_v46  ;;  %v4821_v36 = vsel %vm10752_vm6, 2.3561945, %v10614_v60  ;;  %vm4823_vm9 = vcmp.eq.s32.totalorder %v10505_v32, inf  ;;  %v4827_v29 = vand.u32 2147483648, %v10749_v59  ;;  %vm10767_vm6 = vmmov %vm10757_vm7 }
 0x545   :  { %v5072_v17 = vsub.f32 %v10753_v2, %v4734_v51  ;;  %vm10755_vm11 = vnez %v10754_v39  ;;  %vm4824_vm2 = vmand %vm4822_vm13, %vm4823_vm9  ;;  %vm4955_vm5 = vcmp.eq.f32.partialorder %v10756_v12, 0.0  ;;  %v5208_v28 = vsel %vm10757_vm7, %v5105_v44, 0.0  ;;  %v10781_v2 = vld [vmem:[#allocation95_spill] sm:$0xff] }
 0x546   :  { %v4875_v56 = vor.u32 %v4874_v62, %v4873_v43  ;;  %v4819_v34 = vsel %vm10755_vm11, nan, %v4815_v58  ;;  %v4956_v47 = vsel %vm4955_vm5, %v10758_v19, %v9342_v61  ;;  %vm4963_vm10 = vcmp.eq.s32.totalorder %v8987_v14, inf  ;;  %v10764_v61 = vld [vmem:[#allocation59_spill] sm:$0xff]  ;;  %v10779_v43 = vld [vmem:[#allocation41_spill] sm:$0xff] }
 0x547   :  { %v4825_v57 = vsel %vm4824_vm2, %v4821_v36, %v4819_v34  ;;  %v5104_v32 = vand.u32 2147483647, %v5072_v17  ;;  %vm10761_vm3 = vnez %v10760_v55  ;;  %vm10762_vm4 = vcmp.lt.f32.partialorder %v10547_v11, 0.0  ;;  %5209 = vadd.xlane.f32.xlu1 %v5208_v28  ;;  %v10765_v11 = vld [vmem:[#allocation26_spill] sm:$0xff]  ;;  %vm10770_vm2 = vmmov %vm10767_vm6 }
 0x548   :  { %v5075_v0 = vsub.f32 %v10759_v45, %v4875_v56  ;;  %v4826_v26 = vand.u32 2147483647, %v4825_v57  ;;  %v4960_v6 = vsel %vm10761_vm3, nan, %v4956_v47  ;;  %v5009_v4 = vsel %vm10762_vm4, 2.3561945, %v10614_v60 }
 0x549   :  { %vm10763_vm1 = vcmp.lt.f32.partialorder %v10512_v50, 0.0  ;;  %vm4964_vm12 = vcmp.eq.s32.totalorder %v10516_v23, inf  ;;  %vm4908_vm14 = vcmp.eq.f32.partialorder %v10764_v61, 0.0  ;;  %v4968_v37 = vand.u32 2147483648, %v10756_v12  ;;  %v10768_v23 = vld [vmem:[#allocation91_spill] sm:$0xff] }
 0x54a   :  { %v4962_v22 = vsel %vm10763_vm1, 2.3561945, %v10614_v60  ;;  %v5107_v14 = vand.u32 2147483647, %v5075_v0  ;;  %v4828_v13 = vor.u32 %v4827_v29, %v4826_v26  ;;  %vm4965_vm15 = vmand %vm4963_vm10, %vm4964_vm12  ;;  %v4909_v49 = vsel %vm4908_vm14, %v9360_v35, %v9366_v18 }
 0x54b   :  { %v4966_v10 = vsel %vm4965_vm15, %v4962_v22, %v4960_v6  ;;  %vm10766_vm8 = vnez %v10765_v11  ;;  %vm4916_vm13 = vcmp.eq.s32.totalorder %v9020_v33, inf  ;;  %vm4917_vm0 = vcmp.eq.s32.totalorder %v10524_v15, inf }
 0x54c   :  { %v4913_v24 = vsel %vm10766_vm8, nan, %v4909_v49  ;;  %v5205_v50 = vsel %vm10767_vm6, %v5104_v32, 0.0  ;;  %v5074_v5 = vsub.f32 %v10768_v23, %v4828_v13  ;;  %v4967_v1 = vand.u32 2147483647, %v4966_v10  ;;  %vm4918_vm11 = vmand %vm4916_vm13, %vm4917_vm0 }
 0x54d   :  { %vm10769_vm9 = vcmp.lt.f32.partialorder %v10521_v31, 0.0  ;;  %5206 = vadd.xlane.f32.xlu1 %v5205_v50  ;;  %v5214_v35 = vsel %vm10770_vm2, %v5107_v14, 0.0  ;;  %vm5010_vm5 = vcmp.eq.s32.totalorder %v9146_v38, inf  ;;  %vm5011_vm7 = vcmp.eq.s32.totalorder %v10558_v21, inf  ;;  %v10773_v38 = vld [vmem:[#allocation92_spill] sm:$0xff]  ;;  %vm10778_vm13 = vmmov %vm10770_vm2 }
 0x54e   :  { %v4915_v63 = vsel %vm10769_vm9, 2.3561945, %v10614_v60  ;;  %v4969_v33 = vor.u32 %v4968_v37, %v4967_v1  ;;  %v4921_v20 = vand.u32 2147483648, %v10764_v61  ;;  %vm5012_vm10 = vmand %vm5010_vm5, %vm5011_vm7  ;;  %vm5049_vm3 = vcmp.eq.f32.partialorder %v10771_v8, 0.0 }
 0x54f   :  { %v4919_v18 = vsel %vm4918_vm11, %v4915_v63, %v4913_v24  ;;  %v5106_v54 = vand.u32 2147483647, %v5074_v5  ;;  %v5013_v31 = vsel %vm5012_vm10, %v5009_v4, %v5007_v53  ;;  %v5050_v40 = vsel %vm5049_vm3, %v9529_v3, %v9411_v25  ;;  %vm10780_vm0 = vmmov %vm10770_vm2 }
 0x550   :  { %v4920_v15 = vand.u32 2147483647, %v4919_v18  ;;  %vm5057_vm1 = vcmp.eq.s32.totalorder %v9094_v52, inf  ;;  %v5077_v21 = vsub.f32 %v10773_v38, %v4969_v33  ;;  %v5014_v62 = vand.u32 2147483647, %v5013_v31  ;;  %vm10782_vm6 = vmmov %vm10780_vm0 }
 0x551   :  { %v5015_v59 = vand.u32 2147483648, %v10564_v9  ;;  %5215 = vadd.xlane.f32.xlu1 %v5214_v35  ;;  %vm10775_vm12 = vnez %v10774_v42  ;;  %vm5058_vm14 = vcmp.eq.s32.totalorder %v10545_v27, inf  ;;  %vm10777_vm15 = vcmp.lt.f32.partialorder %v10541_v48, 0.0  ;;  %vm10783_vm9 = vmmov %vm10780_vm0 }
 0x552   :  { %v4922_v46 = vor.u32 %v4921_v20, %v4920_v15  ;;  %v5054_v44 = vsel %vm10775_vm12, nan, %v5050_v40  ;;  %v5056_v25 = vsel %vm10777_vm15, 2.3561945, %v10614_v60  ;;  %vm5059_vm8 = vmand %vm5057_vm1, %vm5058_vm14  ;;  %v5211_v52 = vsel %vm10778_vm13, %v5106_v54, 0.0 }
 0x553   :  { %v5016_v53 = vor.u32 %v5015_v59, %v5014_v62  ;;  %v5060_v3 = vsel %vm5059_vm8, %v5056_v25, %v5054_v44  ;;  %v5109_v51 = vand.u32 2147483647, %v5077_v21  ;;  %v5062_v58 = vand.u32 2147483648, %v10771_v8  ;;  %vm10784_vm11 = vmmov %vm10780_vm0 }
 0x554   :  { %v5076_v30 = vsub.f32 %v10776_v16, %v4922_v46  ;;  %v5061_v41 = vand.u32 2147483647, %v5060_v3  ;;  %vm94_vm2 = vcmask 0  }
 0x555   :  { %v5078_v9 = vsub.f32 %v10779_v43, %v5016_v53  ;;  %5212 = vadd.xlane.f32.xlu1 %v5211_v52  ;;  %v5220_v27 = vsel %vm10780_vm0, %v5109_v51, 0.0  ;;  %95 = vst.msk [vmem:[#allocation10] sm:$0x1] %vm94_vm2, %v10464_v7  ;;  %96 = vst.msk [vmem:[#allocation11] sm:$0x1] %vm94_vm2, %v10464_v7 }
 0x556   :  { %v5063_v36 = vor.u32 %v5062_v58, %v5061_v41  ;;  %v5108_v29 = vand.u32 2147483647, %v5076_v30 }
 0x557   :  { %v5110_v60 = vand.u32 2147483647, %v5078_v9 }
 0x558   :  { %v5079_v17 = vsub.f32 %v10781_v2, %v5063_v36  ;;  %v5217_v48 = vsel %vm10782_vm6, %v5108_v29, 0.0 }
 0x559   :  { %5221 = vadd.xlane.f32.xlu1 %v5220_v27  ;;  %v5223_v56 = vsel %vm10783_vm9, %v5110_v60, 0.0 }
 0x55a   :  { %v5111_v39 = vand.u32 2147483647, %v5079_v17 }
 0x55c   :  { %v5226_v34 = vsel %vm10784_vm11, %v5111_v39, 0.0  ;;  %v5250_v52 = vld [vmem:[#allocation10] sm:$0x1] }
 0x55d   :  { %5218 = vadd.xlane.f32.xlu1 %v5217_v48 }
 0x55e   :  { %v5117_v47 = vpop.xlane.xlu1 %5116 }
 0x561   :  { %5224 = vadd.xlane.f32.xlu1 %v5223_v56 }
 0x564   :  { %v5114_v12 = vpop.xlane.xlu0 %5113 }
 0x565   :  { %5227 = vadd.xlane.f32.xlu1 %v5226_v34  ;;  %v5160_v45 = vadd.f32 %v5117_v47, %v5114_v12 }
 0x580   :  { %v5123_v28 = vpop.xlane.xlu0 %5122 }
 0x587   :  { %v5120_v57 = vpop.xlane.xlu0 %5119 }
 0x588   :  { %v5161_v0 = vadd.f32 %v5160_v45, %v5120_v57 }
 0x58a   :  { %v5162_v55 = vadd.f32 %v5161_v0, %v5123_v28 }
 0x58b   :  { %v5129_v19 = vpop.xlane.xlu0 %5128 }
 0x592   :  { %v5126_v32 = vpop.xlane.xlu0 %5125 }
 0x593   :  { %v5163_v4 = vadd.f32 %v5162_v55, %v5126_v32 }
 0x595   :  { %v5164_v61 = vadd.f32 %v5163_v4, %v5129_v19 }
 0x599   :  { %v5135_v26 = vpop.xlane.xlu0 %5134 }
 0x59e   :  { %v5132_v6 = vpop.xlane.xlu0 %5131 }
 0x59f   :  { %v5165_v14 = vadd.f32 %v5164_v61, %v5132_v6 }
 0x5a1   :  { %v5166_v37 = vadd.f32 %v5165_v14, %v5135_v26 }
 0x5a3   :  { %v5141_v22 = vpop.xlane.xlu0 %5140 }
 0x5a7   :  { %v5138_v13 = vpop.xlane.xlu0 %5137 }
 0x5a8   :  { %v5167_v10 = vadd.f32 %v5166_v37, %v5138_v13  ;;  %v5186_v7 = vpop.xlane.xlu1 %5185 }
 0x5aa   :  { %v5168_v24 = vadd.f32 %v5167_v10, %v5141_v22 }
 0x5ab   :  { %v5147_v49 = vpop.xlane.xlu0 %5146 }
 0x5af   :  { %v5144_v11 = vpop.xlane.xlu0 %5143 }
 0x5b0   :  { %v5169_v50 = vadd.f32 %v5168_v24, %v5144_v11 }
 0x5b2   :  { %v5170_v1 = vadd.f32 %v5169_v50, %v5147_v49 }
 0x5b3   :  { %v5183_v23 = vpop.xlane.xlu1 %5182  ;;  %v5153_v5 = vpop.xlane.xlu0 %5152 }
 0x5b4   :  { %v5229_v46 = vadd.f32 %v5186_v7, %v5183_v23 }
 0x5b7   :  { %v5150_v63 = vpop.xlane.xlu0 %5149 }
 0x5b8   :  { %v5171_v18 = vadd.f32 %v5170_v1, %v5150_v63 }
 0x5ba   :  { %v5172_v33 = vadd.f32 %v5171_v18, %v5153_v5 }
 0x5bb   :  { %v5192_v35 = vpop.xlane.xlu1 %5191 }
 0x5be   :  { %v5156_v15 = vpop.xlane.xlu0 %5155 }
 0x5bf   :  { %v5189_v20 = vpop.xlane.xlu1 %5188  ;;  %v5173_v8 = vadd.f32 %v5172_v33, %v5156_v15 }
 0x5c0   :  { %v5230_v42 = vadd.f32 %v5229_v46, %v5189_v20 }
 0x5c2   :  { %v5231_v53 = vadd.f32 %v5230_v42, %v5192_v35 }
 0x5c3   :  { %v5198_v54 = vpop.xlane.xlu1 %5197 }
 0x5c4   :  { %v5159_v31 = vpop.xlane.xlu0 %5158 }
 0x5c5   :  { %v5174_v40 = vadd.f32 %v5173_v8, %v5159_v31 }
 0x5c7   :  { %v5175_v38 = vrot.slane %v5174_v40, 4 }
 0x5c8   :  { %v5195_v21 = vpop.xlane.xlu1 %5194 }
 0x5c9   :  { %v5176_v62 = vadd.f32 %v5175_v38, %v5174_v40  ;;  %v5232_v51 = vadd.f32 %v5231_v53, %v5195_v21 }
 0x5cb   :  { %v5177_v59 = vrot.slane %v5176_v62, 2  ;;  %v5233_v41 = vadd.f32 %v5232_v51, %v5198_v54 }
 0x5cc   :  { %v5204_v44 = vpop.xlane.xlu1 %5203 }
 0x5cd   :  { %v5178_v16 = vadd.f32 %v5177_v59, %v5176_v62 }
 0x5cf   :  { %v5179_v30 = vrot.slane %v5178_v16, 1 }
 0x5d0   :  { %v5201_v25 = vpop.xlane.xlu1 %5200 }
 0x5d1   :  { %v5180_v3 = vadd.f32 %v5179_v30, %v5178_v16 }
 0x5d3   :  { %v5251_v43 = vadd.f32 %v5250_v52, %v5180_v3 }
 0x5d4   :  { %v5210_v9 = vpop.xlane.xlu1 %5209 }
 0x5d5   :  { %5253 = vst.msk [vmem:[#allocation10] sm:$0x1] %vm94_vm2, %v5251_v43 }
 0x5d6   :  { %6349 = shalt.err (!%p6346_p8)
}
 0x5d7   :  { %s6350_s19 = scalar_lea.hbm %s9824_s4, 16 }
 0x5d8   :  { %p6351_p9 = scmp.ne.s32.totalorder %s9824_s4, %s6350_s19  ;;  %p6354_p10 = scmp.lt.u32.totalorder %s6350_s19, %s9824_s4 }
 0x5da   :  { %p6356_p11 = pnand %p6354_p10, %p6351_p9 }
 0x5dc   :  { %6359 = shalt.err (!%p6356_p11)
}
 0x5dd   :  { %5266 = dma.vmem_to_hbm [thread:$0]  %s5264_s30, 16, %s9824_s4, [#allocation4]   ;;  %v5234_v58 = vadd.f32 %v5233_v41, %v5201_v25  ;;  %v5207_v36 = vpop.xlane.xlu1 %5206  ;;  %v5254_v4 = vld [vmem:[#allocation11] sm:$0x1] }
 0x5de   :  { %s6401_s4 = smov [#allocation11]  }
 0x5df   :  { %v5235_v27 = vadd.f32 %v5234_v58, %v5204_v44  ;;  %s5273_s27 = sshll.u32 %s6401_s4, 4  ;;  %s5274_s27 = int_to_ptr.vmem [resolvable:$true] %s5273_s27 }
 0x5e0   :  { %s6360_s28 = scalar_lea.vmem %s5274_s27, 16  ;;  %s6364_s29 = scalar_lea.vmem %s5274_s27, 32 }
 0x5e1   :  { %v5216_v29 = vpop.xlane.xlu1 %5215  ;;  %v5236_v2 = vadd.f32 %v5235_v27, %v5207_v36  ;;  %p6361_p12 = scmp.ne.s32.totalorder %s5274_s27, %s6360_s28  ;;  %p6365_p13 = scmp.lt.s32.totalorder %s5274_s27, %s5274_s27 }
 0x5e2   :  { %p6366_p0 = scmp.lt.s32.totalorder %s6364_s29, %s6360_s28 }
 0x5e3   :  { %v5237_v48 = vadd.f32 %v5236_v2, %v5210_v9 }
 0x5e4   :  { %p6367_p1 = por %p6366_p0, %p6365_p13 }
 0x5e5   :  { %v5213_v17 = vpop.xlane.xlu1 %5212 }
 0x5e6   :  { %v5238_v60 = vadd.f32 %v5237_v48, %v5213_v17  ;;  %p6368_p2 = pnand %p6367_p1, %p6361_p12 }
 0x5e8   :  { %v5239_v39 = vadd.f32 %v5238_v60, %v5216_v29 }
 0x5e9   :  { %v5222_v56 = vpop.xlane.xlu1 %5221 }
 0x5ed   :  { %v5219_v34 = vpop.xlane.xlu1 %5218 }
 0x5ee   :  { %v5240_v12 = vadd.f32 %v5239_v39, %v5219_v34 }
 0x5f0   :  { %v5241_v28 = vadd.f32 %v5240_v12, %v5222_v56 }
 0x5f1   :  { %v5225_v57 = vpop.xlane.xlu1 %5224 }
 0x5f2   :  { %v5242_v19 = vadd.f32 %v5241_v28, %v5225_v57 }
 0x5f5   :  { %v5228_v47 = vpop.xlane.xlu1 %5227 }
 0x5f6   :  { %v5243_v32 = vadd.f32 %v5242_v19, %v5228_v47 }
 0x5f8   :  { %v5244_v45 = vrot.slane %v5243_v32, 4 }
 0x5fa   :  { %v5245_v0 = vadd.f32 %v5244_v45, %v5243_v32 }
 0x5fc   :  { %v5246_v26 = vrot.slane %v5245_v0, 2 }
 0x5fe   :  { %v5247_v55 = vadd.f32 %v5246_v26, %v5245_v0 }
 0x600   :  { %v5248_v6 = vrot.slane %v5247_v55, 1 }
 0x602   :  { %v5249_v22 = vadd.f32 %v5248_v6, %v5247_v55 }
 0x604   :  { %v5255_v61 = vadd.f32 %v5254_v4, %v5249_v22 }
 0x606   :  { %5256 = vst.msk [vmem:[#allocation11] sm:$0x1] %vm94_vm2, %v5255_v61 }
 0x607   :  { %6371 = shalt.err (!%p6368_p2)
}
 0x608   :  { %s6372_s7 = scalar_lea.hbm %s9825_s5, 16 }
 0x609   :  { %p6373_p3 = scmp.ne.s32.totalorder %s9825_s5, %s6372_s7  ;;  %p6376_p4 = scmp.lt.u32.totalorder %s6372_s7, %s9825_s5 }
 0x60b   :  { %p6378_p5 = pnand %p6376_p4, %p6373_p3 }
 0x60d   :  { %6381 = shalt.err (!%p6378_p5)
}
 0x60e   :  { %5276 = dma.vmem_to_hbm [thread:$0]  %s5274_s27, 16, %s9825_s5, [#allocation12]  }
 0x60f   :  { %6388 = dma.done.wait [#allocation4], 16  }
 0x610   :  { %6389 = vsyncadd [#allocation4], 4294967280 }
 0x611   :  { %6390 = dma.done.wait [#allocation12], 16  }
 0x612   :  { %6391 = vsyncadd [#allocation12], 4294967280 }
 0x613   :  { %5283 = vsyncpa [#allocation3], 1 }
 0x614   :  { %5284 = vsyncpa [#allocation6], 1 }
 0x615   :  { %5285 = vsyncpa [#allocation9], 1 }
 0x616   :  { %5286 = vsyncpa [#allocation4], 1 }
 0x617   :  { %5287 = vsyncpa [#allocation12], 1 }

</bundles_post_ra>
